<compile_context>
chip_gen: v7x
topology: tpu7x:2x2x1
jax: 0.10.0
libtpu: 0.0.40
codegen_flags: <defaults>
</compile_context>

<pallas_src>
import numpy as np
import jax
import jax.numpy as jnp
from jax.experimental import pallas as pl
from jax.experimental.pallas import tpu as pltpu

HEAD_PAD = 128  # lane-dense padded width of the fused value+action head output


# ----------------------------------------------------------------------------
# Fused Pallas kernel (one sample per grid step)
# ----------------------------------------------------------------------------
def _cnn_policy_kernel(x_ref,
                       s1_ref, w1_ref, b1_ref,
                       s2_ref, w2_ref, b2_ref,
                       s3_ref, w3_ref, b3_ref,
                       fw_ref, fb_ref,
                       hw_ref, hb_ref,
                       out_ref):
    """Full CNNPolicy forward for one sample; activations never leave VMEM."""

    def conv_relu(act_bf16, s_ref, w_ref, b_ref):
        # act: (P_in, Cin) bf16 (rows = spatial positions, lanes = channels)
        # s_ref: (taps, P_out, P_in) constant 0/1 gather matrices (im2col taps)
        # w_ref: (taps, Cin, Cout) per-tap conv weights; b_ref: (1, Cout) f32
        taps = s_ref.shape[0]
        acc = None
        for t in range(taps):                      # static unroll (kh*kw taps)
            rows = jnp.dot(s_ref[t], act_bf16,
                           preferred_element_type=jnp.float32)   # (P_out, Cin)
            y = jnp.dot(rows.astype(jnp.bfloat16), w_ref[t],
                        preferred_element_type=jnp.float32)      # (P_out, Cout)
            acc = y if acc is None else acc + y
        return jnp.maximum(acc + b_ref[...], 0.0)                # f32

    x = x_ref[0]                                                 # (H*W, Cin) bf16
    a = conv_relu(x, s1_ref, w1_ref, b1_ref)
    a = conv_relu(a.astype(jnp.bfloat16), s2_ref, w2_ref, b2_ref)
    a = conv_relu(a.astype(jnp.bfloat16), s3_ref, w3_ref, b3_ref)  # (P3, C3) f32

    # fc1 + tanh; the flatten is folded into the (P3, C3, hidden) weight layout.
    h = None
    for p in range(fw_ref.shape[0]):               # P3 is tiny (1 here)
        c = jnp.dot(a[p:p + 1, :].astype(jnp.bfloat16), fw_ref[p],
                    preferred_element_type=jnp.float32)          # (1, hidden)
        h = c if h is None else h + c
    h = jnp.tanh(h + fb_ref[...])

    # Fused value/action head: one matmul, one lane-dense (1, 128) store.
    out = jnp.dot(h.astype(jnp.bfloat16), hw_ref[...],
                  preferred_element_type=jnp.float32) + hb_ref[...]
    out_ref[0] = out.astype(out_ref.dtype)


# ----------------------------------------------------------------------------
# One-time parameter preprocessing (hoisted out of the per-step forward)
# ----------------------------------------------------------------------------
def _conv_out(size, k, stride):
    return (size - k) // stride + 1


def _build_selection(h, w, k, stride):
    """0/1 gather matrices implementing strided im2col taps for one conv layer."""
    ho, wo = _conv_out(h, k, stride), _conv_out(w, k, stride)
    sel = np.zeros((k * k, ho * wo, h * w), dtype=np.float32)
    for i in range(k):
        for j in range(k):
            t = i * k + j
            for oy in range(ho):
                for ox in range(wo):
                    q = (stride * oy + i) * w + (stride * ox + j)
                    sel[t, oy * wo + ox, q] = 1.0
    return sel, ho, wo


def preprocess_params(params, input_shape, kernel_sizes, strides):
    """Build gather matrices, reshape/concat/pad weights, cast MXU inputs to bf16."""
    cin, hh, ww = input_shape
    del cin
    ops = {}
    for l in range(3):
        k, s = kernel_sizes[l], strides[l]
        sel, hh, ww = _build_selection(hh, ww, k, s)
        cw = params[f"cw{l + 1}"]                                  # (k, k, Cin, Cout)
        kk = cw.shape[0]
        ci, co = cw.shape[2], cw.shape[3]
        ops[f"s{l + 1}"] = jnp.asarray(sel, dtype=jnp.bfloat16)    # exact in bf16
        ops[f"w{l + 1}"] = cw.reshape(kk * kk, ci, co).astype(jnp.bfloat16)
        ops[f"b{l + 1}"] = params[f"cb{l + 1}"].reshape(1, co).astype(jnp.float32)
    p3 = hh * ww
    c3 = params["cw3"].shape[-1]
    hidden = params["w1"].shape[-1]
    action_dim = params["wa"].shape[-1]
    # fc1 rows are in (spatial-major, channel-minor) order — the flatten order the
    # kernel produces.  Loading real PyTorch (NCHW-flatten) fc1 weights would need
    # a row permutation here; identical when conv3's output is 1x1 spatial.
    ops["fw"] = params["w1"].reshape(p3, c3, hidden).astype(jnp.bfloat16)
    ops["fb"] = params["b1"].reshape(1, hidden).astype(jnp.float32)
    pad = HEAD_PAD - 1 - action_dim
    hw = jnp.concatenate(
        [params["wv"], params["wa"], jnp.zeros((hidden, pad), jnp.float32)], axis=1)
    hb = jnp.concatenate(
        [params["bv"], params["ba"], jnp.zeros((1, pad), jnp.float32)], axis=1)
    ops["hw"] = hw.astype(jnp.bfloat16)
    ops["hb"] = hb.astype(jnp.float32)
    ops["action_dim"] = action_dim
    return ops


# ----------------------------------------------------------------------------
# Forward wrapper (single pallas_call)
# ----------------------------------------------------------------------------
def cnn_policy_forward(x_nchw, ops, cfg):
    n, cin, h, w = x_nchw.shape
    # NCHW -> (N, H*W, Cin): rows = spatial positions, lanes = channels (bf16 feed).
    x = jnp.transpose(x_nchw, (0, 2, 3, 1)).reshape(n, h * w, cin).astype(jnp.bfloat16)

    operands = [x,
                ops["s1"], ops["w1"], ops["b1"],
                ops["s2"], ops["w2"], ops["b2"],
                ops["s3"], ops["w3"], ops["b3"],
                ops["fw"], ops["fb"], ops["hw"], ops["hb"]]

    def full_spec(arr):
        # Whole array as one block; constant index map -> fetched to VMEM once.
        return pl.BlockSpec(arr.shape, lambda b, nd=arr.ndim: (0,) * nd)

    in_specs = [pl.BlockSpec((1, h * w, cin), lambda b: (b, 0, 0))]
    in_specs += [full_spec(a) for a in operands[1:]]

    out = pl.pallas_call(
        _cnn_policy_kernel,
        out_shape=jax.ShapeDtypeStruct((n, 1, HEAD_PAD), jnp.float32),
        grid=(n,),
        in_specs=in_specs,
        out_specs=pl.BlockSpec((1, 1, HEAD_PAD), lambda b: (b, 0, 0)),
        compiler_params=pltpu.CompilerParams(
            dimension_semantics=("parallel",)),      # v7x: batch split across TCs
    )(*operands)

    out = out.reshape(n, HEAD_PAD)
    a_dim = ops["action_dim"]
    v = out[:, :1]
    ac_mean = out[:, 1:1 + a_dim]
    # ac_std = self.std(ac_mean): constant log-std broadcast -> done in the wrapper.
    # TODO(synk): replace the linear anneal below with the real Policy.std()
    # schedule if its source becomes available.
    ratio = cfg["n"] / cfg["total_n"]
    logstd = (1.0 - ratio) * cfg["std_start"] + ratio * cfg["std_stop"]
    ac_std = jnp.full((n, a_dim), logstd, dtype=jnp.float32)
    return v, ac_mean, ac_std


# ----------------------------------------------------------------------------
# Deterministic parameter init + pure-JAX reference + driver
# ----------------------------------------------------------------------------
def init_params(key, input_shape, feature_maps, kernel_sizes, strides, hidden,
                action_shape):
    cin, h, w = input_shape
    for k, s in zip(kernel_sizes, strides):
        h, w = _conv_out(h, k, s), _conv_out(w, k, s)
    total_conv_out = feature_maps[2] * h * w

    keys = jax.random.split(key, 12)

    def rnd(k_, shape, scale=0.1):
        return scale * jax.random.normal(k_, shape, dtype=jnp.float32)

    chans = [cin] + list(feature_maps)
    params = {}
    for l in range(3):
        params[f"cw{l + 1}"] = rnd(
            keys[2 * l], (kernel_sizes[l], kernel_sizes[l], chans[l], chans[l + 1]))
        params[f"cb{l + 1}"] = rnd(keys[2 * l + 1], (chans[l + 1],))
    params["w1"] = rnd(keys[6], (total_conv_out, hidden))
    params["b1"] = rnd(keys[7], (hidden,))
    params["wv"] = rnd(keys[8], (hidden, 1))
    params["bv"] = rnd(keys[9], (1, 1))
    params["wa"] = rnd(keys[10], (hidden, action_shape))
    params["ba"] = rnd(keys[11], (1, action_shape))
    return params, total_conv_out


def reference_forward(x_nchw, params, cfg, action_shape):
    """Pure-JAX f32 reference (independent formulation via lax.conv)."""
    x = jnp.transpose(x_nchw, (0, 2, 3, 1)).astype(jnp.float32)
    for l in range(3):
        w = params[f"cw{l + 1}"]
        b = params[f"cb{l + 1}"]
        x = jax.lax.conv_general_dilated(
            x, w, (cfg["strides"][l],) * 2, "VALID",
            dimension_numbers=("NHWC", "HWIO", "NHWC"))
        x = jnp.maximum(x + b, 0.0)
    n = x.shape[0]
    xf = x.reshape(n, -1)
    h = jnp.tanh(xf @ params["w1"] + params["b1"])
    v = h @ params["wv"] + params["bv"]
    mean = h @ params["wa"] + params["ba"]
    ratio = cfg["n"] / cfg["total_n"]
    logstd = (1.0 - ratio) * cfg["std_start"] + ratio * cfg["std_stop"]
    std = jnp.full((n, action_shape), logstd, jnp.float32)
    return v, mean, std


if __name__ == "__main__":
    batch = 2
    input_shape = (4, 16, 16)          # (C, H, W)
    feature_maps = [16, 16, 8]
    kernel_sizes = [3, 3, 3]
    strides = [2, 2, 2]
    hidden = 32
    action_shape = 2

    cfg = {"strides": strides, "std_start": -0.6, "std_stop": -1.7,
           "n": 0, "total_n": 1000}

    key = jax.random.PRNGKey(0)
    pkey, xkey = jax.random.split(key)
    params, _ = init_params(pkey, input_shape, feature_maps, kernel_sizes,
                            strides, hidden, action_shape)
    ops = preprocess_params(params, input_shape, kernel_sizes, strides)

    x = jax.random.normal(xkey, (batch,) + input_shape, dtype=jnp.float32)  # NCHW

    v, ac_mean, ac_std = cnn_policy_forward(x, ops, cfg)
    jax.block_until_ready((v, ac_mean, ac_std))

    assert v.shape == (batch, 1)
    assert ac_mean.shape == (batch, action_shape)
    assert ac_std.shape == (batch, action_shape)
    assert bool(jnp.all(jnp.isfinite(v)))
    assert bool(jnp.all(jnp.isfinite(ac_mean)))

    # Numerical check vs. f32 reference (bf16 MXU inputs, f32 accumulation).
    v_ref, mean_ref, std_ref = reference_forward(x, params, cfg, action_shape)
    assert float(jnp.max(jnp.abs(v - v_ref))) < 5e-2
    assert float(jnp.max(jnp.abs(ac_mean - mean_ref))) < 5e-2
    assert bool(jnp.allclose(ac_std, std_ref))

    print("KERNEL_OK")
</pallas_src>

<mosaic_0001>
module attributes {stable_mosaic.version = 11 : i64} {
  func.func @_cnn_policy_kernel(%arg0: i32, %arg1: memref<1x256x4xbf16, #tpu.memory_space<vmem>>, %arg2: memref<9x49x256xbf16, #tpu.memory_space<vmem>>, %arg3: memref<9x4x16xbf16, #tpu.memory_space<vmem>>, %arg4: memref<1x16xf32, #tpu.memory_space<vmem>>, %arg5: memref<9x9x49xbf16, #tpu.memory_space<vmem>>, %arg6: memref<9x16x16xbf16, #tpu.memory_space<vmem>>, %arg7: memref<1x16xf32, #tpu.memory_space<vmem>>, %arg8: memref<9x1x9xbf16, #tpu.memory_space<vmem>>, %arg9: memref<9x16x8xbf16, #tpu.memory_space<vmem>>, %arg10: memref<1x8xf32, #tpu.memory_space<vmem>>, %arg11: memref<1x8x32xbf16, #tpu.memory_space<vmem>>, %arg12: memref<1x32xf32, #tpu.memory_space<vmem>>, %arg13: memref<32x128xbf16, #tpu.memory_space<vmem>>, %arg14: memref<1x128xf32, #tpu.memory_space<vmem>>, %arg15: memref<1x1x128xf32, #tpu.memory_space<vmem>>) attributes {dimension_semantics = [#tpu.dimension_semantics<parallel>], iteration_bounds = array<i64: 2>, scalar_prefetch = 0 : i64, scratch_operands = 0 : i64, tpu.core_type = #tpu.core_type<tc>, window_params = [{transform_indices = @transform_0, window_bounds = array<i64: 1, 256, 4>}, {pipeline_mode = #tpu.pipeline_mode<synchronous>, transform_indices = @transform_1, window_bounds = array<i64: 9, 49, 256>}, {pipeline_mode = #tpu.pipeline_mode<synchronous>, transform_indices = @transform_2, window_bounds = array<i64: 9, 4, 16>}, {pipeline_mode = #tpu.pipeline_mode<synchronous>, transform_indices = @transform_3, window_bounds = array<i64: 1, 16>}, {pipeline_mode = #tpu.pipeline_mode<synchronous>, transform_indices = @transform_4, window_bounds = array<i64: 9, 9, 49>}, {pipeline_mode = #tpu.pipeline_mode<synchronous>, transform_indices = @transform_5, window_bounds = array<i64: 9, 16, 16>}, {pipeline_mode = #tpu.pipeline_mode<synchronous>, transform_indices = @transform_6, window_bounds = array<i64: 1, 16>}, {pipeline_mode = #tpu.pipeline_mode<synchronous>, transform_indices = @transform_7, window_bounds = array<i64: 9, 1, 9>}, {pipeline_mode = #tpu.pipeline_mode<synchronous>, transform_indices = @transform_8, window_bounds = array<i64: 9, 16, 8>}, {pipeline_mode = #tpu.pipeline_mode<synchronous>, transform_indices = @transform_9, window_bounds = array<i64: 1, 8>}, {pipeline_mode = #tpu.pipeline_mode<synchronous>, transform_indices = @transform_10, window_bounds = array<i64: 1, 8, 32>}, {pipeline_mode = #tpu.pipeline_mode<synchronous>, transform_indices = @transform_11, window_bounds = array<i64: 1, 32>}, {pipeline_mode = #tpu.pipeline_mode<synchronous>, transform_indices = @transform_12, window_bounds = array<i64: 32, 128>}, {pipeline_mode = #tpu.pipeline_mode<synchronous>, transform_indices = @transform_13, window_bounds = array<i64: 1, 128>}, {transform_indices = @transform_14, window_bounds = array<i64: 1, 1, 128>}]} {
    %c0 = arith.constant 0 : index
    %c0_0 = arith.constant 0 : index
    %c0_1 = arith.constant 0 : index
    %0 = vector.load %arg1[%c0, %c0_0, %c0_1] : memref<1x256x4xbf16, #tpu.memory_space<vmem>>, vector<1x256x4xbf16>
    %1 = vector.shape_cast %0 : vector<1x256x4xbf16> to vector<256x4xbf16>
    %c0_2 = arith.constant 0 : index
    %c0_3 = arith.constant 0 : index
    %c0_4 = arith.constant 0 : index
    %2 = vector.load %arg2[%c0_2, %c0_3, %c0_4] : memref<9x49x256xbf16, #tpu.memory_space<vmem>>, vector<1x49x256xbf16>
    %3 = vector.shape_cast %2 : vector<1x49x256xbf16> to vector<49x256xbf16>
    %cst = arith.constant dense<0.000000e+00> : vector<49x4xf32>
    %4 = tpu.matmul %3, %1, %cst {dimension_numbers = #tpu.dot_dimension_numbers<[1], [0], [0], [1], [0, 0, 1, 1], [], []>} : vector<49x256xbf16>, vector<256x4xbf16>, vector<49x4xf32> -> vector<49x4xf32>
    %5 = arith.truncf %4 : vector<49x4xf32> to vector<49x4xbf16>
    %c0_5 = arith.constant 0 : index
    %c0_6 = arith.constant 0 : index
    %c0_7 = arith.constant 0 : index
    %6 = vector.load %arg3[%c0_5, %c0_6, %c0_7] : memref<9x4x16xbf16, #tpu.memory_space<vmem>>, vector<1x4x16xbf16>
    %7 = vector.shape_cast %6 : vector<1x4x16xbf16> to vector<4x16xbf16>
    %cst_8 = arith.constant dense<0.000000e+00> : vector<49x16xf32>
    %8 = tpu.matmul %5, %7, %cst_8 {dimension_numbers = #tpu.dot_dimension_numbers<[1], [0], [0], [1], [0, 0, 1, 1], [], []>} : vector<49x4xbf16>, vector<4x16xbf16>, vector<49x16xf32> -> vector<49x16xf32>
    %c1 = arith.constant 1 : index
    %c0_9 = arith.constant 0 : index
    %c0_10 = arith.constant 0 : index
    %9 = vector.load %arg2[%c1, %c0_9, %c0_10] : memref<9x49x256xbf16, #tpu.memory_space<vmem>>, vector<1x49x256xbf16>
    %10 = vector.shape_cast %9 : vector<1x49x256xbf16> to vector<49x256xbf16>
    %cst_11 = arith.constant dense<0.000000e+00> : vector<49x4xf32>
    %11 = tpu.matmul %10, %1, %cst_11 {dimension_numbers = #tpu.dot_dimension_numbers<[1], [0], [0], [1], [0, 0, 1, 1], [], []>} : vector<49x256xbf16>, vector<256x4xbf16>, vector<49x4xf32> -> vector<49x4xf32>
    %12 = arith.truncf %11 : vector<49x4xf32> to vector<49x4xbf16>
    %c1_12 = arith.constant 1 : index
    %c0_13 = arith.constant 0 : index
    %c0_14 = arith.constant 0 : index
    %13 = vector.load %arg3[%c1_12, %c0_13, %c0_14] : memref<9x4x16xbf16, #tpu.memory_space<vmem>>, vector<1x4x16xbf16>
    %14 = vector.shape_cast %13 : vector<1x4x16xbf16> to vector<4x16xbf16>
    %cst_15 = arith.constant dense<0.000000e+00> : vector<49x16xf32>
    %15 = tpu.matmul %12, %14, %cst_15 {dimension_numbers = #tpu.dot_dimension_numbers<[1], [0], [0], [1], [0, 0, 1, 1], [], []>} : vector<49x4xbf16>, vector<4x16xbf16>, vector<49x16xf32> -> vector<49x16xf32>
    %16 = arith.addf %8, %15 : vector<49x16xf32>
    %c2 = arith.constant 2 : index
    %c0_16 = arith.constant 0 : index
    %c0_17 = arith.constant 0 : index
    %17 = vector.load %arg2[%c2, %c0_16, %c0_17] : memref<9x49x256xbf16, #tpu.memory_space<vmem>>, vector<1x49x256xbf16>
    %18 = vector.shape_cast %17 : vector<1x49x256xbf16> to vector<49x256xbf16>
    %cst_18 = arith.constant dense<0.000000e+00> : vector<49x4xf32>
    %19 = tpu.matmul %18, %1, %cst_18 {dimension_numbers = #tpu.dot_dimension_numbers<[1], [0], [0], [1], [0, 0, 1, 1], [], []>} : vector<49x256xbf16>, vector<256x4xbf16>, vector<49x4xf32> -> vector<49x4xf32>
    %20 = arith.truncf %19 : vector<49x4xf32> to vector<49x4xbf16>
    %c2_19 = arith.constant 2 : index
    %c0_20 = arith.constant 0 : index
    %c0_21 = arith.constant 0 : index
    %21 = vector.load %arg3[%c2_19, %c0_20, %c0_21] : memref<9x4x16xbf16, #tpu.memory_space<vmem>>, vector<1x4x16xbf16>
    %22 = vector.shape_cast %21 : vector<1x4x16xbf16> to vector<4x16xbf16>
    %cst_22 = arith.constant dense<0.000000e+00> : vector<49x16xf32>
    %23 = tpu.matmul %20, %22, %cst_22 {dimension_numbers = #tpu.dot_dimension_numbers<[1], [0], [0], [1], [0, 0, 1, 1], [], []>} : vector<49x4xbf16>, vector<4x16xbf16>, vector<49x16xf32> -> vector<49x16xf32>
    %24 = arith.addf %16, %23 : vector<49x16xf32>
    %c3 = arith.constant 3 : index
    %c0_23 = arith.constant 0 : index
    %c0_24 = arith.constant 0 : index
    %25 = vector.load %arg2[%c3, %c0_23, %c0_24] : memref<9x49x256xbf16, #tpu.memory_space<vmem>>, vector<1x49x256xbf16>
    %26 = vector.shape_cast %25 : vector<1x49x256xbf16> to vector<49x256xbf16>
    %cst_25 = arith.constant dense<0.000000e+00> : vector<49x4xf32>
    %27 = tpu.matmul %26, %1, %cst_25 {dimension_numbers = #tpu.dot_dimension_numbers<[1], [0], [0], [1], [0, 0, 1, 1], [], []>} : vector<49x256xbf16>, vector<256x4xbf16>, vector<49x4xf32> -> vector<49x4xf32>
    %28 = arith.truncf %27 : vector<49x4xf32> to vector<49x4xbf16>
    %c3_26 = arith.constant 3 : index
    %c0_27 = arith.constant 0 : index
    %c0_28 = arith.constant 0 : index
    %29 = vector.load %arg3[%c3_26, %c0_27, %c0_28] : memref<9x4x16xbf16, #tpu.memory_space<vmem>>, vector<1x4x16xbf16>
    %30 = vector.shape_cast %29 : vector<1x4x16xbf16> to vector<4x16xbf16>
    %cst_29 = arith.constant dense<0.000000e+00> : vector<49x16xf32>
    %31 = tpu.matmul %28, %30, %cst_29 {dimension_numbers = #tpu.dot_dimension_numbers<[1], [0], [0], [1], [0, 0, 1, 1], [], []>} : vector<49x4xbf16>, vector<4x16xbf16>, vector<49x16xf32> -> vector<49x16xf32>
    %32 = arith.addf %24, %31 : vector<49x16xf32>
    %c4 = arith.constant 4 : index
    %c0_30 = arith.constant 0 : index
    %c0_31 = arith.constant 0 : index
    %33 = vector.load %arg2[%c4, %c0_30, %c0_31] : memref<9x49x256xbf16, #tpu.memory_space<vmem>>, vector<1x49x256xbf16>
    %34 = vector.shape_cast %33 : vector<1x49x256xbf16> to vector<49x256xbf16>
    %cst_32 = arith.constant dense<0.000000e+00> : vector<49x4xf32>
    %35 = tpu.matmul %34, %1, %cst_32 {dimension_numbers = #tpu.dot_dimension_numbers<[1], [0], [0], [1], [0, 0, 1, 1], [], []>} : vector<49x256xbf16>, vector<256x4xbf16>, vector<49x4xf32> -> vector<49x4xf32>
    %36 = arith.truncf %35 : vector<49x4xf32> to vector<49x4xbf16>
    %c4_33 = arith.constant 4 : index
    %c0_34 = arith.constant 0 : index
    %c0_35 = arith.constant 0 : index
    %37 = vector.load %arg3[%c4_33, %c0_34, %c0_35] : memref<9x4x16xbf16, #tpu.memory_space<vmem>>, vector<1x4x16xbf16>
    %38 = vector.shape_cast %37 : vector<1x4x16xbf16> to vector<4x16xbf16>
    %cst_36 = arith.constant dense<0.000000e+00> : vector<49x16xf32>
    %39 = tpu.matmul %36, %38, %cst_36 {dimension_numbers = #tpu.dot_dimension_numbers<[1], [0], [0], [1], [0, 0, 1, 1], [], []>} : vector<49x4xbf16>, vector<4x16xbf16>, vector<49x16xf32> -> vector<49x16xf32>
    %40 = arith.addf %32, %39 : vector<49x16xf32>
    %c5 = arith.constant 5 : index
    %c0_37 = arith.constant 0 : index
    %c0_38 = arith.constant 0 : index
    %41 = vector.load %arg2[%c5, %c0_37, %c0_38] : memref<9x49x256xbf16, #tpu.memory_space<vmem>>, vector<1x49x256xbf16>
    %42 = vector.shape_cast %41 : vector<1x49x256xbf16> to vector<49x256xbf16>
    %cst_39 = arith.constant dense<0.000000e+00> : vector<49x4xf32>
    %43 = tpu.matmul %42, %1, %cst_39 {dimension_numbers = #tpu.dot_dimension_numbers<[1], [0], [0], [1], [0, 0, 1, 1], [], []>} : vector<49x256xbf16>, vector<256x4xbf16>, vector<49x4xf32> -> vector<49x4xf32>
    %44 = arith.truncf %43 : vector<49x4xf32> to vector<49x4xbf16>
    %c5_40 = arith.constant 5 : index
    %c0_41 = arith.constant 0 : index
    %c0_42 = arith.constant 0 : index
    %45 = vector.load %arg3[%c5_40, %c0_41, %c0_42] : memref<9x4x16xbf16, #tpu.memory_space<vmem>>, vector<1x4x16xbf16>
    %46 = vector.shape_cast %45 : vector<1x4x16xbf16> to vector<4x16xbf16>
    %cst_43 = arith.constant dense<0.000000e+00> : vector<49x16xf32>
    %47 = tpu.matmul %44, %46, %cst_43 {dimension_numbers = #tpu.dot_dimension_numbers<[1], [0], [0], [1], [0, 0, 1, 1], [], []>} : vector<49x4xbf16>, vector<4x16xbf16>, vector<49x16xf32> -> vector<49x16xf32>
    %48 = arith.addf %40, %47 : vector<49x16xf32>
    %c6 = arith.constant 6 : index
    %c0_44 = arith.constant 0 : index
    %c0_45 = arith.constant 0 : index
    %49 = vector.load %arg2[%c6, %c0_44, %c0_45] : memref<9x49x256xbf16, #tpu.memory_space<vmem>>, vector<1x49x256xbf16>
    %50 = vector.shape_cast %49 : vector<1x49x256xbf16> to vector<49x256xbf16>
    %cst_46 = arith.constant dense<0.000000e+00> : vector<49x4xf32>
    %51 = tpu.matmul %50, %1, %cst_46 {dimension_numbers = #tpu.dot_dimension_numbers<[1], [0], [0], [1], [0, 0, 1, 1], [], []>} : vector<49x256xbf16>, vector<256x4xbf16>, vector<49x4xf32> -> vector<49x4xf32>
    %52 = arith.truncf %51 : vector<49x4xf32> to vector<49x4xbf16>
    %c6_47 = arith.constant 6 : index
    %c0_48 = arith.constant 0 : index
    %c0_49 = arith.constant 0 : index
    %53 = vector.load %arg3[%c6_47, %c0_48, %c0_49] : memref<9x4x16xbf16, #tpu.memory_space<vmem>>, vector<1x4x16xbf16>
    %54 = vector.shape_cast %53 : vector<1x4x16xbf16> to vector<4x16xbf16>
    %cst_50 = arith.constant dense<0.000000e+00> : vector<49x16xf32>
    %55 = tpu.matmul %52, %54, %cst_50 {dimension_numbers = #tpu.dot_dimension_numbers<[1], [0], [0], [1], [0, 0, 1, 1], [], []>} : vector<49x4xbf16>, vector<4x16xbf16>, vector<49x16xf32> -> vector<49x16xf32>
    %56 = arith.addf %48, %55 : vector<49x16xf32>
    %c7 = arith.constant 7 : index
    %c0_51 = arith.constant 0 : index
    %c0_52 = arith.constant 0 : index
    %57 = vector.load %arg2[%c7, %c0_51, %c0_52] : memref<9x49x256xbf16, #tpu.memory_space<vmem>>, vector<1x49x256xbf16>
    %58 = vector.shape_cast %57 : vector<1x49x256xbf16> to vector<49x256xbf16>
    %cst_53 = arith.constant dense<0.000000e+00> : vector<49x4xf32>
    %59 = tpu.matmul %58, %1, %cst_53 {dimension_numbers = #tpu.dot_dimension_numbers<[1], [0], [0], [1], [0, 0, 1, 1], [], []>} : vector<49x256xbf16>, vector<256x4xbf16>, vector<49x4xf32> -> vector<49x4xf32>
    %60 = arith.truncf %59 : vector<49x4xf32> to vector<49x4xbf16>
    %c7_54 = arith.constant 7 : index
    %c0_55 = arith.constant 0 : index
    %c0_56 = arith.constant 0 : index
    %61 = vector.load %arg3[%c7_54, %c0_55, %c0_56] : memref<9x4x16xbf16, #tpu.memory_space<vmem>>, vector<1x4x16xbf16>
    %62 = vector.shape_cast %61 : vector<1x4x16xbf16> to vector<4x16xbf16>
    %cst_57 = arith.constant dense<0.000000e+00> : vector<49x16xf32>
    %63 = tpu.matmul %60, %62, %cst_57 {dimension_numbers = #tpu.dot_dimension_numbers<[1], [0], [0], [1], [0, 0, 1, 1], [], []>} : vector<49x4xbf16>, vector<4x16xbf16>, vector<49x16xf32> -> vector<49x16xf32>
    %64 = arith.addf %56, %63 : vector<49x16xf32>
    %c8 = arith.constant 8 : index
    %c0_58 = arith.constant 0 : index
    %c0_59 = arith.constant 0 : index
    %65 = vector.load %arg2[%c8, %c0_58, %c0_59] : memref<9x49x256xbf16, #tpu.memory_space<vmem>>, vector<1x49x256xbf16>
    %66 = vector.shape_cast %65 : vector<1x49x256xbf16> to vector<49x256xbf16>
    %cst_60 = arith.constant dense<0.000000e+00> : vector<49x4xf32>
    %67 = tpu.matmul %66, %1, %cst_60 {dimension_numbers = #tpu.dot_dimension_numbers<[1], [0], [0], [1], [0, 0, 1, 1], [], []>} : vector<49x256xbf16>, vector<256x4xbf16>, vector<49x4xf32> -> vector<49x4xf32>
    %68 = arith.truncf %67 : vector<49x4xf32> to vector<49x4xbf16>
    %c8_61 = arith.constant 8 : index
    %c0_62 = arith.constant 0 : index
    %c0_63 = arith.constant 0 : index
    %69 = vector.load %arg3[%c8_61, %c0_62, %c0_63] : memref<9x4x16xbf16, #tpu.memory_space<vmem>>, vector<1x4x16xbf16>
    %70 = vector.shape_cast %69 : vector<1x4x16xbf16> to vector<4x16xbf16>
    %cst_64 = arith.constant dense<0.000000e+00> : vector<49x16xf32>
    %71 = tpu.matmul %68, %70, %cst_64 {dimension_numbers = #tpu.dot_dimension_numbers<[1], [0], [0], [1], [0, 0, 1, 1], [], []>} : vector<49x4xbf16>, vector<4x16xbf16>, vector<49x16xf32> -> vector<49x16xf32>
    %72 = arith.addf %64, %71 : vector<49x16xf32>
    %c0_65 = arith.constant 0 : index
    %c0_66 = arith.constant 0 : index
    %73 = vector.load %arg4[%c0_65, %c0_66] : memref<1x16xf32, #tpu.memory_space<vmem>>, vector<1x16xf32>
    %74 = vector.broadcast %73 : vector<1x16xf32> to vector<49x16xf32>
    %75 = arith.addf %72, %74 : vector<49x16xf32>
    %cst_67 = arith.constant 0.000000e+00 : f32
    %76 = vector.broadcast %cst_67 : f32 to vector<49x16xf32>
    %77 = arith.maximumf %75, %76 : vector<49x16xf32>
    %78 = arith.truncf %77 : vector<49x16xf32> to vector<49x16xbf16>
    %c0_68 = arith.constant 0 : index
    %c0_69 = arith.constant 0 : index
    %c0_70 = arith.constant 0 : index
    %79 = vector.load %arg5[%c0_68, %c0_69, %c0_70] : memref<9x9x49xbf16, #tpu.memory_space<vmem>>, vector<1x9x49xbf16>
    %80 = vector.shape_cast %79 : vector<1x9x49xbf16> to vector<9x49xbf16>
    %cst_71 = arith.constant dense<0.000000e+00> : vector<9x16xf32>
    %81 = tpu.matmul %80, %78, %cst_71 {dimension_numbers = #tpu.dot_dimension_numbers<[1], [0], [0], [1], [0, 0, 1, 1], [], []>} : vector<9x49xbf16>, vector<49x16xbf16>, vector<9x16xf32> -> vector<9x16xf32>
    %82 = arith.truncf %81 : vector<9x16xf32> to vector<9x16xbf16>
    %c0_72 = arith.constant 0 : index
    %c0_73 = arith.constant 0 : index
    %c0_74 = arith.constant 0 : index
    %83 = vector.load %arg6[%c0_72, %c0_73, %c0_74] : memref<9x16x16xbf16, #tpu.memory_space<vmem>>, vector<1x16x16xbf16>
    %84 = vector.shape_cast %83 : vector<1x16x16xbf16> to vector<16x16xbf16>
    %cst_75 = arith.constant dense<0.000000e+00> : vector<9x16xf32>
    %85 = tpu.matmul %82, %84, %cst_75 {dimension_numbers = #tpu.dot_dimension_numbers<[1], [0], [0], [1], [0, 0, 1, 1], [], []>} : vector<9x16xbf16>, vector<16x16xbf16>, vector<9x16xf32> -> vector<9x16xf32>
    %c1_76 = arith.constant 1 : index
    %c0_77 = arith.constant 0 : index
    %c0_78 = arith.constant 0 : index
    %86 = vector.load %arg5[%c1_76, %c0_77, %c0_78] : memref<9x9x49xbf16, #tpu.memory_space<vmem>>, vector<1x9x49xbf16>
    %87 = vector.shape_cast %86 : vector<1x9x49xbf16> to vector<9x49xbf16>
    %cst_79 = arith.constant dense<0.000000e+00> : vector<9x16xf32>
    %88 = tpu.matmul %87, %78, %cst_79 {dimension_numbers = #tpu.dot_dimension_numbers<[1], [0], [0], [1], [0, 0, 1, 1], [], []>} : vector<9x49xbf16>, vector<49x16xbf16>, vector<9x16xf32> -> vector<9x16xf32>
    %89 = arith.truncf %88 : vector<9x16xf32> to vector<9x16xbf16>
    %c1_80 = arith.constant 1 : index
    %c0_81 = arith.constant 0 : index
    %c0_82 = arith.constant 0 : index
    %90 = vector.load %arg6[%c1_80, %c0_81, %c0_82] : memref<9x16x16xbf16, #tpu.memory_space<vmem>>, vector<1x16x16xbf16>
    %91 = vector.shape_cast %90 : vector<1x16x16xbf16> to vector<16x16xbf16>
    %cst_83 = arith.constant dense<0.000000e+00> : vector<9x16xf32>
    %92 = tpu.matmul %89, %91, %cst_83 {dimension_numbers = #tpu.dot_dimension_numbers<[1], [0], [0], [1], [0, 0, 1, 1], [], []>} : vector<9x16xbf16>, vector<16x16xbf16>, vector<9x16xf32> -> vector<9x16xf32>
    %93 = arith.addf %85, %92 : vector<9x16xf32>
    %c2_84 = arith.constant 2 : index
    %c0_85 = arith.constant 0 : index
    %c0_86 = arith.constant 0 : index
    %94 = vector.load %arg5[%c2_84, %c0_85, %c0_86] : memref<9x9x49xbf16, #tpu.memory_space<vmem>>, vector<1x9x49xbf16>
    %95 = vector.shape_cast %94 : vector<1x9x49xbf16> to vector<9x49xbf16>
    %cst_87 = arith.constant dense<0.000000e+00> : vector<9x16xf32>
    %96 = tpu.matmul %95, %78, %cst_87 {dimension_numbers = #tpu.dot_dimension_numbers<[1], [0], [0], [1], [0, 0, 1, 1], [], []>} : vector<9x49xbf16>, vector<49x16xbf16>, vector<9x16xf32> -> vector<9x16xf32>
    %97 = arith.truncf %96 : vector<9x16xf32> to vector<9x16xbf16>
    %c2_88 = arith.constant 2 : index
    %c0_89 = arith.constant 0 : index
    %c0_90 = arith.constant 0 : index
    %98 = vector.load %arg6[%c2_88, %c0_89, %c0_90] : memref<9x16x16xbf16, #tpu.memory_space<vmem>>, vector<1x16x16xbf16>
    %99 = vector.shape_cast %98 : vector<1x16x16xbf16> to vector<16x16xbf16>
    %cst_91 = arith.constant dense<0.000000e+00> : vector<9x16xf32>
    %100 = tpu.matmul %97, %99, %cst_91 {dimension_numbers = #tpu.dot_dimension_numbers<[1], [0], [0], [1], [0, 0, 1, 1], [], []>} : vector<9x16xbf16>, vector<16x16xbf16>, vector<9x16xf32> -> vector<9x16xf32>
    %101 = arith.addf %93, %100 : vector<9x16xf32>
    %c3_92 = arith.constant 3 : index
    %c0_93 = arith.constant 0 : index
    %c0_94 = arith.constant 0 : index
    %102 = vector.load %arg5[%c3_92, %c0_93, %c0_94] : memref<9x9x49xbf16, #tpu.memory_space<vmem>>, vector<1x9x49xbf16>
    %103 = vector.shape_cast %102 : vector<1x9x49xbf16> to vector<9x49xbf16>
    %cst_95 = arith.constant dense<0.000000e+00> : vector<9x16xf32>
    %104 = tpu.matmul %103, %78, %cst_95 {dimension_numbers = #tpu.dot_dimension_numbers<[1], [0], [0], [1], [0, 0, 1, 1], [], []>} : vector<9x49xbf16>, vector<49x16xbf16>, vector<9x16xf32> -> vector<9x16xf32>
    %105 = arith.truncf %104 : vector<9x16xf32> to vector<9x16xbf16>
    %c3_96 = arith.constant 3 : index
    %c0_97 = arith.constant 0 : index
    %c0_98 = arith.constant 0 : index
    %106 = vector.load %arg6[%c3_96, %c0_97, %c0_98] : memref<9x16x16xbf16, #tpu.memory_space<vmem>>, vector<1x16x16xbf16>
    %107 = vector.shape_cast %106 : vector<1x16x16xbf16> to vector<16x16xbf16>
    %cst_99 = arith.constant dense<0.000000e+00> : vector<9x16xf32>
    %108 = tpu.matmul %105, %107, %cst_99 {dimension_numbers = #tpu.dot_dimension_numbers<[1], [0], [0], [1], [0, 0, 1, 1], [], []>} : vector<9x16xbf16>, vector<16x16xbf16>, vector<9x16xf32> -> vector<9x16xf32>
    %109 = arith.addf %101, %108 : vector<9x16xf32>
    %c4_100 = arith.constant 4 : index
    %c0_101 = arith.constant 0 : index
    %c0_102 = arith.constant 0 : index
    %110 = vector.load %arg5[%c4_100, %c0_101, %c0_102] : memref<9x9x49xbf16, #tpu.memory_space<vmem>>, vector<1x9x49xbf16>
    %111 = vector.shape_cast %110 : vector<1x9x49xbf16> to vector<9x49xbf16>
    %cst_103 = arith.constant dense<0.000000e+00> : vector<9x16xf32>
    %112 = tpu.matmul %111, %78, %cst_103 {dimension_numbers = #tpu.dot_dimension_numbers<[1], [0], [0], [1], [0, 0, 1, 1], [], []>} : vector<9x49xbf16>, vector<49x16xbf16>, vector<9x16xf32> -> vector<9x16xf32>
    %113 = arith.truncf %112 : vector<9x16xf32> to vector<9x16xbf16>
    %c4_104 = arith.constant 4 : index
    %c0_105 = arith.constant 0 : index
    %c0_106 = arith.constant 0 : index
    %114 = vector.load %arg6[%c4_104, %c0_105, %c0_106] : memref<9x16x16xbf16, #tpu.memory_space<vmem>>, vector<1x16x16xbf16>
    %115 = vector.shape_cast %114 : vector<1x16x16xbf16> to vector<16x16xbf16>
    %cst_107 = arith.constant dense<0.000000e+00> : vector<9x16xf32>
    %116 = tpu.matmul %113, %115, %cst_107 {dimension_numbers = #tpu.dot_dimension_numbers<[1], [0], [0], [1], [0, 0, 1, 1], [], []>} : vector<9x16xbf16>, vector<16x16xbf16>, vector<9x16xf32> -> vector<9x16xf32>
    %117 = arith.addf %109, %116 : vector<9x16xf32>
    %c5_108 = arith.constant 5 : index
    %c0_109 = arith.constant 0 : index
    %c0_110 = arith.constant 0 : index
    %118 = vector.load %arg5[%c5_108, %c0_109, %c0_110] : memref<9x9x49xbf16, #tpu.memory_space<vmem>>, vector<1x9x49xbf16>
    %119 = vector.shape_cast %118 : vector<1x9x49xbf16> to vector<9x49xbf16>
    %cst_111 = arith.constant dense<0.000000e+00> : vector<9x16xf32>
    %120 = tpu.matmul %119, %78, %cst_111 {dimension_numbers = #tpu.dot_dimension_numbers<[1], [0], [0], [1], [0, 0, 1, 1], [], []>} : vector<9x49xbf16>, vector<49x16xbf16>, vector<9x16xf32> -> vector<9x16xf32>
    %121 = arith.truncf %120 : vector<9x16xf32> to vector<9x16xbf16>
    %c5_112 = arith.constant 5 : index
    %c0_113 = arith.constant 0 : index
    %c0_114 = arith.constant 0 : index
    %122 = vector.load %arg6[%c5_112, %c0_113, %c0_114] : memref<9x16x16xbf16, #tpu.memory_space<vmem>>, vector<1x16x16xbf16>
    %123 = vector.shape_cast %122 : vector<1x16x16xbf16> to vector<16x16xbf16>
    %cst_115 = arith.constant dense<0.000000e+00> : vector<9x16xf32>
    %124 = tpu.matmul %121, %123, %cst_115 {dimension_numbers = #tpu.dot_dimension_numbers<[1], [0], [0], [1], [0, 0, 1, 1], [], []>} : vector<9x16xbf16>, vector<16x16xbf16>, vector<9x16xf32> -> vector<9x16xf32>
    %125 = arith.addf %117, %124 : vector<9x16xf32>
    %c6_116 = arith.constant 6 : index
    %c0_117 = arith.constant 0 : index
    %c0_118 = arith.constant 0 : index
    %126 = vector.load %arg5[%c6_116, %c0_117, %c0_118] : memref<9x9x49xbf16, #tpu.memory_space<vmem>>, vector<1x9x49xbf16>
    %127 = vector.shape_cast %126 : vector<1x9x49xbf16> to vector<9x49xbf16>
    %cst_119 = arith.constant dense<0.000000e+00> : vector<9x16xf32>
    %128 = tpu.matmul %127, %78, %cst_119 {dimension_numbers = #tpu.dot_dimension_numbers<[1], [0], [0], [1], [0, 0, 1, 1], [], []>} : vector<9x49xbf16>, vector<49x16xbf16>, vector<9x16xf32> -> vector<9x16xf32>
    %129 = arith.truncf %128 : vector<9x16xf32> to vector<9x16xbf16>
    %c6_120 = arith.constant 6 : index
    %c0_121 = arith.constant 0 : index
    %c0_122 = arith.constant 0 : index
    %130 = vector.load %arg6[%c6_120, %c0_121, %c0_122] : memref<9x16x16xbf16, #tpu.memory_space<vmem>>, vector<1x16x16xbf16>
    %131 = vector.shape_cast %130 : vector<1x16x16xbf16> to vector<16x16xbf16>
    %cst_123 = arith.constant dense<0.000000e+00> : vector<9x16xf32>
    %132 = tpu.matmul %129, %131, %cst_123 {dimension_numbers = #tpu.dot_dimension_numbers<[1], [0], [0], [1], [0, 0, 1, 1], [], []>} : vector<9x16xbf16>, vector<16x16xbf16>, vector<9x16xf32> -> vector<9x16xf32>
    %133 = arith.addf %125, %132 : vector<9x16xf32>
    %c7_124 = arith.constant 7 : index
    %c0_125 = arith.constant 0 : index
    %c0_126 = arith.constant 0 : index
    %134 = vector.load %arg5[%c7_124, %c0_125, %c0_126] : memref<9x9x49xbf16, #tpu.memory_space<vmem>>, vector<1x9x49xbf16>
    %135 = vector.shape_cast %134 : vector<1x9x49xbf16> to vector<9x49xbf16>
    %cst_127 = arith.constant dense<0.000000e+00> : vector<9x16xf32>
    %136 = tpu.matmul %135, %78, %cst_127 {dimension_numbers = #tpu.dot_dimension_numbers<[1], [0], [0], [1], [0, 0, 1, 1], [], []>} : vector<9x49xbf16>, vector<49x16xbf16>, vector<9x16xf32> -> vector<9x16xf32>
    %137 = arith.truncf %136 : vector<9x16xf32> to vector<9x16xbf16>
    %c7_128 = arith.constant 7 : index
    %c0_129 = arith.constant 0 : index
    %c0_130 = arith.constant 0 : index
    %138 = vector.load %arg6[%c7_128, %c0_129, %c0_130] : memref<9x16x16xbf16, #tpu.memory_space<vmem>>, vector<1x16x16xbf16>
    %139 = vector.shape_cast %138 : vector<1x16x16xbf16> to vector<16x16xbf16>
    %cst_131 = arith.constant dense<0.000000e+00> : vector<9x16xf32>
    %140 = tpu.matmul %137, %139, %cst_131 {dimension_numbers = #tpu.dot_dimension_numbers<[1], [0], [0], [1], [0, 0, 1, 1], [], []>} : vector<9x16xbf16>, vector<16x16xbf16>, vector<9x16xf32> -> vector<9x16xf32>
    %141 = arith.addf %133, %140 : vector<9x16xf32>
    %c8_132 = arith.constant 8 : index
    %c0_133 = arith.constant 0 : index
    %c0_134 = arith.constant 0 : index
    %142 = vector.load %arg5[%c8_132, %c0_133, %c0_134] : memref<9x9x49xbf16, #tpu.memory_space<vmem>>, vector<1x9x49xbf16>
    %143 = vector.shape_cast %142 : vector<1x9x49xbf16> to vector<9x49xbf16>
    %cst_135 = arith.constant dense<0.000000e+00> : vector<9x16xf32>
    %144 = tpu.matmul %143, %78, %cst_135 {dimension_numbers = #tpu.dot_dimension_numbers<[1], [0], [0], [1], [0, 0, 1, 1], [], []>} : vector<9x49xbf16>, vector<49x16xbf16>, vector<9x16xf32> -> vector<9x16xf32>
    %145 = arith.truncf %144 : vector<9x16xf32> to vector<9x16xbf16>
    %c8_136 = arith.constant 8 : index
    %c0_137 = arith.constant 0 : index
    %c0_138 = arith.constant 0 : index
    %146 = vector.load %arg6[%c8_136, %c0_137, %c0_138] : memref<9x16x16xbf16, #tpu.memory_space<vmem>>, vector<1x16x16xbf16>
    %147 = vector.shape_cast %146 : vector<1x16x16xbf16> to vector<16x16xbf16>
    %cst_139 = arith.constant dense<0.000000e+00> : vector<9x16xf32>
    %148 = tpu.matmul %145, %147, %cst_139 {dimension_numbers = #tpu.dot_dimension_numbers<[1], [0], [0], [1], [0, 0, 1, 1], [], []>} : vector<9x16xbf16>, vector<16x16xbf16>, vector<9x16xf32> -> vector<9x16xf32>
    %149 = arith.addf %141, %148 : vector<9x16xf32>
    %c0_140 = arith.constant 0 : index
    %c0_141 = arith.constant 0 : index
    %150 = vector.load %arg7[%c0_140, %c0_141] : memref<1x16xf32, #tpu.memory_space<vmem>>, vector<1x16xf32>
    %151 = vector.broadcast %150 : vector<1x16xf32> to vector<9x16xf32>
    %152 = arith.addf %149, %151 : vector<9x16xf32>
    %cst_142 = arith.constant 0.000000e+00 : f32
    %153 = vector.broadcast %cst_142 : f32 to vector<9x16xf32>
    %154 = arith.maximumf %152, %153 : vector<9x16xf32>
    %155 = arith.truncf %154 : vector<9x16xf32> to vector<9x16xbf16>
    %c0_143 = arith.constant 0 : index
    %c0_144 = arith.constant 0 : index
    %c0_145 = arith.constant 0 : index
    %156 = vector.load %arg8[%c0_143, %c0_144, %c0_145] : memref<9x1x9xbf16, #tpu.memory_space<vmem>>, vector<1x1x9xbf16>
    %157 = vector.shape_cast %156 : vector<1x1x9xbf16> to vector<1x9xbf16>
    %cst_146 = arith.constant dense<0.000000e+00> : vector<1x16xf32>
    %158 = tpu.matmul %157, %155, %cst_146 {dimension_numbers = #tpu.dot_dimension_numbers<[1], [0], [0], [1], [0, 0, 1, 1], [], []>} : vector<1x9xbf16>, vector<9x16xbf16>, vector<1x16xf32> -> vector<1x16xf32>
    %159 = arith.truncf %158 : vector<1x16xf32> to vector<1x16xbf16>
    %c0_147 = arith.constant 0 : index
    %c0_148 = arith.constant 0 : index
    %c0_149 = arith.constant 0 : index
    %160 = vector.load %arg9[%c0_147, %c0_148, %c0_149] : memref<9x16x8xbf16, #tpu.memory_space<vmem>>, vector<1x16x8xbf16>
    %161 = vector.shape_cast %160 : vector<1x16x8xbf16> to vector<16x8xbf16>
    %cst_150 = arith.constant dense<0.000000e+00> : vector<1x8xf32>
    %162 = tpu.matmul %159, %161, %cst_150 {dimension_numbers = #tpu.dot_dimension_numbers<[1], [0], [0], [1], [0, 0, 1, 1], [], []>} : vector<1x16xbf16>, vector<16x8xbf16>, vector<1x8xf32> -> vector<1x8xf32>
    %c1_151 = arith.constant 1 : index
    %c0_152 = arith.constant 0 : index
    %c0_153 = arith.constant 0 : index
    %163 = vector.load %arg8[%c1_151, %c0_152, %c0_153] : memref<9x1x9xbf16, #tpu.memory_space<vmem>>, vector<1x1x9xbf16>
    %164 = vector.shape_cast %163 : vector<1x1x9xbf16> to vector<1x9xbf16>
    %cst_154 = arith.constant dense<0.000000e+00> : vector<1x16xf32>
    %165 = tpu.matmul %164, %155, %cst_154 {dimension_numbers = #tpu.dot_dimension_numbers<[1], [0], [0], [1], [0, 0, 1, 1], [], []>} : vector<1x9xbf16>, vector<9x16xbf16>, vector<1x16xf32> -> vector<1x16xf32>
    %166 = arith.truncf %165 : vector<1x16xf32> to vector<1x16xbf16>
    %c1_155 = arith.constant 1 : index
    %c0_156 = arith.constant 0 : index
    %c0_157 = arith.constant 0 : index
    %167 = vector.load %arg9[%c1_155, %c0_156, %c0_157] : memref<9x16x8xbf16, #tpu.memory_space<vmem>>, vector<1x16x8xbf16>
    %168 = vector.shape_cast %167 : vector<1x16x8xbf16> to vector<16x8xbf16>
    %cst_158 = arith.constant dense<0.000000e+00> : vector<1x8xf32>
    %169 = tpu.matmul %166, %168, %cst_158 {dimension_numbers = #tpu.dot_dimension_numbers<[1], [0], [0], [1], [0, 0, 1, 1], [], []>} : vector<1x16xbf16>, vector<16x8xbf16>, vector<1x8xf32> -> vector<1x8xf32>
    %170 = arith.addf %162, %169 : vector<1x8xf32>
    %c2_159 = arith.constant 2 : index
    %c0_160 = arith.constant 0 : index
    %c0_161 = arith.constant 0 : index
    %171 = vector.load %arg8[%c2_159, %c0_160, %c0_161] : memref<9x1x9xbf16, #tpu.memory_space<vmem>>, vector<1x1x9xbf16>
    %172 = vector.shape_cast %171 : vector<1x1x9xbf16> to vector<1x9xbf16>
    %cst_162 = arith.constant dense<0.000000e+00> : vector<1x16xf32>
    %173 = tpu.matmul %172, %155, %cst_162 {dimension_numbers = #tpu.dot_dimension_numbers<[1], [0], [0], [1], [0, 0, 1, 1], [], []>} : vector<1x9xbf16>, vector<9x16xbf16>, vector<1x16xf32> -> vector<1x16xf32>
    %174 = arith.truncf %173 : vector<1x16xf32> to vector<1x16xbf16>
    %c2_163 = arith.constant 2 : index
    %c0_164 = arith.constant 0 : index
    %c0_165 = arith.constant 0 : index
    %175 = vector.load %arg9[%c2_163, %c0_164, %c0_165] : memref<9x16x8xbf16, #tpu.memory_space<vmem>>, vector<1x16x8xbf16>
    %176 = vector.shape_cast %175 : vector<1x16x8xbf16> to vector<16x8xbf16>
    %cst_166 = arith.constant dense<0.000000e+00> : vector<1x8xf32>
    %177 = tpu.matmul %174, %176, %cst_166 {dimension_numbers = #tpu.dot_dimension_numbers<[1], [0], [0], [1], [0, 0, 1, 1], [], []>} : vector<1x16xbf16>, vector<16x8xbf16>, vector<1x8xf32> -> vector<1x8xf32>
    %178 = arith.addf %170, %177 : vector<1x8xf32>
    %c3_167 = arith.constant 3 : index
    %c0_168 = arith.constant 0 : index
    %c0_169 = arith.constant 0 : index
    %179 = vector.load %arg8[%c3_167, %c0_168, %c0_169] : memref<9x1x9xbf16, #tpu.memory_space<vmem>>, vector<1x1x9xbf16>
    %180 = vector.shape_cast %179 : vector<1x1x9xbf16> to vector<1x9xbf16>
    %cst_170 = arith.constant dense<0.000000e+00> : vector<1x16xf32>
    %181 = tpu.matmul %180, %155, %cst_170 {dimension_numbers = #tpu.dot_dimension_numbers<[1], [0], [0], [1], [0, 0, 1, 1], [], []>} : vector<1x9xbf16>, vector<9x16xbf16>, vector<1x16xf32> -> vector<1x16xf32>
    %182 = arith.truncf %181 : vector<1x16xf32> to vector<1x16xbf16>
    %c3_171 = arith.constant 3 : index
    %c0_172 = arith.constant 0 : index
    %c0_173 = arith.constant 0 : index
    %183 = vector.load %arg9[%c3_171, %c0_172, %c0_173] : memref<9x16x8xbf16, #tpu.memory_space<vmem>>, vector<1x16x8xbf16>
    %184 = vector.shape_cast %183 : vector<1x16x8xbf16> to vector<16x8xbf16>
    %cst_174 = arith.constant dense<0.000000e+00> : vector<1x8xf32>
    %185 = tpu.matmul %182, %184, %cst_174 {dimension_numbers = #tpu.dot_dimension_numbers<[1], [0], [0], [1], [0, 0, 1, 1], [], []>} : vector<1x16xbf16>, vector<16x8xbf16>, vector<1x8xf32> -> vector<1x8xf32>
    %186 = arith.addf %178, %185 : vector<1x8xf32>
    %c4_175 = arith.constant 4 : index
    %c0_176 = arith.constant 0 : index
    %c0_177 = arith.constant 0 : index
    %187 = vector.load %arg8[%c4_175, %c0_176, %c0_177] : memref<9x1x9xbf16, #tpu.memory_space<vmem>>, vector<1x1x9xbf16>
    %188 = vector.shape_cast %187 : vector<1x1x9xbf16> to vector<1x9xbf16>
    %cst_178 = arith.constant dense<0.000000e+00> : vector<1x16xf32>
    %189 = tpu.matmul %188, %155, %cst_178 {dimension_numbers = #tpu.dot_dimension_numbers<[1], [0], [0], [1], [0, 0, 1, 1], [], []>} : vector<1x9xbf16>, vector<9x16xbf16>, vector<1x16xf32> -> vector<1x16xf32>
    %190 = arith.truncf %189 : vector<1x16xf32> to vector<1x16xbf16>
    %c4_179 = arith.constant 4 : index
    %c0_180 = arith.constant 0 : index
    %c0_181 = arith.constant 0 : index
    %191 = vector.load %arg9[%c4_179, %c0_180, %c0_181] : memref<9x16x8xbf16, #tpu.memory_space<vmem>>, vector<1x16x8xbf16>
    %192 = vector.shape_cast %191 : vector<1x16x8xbf16> to vector<16x8xbf16>
    %cst_182 = arith.constant dense<0.000000e+00> : vector<1x8xf32>
    %193 = tpu.matmul %190, %192, %cst_182 {dimension_numbers = #tpu.dot_dimension_numbers<[1], [0], [0], [1], [0, 0, 1, 1], [], []>} : vector<1x16xbf16>, vector<16x8xbf16>, vector<1x8xf32> -> vector<1x8xf32>
    %194 = arith.addf %186, %193 : vector<1x8xf32>
    %c5_183 = arith.constant 5 : index
    %c0_184 = arith.constant 0 : index
    %c0_185 = arith.constant 0 : index
    %195 = vector.load %arg8[%c5_183, %c0_184, %c0_185] : memref<9x1x9xbf16, #tpu.memory_space<vmem>>, vector<1x1x9xbf16>
    %196 = vector.shape_cast %195 : vector<1x1x9xbf16> to vector<1x9xbf16>
    %cst_186 = arith.constant dense<0.000000e+00> : vector<1x16xf32>
    %197 = tpu.matmul %196, %155, %cst_186 {dimension_numbers = #tpu.dot_dimension_numbers<[1], [0], [0], [1], [0, 0, 1, 1], [], []>} : vector<1x9xbf16>, vector<9x16xbf16>, vector<1x16xf32> -> vector<1x16xf32>
    %198 = arith.truncf %197 : vector<1x16xf32> to vector<1x16xbf16>
    %c5_187 = arith.constant 5 : index
    %c0_188 = arith.constant 0 : index
    %c0_189 = arith.constant 0 : index
    %199 = vector.load %arg9[%c5_187, %c0_188, %c0_189] : memref<9x16x8xbf16, #tpu.memory_space<vmem>>, vector<1x16x8xbf16>
    %200 = vector.shape_cast %199 : vector<1x16x8xbf16> to vector<16x8xbf16>
    %cst_190 = arith.constant dense<0.000000e+00> : vector<1x8xf32>
    %201 = tpu.matmul %198, %200, %cst_190 {dimension_numbers = #tpu.dot_dimension_numbers<[1], [0], [0], [1], [0, 0, 1, 1], [], []>} : vector<1x16xbf16>, vector<16x8xbf16>, vector<1x8xf32> -> vector<1x8xf32>
    %202 = arith.addf %194, %201 : vector<1x8xf32>
    %c6_191 = arith.constant 6 : index
    %c0_192 = arith.constant 0 : index
    %c0_193 = arith.constant 0 : index
    %203 = vector.load %arg8[%c6_191, %c0_192, %c0_193] : memref<9x1x9xbf16, #tpu.memory_space<vmem>>, vector<1x1x9xbf16>
    %204 = vector.shape_cast %203 : vector<1x1x9xbf16> to vector<1x9xbf16>
    %cst_194 = arith.constant dense<0.000000e+00> : vector<1x16xf32>
    %205 = tpu.matmul %204, %155, %cst_194 {dimension_numbers = #tpu.dot_dimension_numbers<[1], [0], [0], [1], [0, 0, 1, 1], [], []>} : vector<1x9xbf16>, vector<9x16xbf16>, vector<1x16xf32> -> vector<1x16xf32>
    %206 = arith.truncf %205 : vector<1x16xf32> to vector<1x16xbf16>
    %c6_195 = arith.constant 6 : index
    %c0_196 = arith.constant 0 : index
    %c0_197 = arith.constant 0 : index
    %207 = vector.load %arg9[%c6_195, %c0_196, %c0_197] : memref<9x16x8xbf16, #tpu.memory_space<vmem>>, vector<1x16x8xbf16>
    %208 = vector.shape_cast %207 : vector<1x16x8xbf16> to vector<16x8xbf16>
    %cst_198 = arith.constant dense<0.000000e+00> : vector<1x8xf32>
    %209 = tpu.matmul %206, %208, %cst_198 {dimension_numbers = #tpu.dot_dimension_numbers<[1], [0], [0], [1], [0, 0, 1, 1], [], []>} : vector<1x16xbf16>, vector<16x8xbf16>, vector<1x8xf32> -> vector<1x8xf32>
    %210 = arith.addf %202, %209 : vector<1x8xf32>
    %c7_199 = arith.constant 7 : index
    %c0_200 = arith.constant 0 : index
    %c0_201 = arith.constant 0 : index
    %211 = vector.load %arg8[%c7_199, %c0_200, %c0_201] : memref<9x1x9xbf16, #tpu.memory_space<vmem>>, vector<1x1x9xbf16>
    %212 = vector.shape_cast %211 : vector<1x1x9xbf16> to vector<1x9xbf16>
    %cst_202 = arith.constant dense<0.000000e+00> : vector<1x16xf32>
    %213 = tpu.matmul %212, %155, %cst_202 {dimension_numbers = #tpu.dot_dimension_numbers<[1], [0], [0], [1], [0, 0, 1, 1], [], []>} : vector<1x9xbf16>, vector<9x16xbf16>, vector<1x16xf32> -> vector<1x16xf32>
    %214 = arith.truncf %213 : vector<1x16xf32> to vector<1x16xbf16>
    %c7_203 = arith.constant 7 : index
    %c0_204 = arith.constant 0 : index
    %c0_205 = arith.constant 0 : index
    %215 = vector.load %arg9[%c7_203, %c0_204, %c0_205] : memref<9x16x8xbf16, #tpu.memory_space<vmem>>, vector<1x16x8xbf16>
    %216 = vector.shape_cast %215 : vector<1x16x8xbf16> to vector<16x8xbf16>
    %cst_206 = arith.constant dense<0.000000e+00> : vector<1x8xf32>
    %217 = tpu.matmul %214, %216, %cst_206 {dimension_numbers = #tpu.dot_dimension_numbers<[1], [0], [0], [1], [0, 0, 1, 1], [], []>} : vector<1x16xbf16>, vector<16x8xbf16>, vector<1x8xf32> -> vector<1x8xf32>
    %218 = arith.addf %210, %217 : vector<1x8xf32>
    %c8_207 = arith.constant 8 : index
    %c0_208 = arith.constant 0 : index
    %c0_209 = arith.constant 0 : index
    %219 = vector.load %arg8[%c8_207, %c0_208, %c0_209] : memref<9x1x9xbf16, #tpu.memory_space<vmem>>, vector<1x1x9xbf16>
    %220 = vector.shape_cast %219 : vector<1x1x9xbf16> to vector<1x9xbf16>
    %cst_210 = arith.constant dense<0.000000e+00> : vector<1x16xf32>
    %221 = tpu.matmul %220, %155, %cst_210 {dimension_numbers = #tpu.dot_dimension_numbers<[1], [0], [0], [1], [0, 0, 1, 1], [], []>} : vector<1x9xbf16>, vector<9x16xbf16>, vector<1x16xf32> -> vector<1x16xf32>
    %222 = arith.truncf %221 : vector<1x16xf32> to vector<1x16xbf16>
    %c8_211 = arith.constant 8 : index
    %c0_212 = arith.constant 0 : index
    %c0_213 = arith.constant 0 : index
    %223 = vector.load %arg9[%c8_211, %c0_212, %c0_213] : memref<9x16x8xbf16, #tpu.memory_space<vmem>>, vector<1x16x8xbf16>
    %224 = vector.shape_cast %223 : vector<1x16x8xbf16> to vector<16x8xbf16>
    %cst_214 = arith.constant dense<0.000000e+00> : vector<1x8xf32>
    %225 = tpu.matmul %222, %224, %cst_214 {dimension_numbers = #tpu.dot_dimension_numbers<[1], [0], [0], [1], [0, 0, 1, 1], [], []>} : vector<1x16xbf16>, vector<16x8xbf16>, vector<1x8xf32> -> vector<1x8xf32>
    %226 = arith.addf %218, %225 : vector<1x8xf32>
    %c0_215 = arith.constant 0 : index
    %c0_216 = arith.constant 0 : index
    %227 = vector.load %arg10[%c0_215, %c0_216] : memref<1x8xf32, #tpu.memory_space<vmem>>, vector<1x8xf32>
    %228 = arith.addf %226, %227 : vector<1x8xf32>
    %cst_217 = arith.constant 0.000000e+00 : f32
    %229 = vector.broadcast %cst_217 : f32 to vector<1x8xf32>
    %230 = arith.maximumf %228, %229 : vector<1x8xf32>
    %231 = arith.truncf %230 : vector<1x8xf32> to vector<1x8xbf16>
    %c0_218 = arith.constant 0 : index
    %c0_219 = arith.constant 0 : index
    %c0_220 = arith.constant 0 : index
    %232 = vector.load %arg11[%c0_218, %c0_219, %c0_220] : memref<1x8x32xbf16, #tpu.memory_space<vmem>>, vector<1x8x32xbf16>
    %233 = vector.shape_cast %232 : vector<1x8x32xbf16> to vector<8x32xbf16>
    %cst_221 = arith.constant dense<0.000000e+00> : vector<1x32xf32>
    %234 = tpu.matmul %231, %233, %cst_221 {dimension_numbers = #tpu.dot_dimension_numbers<[1], [0], [0], [1], [0, 0, 1, 1], [], []>} : vector<1x8xbf16>, vector<8x32xbf16>, vector<1x32xf32> -> vector<1x32xf32>
    %c0_222 = arith.constant 0 : index
    %c0_223 = arith.constant 0 : index
    %235 = vector.load %arg12[%c0_222, %c0_223] : memref<1x32xf32, #tpu.memory_space<vmem>>, vector<1x32xf32>
    %236 = arith.addf %234, %235 : vector<1x32xf32>
    %237 = math.tanh %236 : vector<1x32xf32>
    %238 = arith.truncf %237 : vector<1x32xf32> to vector<1x32xbf16>
    %c0_224 = arith.constant 0 : index
    %c0_225 = arith.constant 0 : index
    %239 = vector.load %arg13[%c0_224, %c0_225] : memref<32x128xbf16, #tpu.memory_space<vmem>>, vector<32x128xbf16>
    %cst_226 = arith.constant dense<0.000000e+00> : vector<1x128xf32>
    %240 = tpu.matmul %238, %239, %cst_226 {dimension_numbers = #tpu.dot_dimension_numbers<[1], [0], [0], [1], [0, 0, 1, 1], [], []>} : vector<1x32xbf16>, vector<32x128xbf16>, vector<1x128xf32> -> vector<1x128xf32>
    %c0_227 = arith.constant 0 : index
    %c0_228 = arith.constant 0 : index
    %241 = vector.load %arg14[%c0_227, %c0_228] : memref<1x128xf32, #tpu.memory_space<vmem>>, vector<1x128xf32>
    %242 = arith.addf %240, %241 : vector<1x128xf32>
    %c0_229 = arith.constant 0 : index
    %c0_230 = arith.constant 0 : index
    %c0_231 = arith.constant 0 : index
    %243 = vector.load %arg15[%c0_229, %c0_230, %c0_231] : memref<1x1x128xf32, #tpu.memory_space<vmem>>, vector<1x1x128xf32>
    %244 = vector.shape_cast %243 : vector<1x1x128xf32> to vector<1x128xf32>
    %245 = vector.shape_cast %242 : vector<1x128xf32> to vector<1x1x128xf32>
    tpu.vector_store %arg15[%c0_229, %c0_230, %c0_231], %245 {strides = array<i32>} : memref<1x1x128xf32, #tpu.memory_space<vmem>>, vector<1x1x128xf32>,
    return
  }
  func.func @transform_0(%arg0: i32) -> (i32, i32, i32) {
    %c0_i32 = arith.constant 0 : i32
    %c0_i32_0 = arith.constant 0 : i32
    %c0_i32_1 = arith.constant 0 : i32
    return %arg0, %c0_i32, %c0_i32_0 : i32, i32, i32
  }
  func.func @transform_1(%arg0: i32) -> (i32, i32, i32) {
    %c0_i32 = arith.constant 0 : i32
    %c0_i32_0 = arith.constant 0 : i32
    %c0_i32_1 = arith.constant 0 : i32
    %c0_i32_2 = arith.constant 0 : i32
    return %c0_i32, %c0_i32_0, %c0_i32_1 : i32, i32, i32
  }
  func.func @transform_2(%arg0: i32) -> (i32, i32, i32) {
    %c0_i32 = arith.constant 0 : i32
    %c0_i32_0 = arith.constant 0 : i32
    %c0_i32_1 = arith.constant 0 : i32
    %c0_i32_2 = arith.constant 0 : i32
    return %c0_i32, %c0_i32_0, %c0_i32_1 : i32, i32, i32
  }
  func.func @transform_3(%arg0: i32) -> (i32, i32) {
    %c0_i32 = arith.constant 0 : i32
    %c0_i32_0 = arith.constant 0 : i32
    %c0_i32_1 = arith.constant 0 : i32
    return %c0_i32, %c0_i32_0 : i32, i32
  }
  func.func @transform_4(%arg0: i32) -> (i32, i32, i32) {
    %c0_i32 = arith.constant 0 : i32
    %c0_i32_0 = arith.constant 0 : i32
    %c0_i32_1 = arith.constant 0 : i32
    %c0_i32_2 = arith.constant 0 : i32
    return %c0_i32, %c0_i32_0, %c0_i32_1 : i32, i32, i32
  }
  func.func @transform_5(%arg0: i32) -> (i32, i32, i32) {
    %c0_i32 = arith.constant 0 : i32
    %c0_i32_0 = arith.constant 0 : i32
    %c0_i32_1 = arith.constant 0 : i32
    %c0_i32_2 = arith.constant 0 : i32
    return %c0_i32, %c0_i32_0, %c0_i32_1 : i32, i32, i32
  }
  func.func @transform_6(%arg0: i32) -> (i32, i32) {
    %c0_i32 = arith.constant 0 : i32
    %c0_i32_0 = arith.constant 0 : i32
    %c0_i32_1 = arith.constant 0 : i32
    return %c0_i32, %c0_i32_0 : i32, i32
  }
  func.func @transform_7(%arg0: i32) -> (i32, i32, i32) {
    %c0_i32 = arith.constant 0 : i32
    %c0_i32_0 = arith.constant 0 : i32
    %c0_i32_1 = arith.constant 0 : i32
    %c0_i32_2 = arith.constant 0 : i32
    return %c0_i32, %c0_i32_0, %c0_i32_1 : i32, i32, i32
  }
  func.func @transform_8(%arg0: i32) -> (i32, i32, i32) {
    %c0_i32 = arith.constant 0 : i32
    %c0_i32_0 = arith.constant 0 : i32
    %c0_i32_1 = arith.constant 0 : i32
    %c0_i32_2 = arith.constant 0 : i32
    return %c0_i32, %c0_i32_0, %c0_i32_1 : i32, i32, i32
  }
  func.func @transform_9(%arg0: i32) -> (i32, i32) {
    %c0_i32 = arith.constant 0 : i32
    %c0_i32_0 = arith.constant 0 : i32
    %c0_i32_1 = arith.constant 0 : i32
    return %c0_i32, %c0_i32_0 : i32, i32
  }
  func.func @transform_10(%arg0: i32) -> (i32, i32, i32) {
    %c0_i32 = arith.constant 0 : i32
    %c0_i32_0 = arith.constant 0 : i32
    %c0_i32_1 = arith.constant 0 : i32
    %c0_i32_2 = arith.constant 0 : i32
    return %c0_i32, %c0_i32_0, %c0_i32_1 : i32, i32, i32
  }
  func.func @transform_11(%arg0: i32) -> (i32, i32) {
    %c0_i32 = arith.constant 0 : i32
    %c0_i32_0 = arith.constant 0 : i32
    %c0_i32_1 = arith.constant 0 : i32
    return %c0_i32, %c0_i32_0 : i32, i32
  }
  func.func @transform_12(%arg0: i32) -> (i32, i32) {
    %c0_i32 = arith.constant 0 : i32
    %c0_i32_0 = arith.constant 0 : i32
    %c0_i32_1 = arith.constant 0 : i32
    return %c0_i32, %c0_i32_0 : i32, i32
  }
  func.func @transform_13(%arg0: i32) -> (i32, i32) {
    %c0_i32 = arith.constant 0 : i32
    %c0_i32_0 = arith.constant 0 : i32
    %c0_i32_1 = arith.constant 0 : i32
    return %c0_i32, %c0_i32_0 : i32, i32
  }
  func.func @transform_14(%arg0: i32) -> (i32, i32, i32) {
    %c0_i32 = arith.constant 0 : i32
    %c0_i32_0 = arith.constant 0 : i32
    %c0_i32_1 = arith.constant 0 : i32
    return %arg0, %c0_i32, %c0_i32_0 : i32, i32, i32
  }
}

</mosaic_0001>

<bundles_post_ra>
// kernel: tpu_custom_call.1
= control target key start
LH: loop header
LB: loop body
LE: loop exit
PB: predicated region body
PF: predicated region fallthrough
CT: control target
= control target key end

     0   :  { %19 = vsyncpa [#allocation3], 0  ;;  %s6987_s0 = inlined_call_operand.vmem [shape: bf16[2,256,4], index: 0, kind: input, shape index: {}]   ;;  %s6988_s1 = inlined_call_operand.hbm [shape: bf16[9,49,256], index: 1, kind: input, shape index: {}]   ;;  %s6989_s2 = inlined_call_operand.vmem [shape: bf16[9,4,16], index: 2, kind: input, shape index: {}]   ;;  %s6990_s3 = inlined_call_operand.vmem [shape: f32[1,16], index: 3, kind: input, shape index: {}]   ;;  %s6991_s4 = inlined_call_operand.vmem [shape: bf16[9,9,49], index: 4, kind: input, shape index: {}]   ;;  %s6992_s5 = inlined_call_operand.vmem [shape: bf16[9,16,16], index: 5, kind: input, shape index: {}]   ;;  %s6993_s6 = inlined_call_operand.vmem [shape: f32[1,16], index: 6, kind: input, shape index: {}]   ;;  %s6994_s7 = inlined_call_operand.vmem [shape: bf16[9,1,9], index: 7, kind: input, shape index: {}]   ;;  %s6995_s8 = inlined_call_operand.vmem [shape: bf16[9,16,8], index: 8, kind: input, shape index: {}]   ;;  %s6996_s9 = inlined_call_operand.vmem [shape: f32[1,8], index: 9, kind: input, shape index: {}]   ;;  %s6997_s10 = inlined_call_operand.vmem [shape: bf16[1,8,32], index: 10, kind: input, shape index: {}]   ;;  %s6998_s11 = inlined_call_operand.vmem [shape: f32[1,32], index: 11, kind: input, shape index: {}]   ;;  %s6999_s12 = inlined_call_operand.vmem [shape: bf16[32,128], index: 12, kind: input, shape index: {}]   ;;  %s7000_s13 = inlined_call_operand.vmem [shape: f32[1,128], index: 13, kind: input, shape index: {}]   ;;  %s7001_s14 = inlined_call_operand.hbm [shape: f32[2,1,128], index: 14, kind: output, shape index: {}]  }
   0x1   :  { %20 = vsyncpa [#allocation4], 0 }
   0x2   :  { %22 = vsyncpa [#allocation4 + $0x1], 0  ;;  %s6097_s29 = smov 0   ;;  %s6099_s30 = smov 0  }
   0x3   :  { %s6101_s15 = smov 0   ;;  %s6103_s16 = smov 0  }
   0x4 LB: > { %7009 = sst [smem:[#allocation8_spill]] %s6008_s15  ;;  %s6118_s17 = sadd.s32 4294967295, %s6012_s16   ;;  %s6012_s16 = sphi %s6103_s16, %s7023_s16   ;;  %s6008_s15 = sphi %s6101_s15, %s7025_s15   ;;  %s6004_s30 = sphi %s6099_s30, %s7027_s30   ;;  %s6000_s29 = sphi %s6097_s29, %s7026_s29  }
   0x5   : > { %s4507_s18 = sadd.s32 4294967294, %s6012_s16   ;;  %s6122_s19 = sadd.s32 1, %s6012_s16  }
   0x6   : > { %7010 = sst [smem:[#allocation9_spill]] %s6122_s19  ;;  %s334_s20 = sadd.s32 1, %s6008_s15 }
   0x7   : > { %s331_s21 = ssub.s32 %s6012_s16, %s6122_s19  ;;  %p344_p0 = scmp.ne.s32.totalorder %s6008_s15, %s6004_s30 }
   0x8   : > { %p332_p1 = scmp.eq.s32.totalorder %s331_s21, 0  ;;  %p345_p2 = scmp.eq.s32.totalorder %s6118_s17, 1 }
   0x9   : > { %p350_p3 = scmp.ne.s32.totalorder %s6004_s30, %s6000_s29  ;;  %p351_p4 = scmp.eq.s32.totalorder %s4507_s18, 1 }
   0xa   : > { %s6133_s22 = scalar_select %p332_p1, %s6008_s15, %s334_s20  }
   0xb   : > { %p6135_p5 = por %p345_p2, %p344_p0  ;;  %p6139_p6 = por %p351_p4, %p350_p3 }
   0xc   : > { %7011 = sst [smem:[#allocation10_spill]] %s6133_s22  ;;  %p4508_p7 = scmp.ge.s32.totalorder %s6012_s16, 1 }
   0xd   : > { %s7012_s23 = scalar_select %p6135_p5, 1, 0 }
   0xe   : > { %s7013_s24 = scalar_select %p6139_p6, 1, 0 }
   0xf   : > { %p358_p8 = scmp.lt.s32.totalorder %s6012_s16, 3  ;;  %p7006_p9 = scmp.eq.s32.totalorder %s6118_s17, 0 }
  0x10   : > { %7014 = sst [smem:[#allocation11_spill]] %s7013_s24  ;;  %s6014_s26 = smov [#allocation2]  }
  0x11   : > { %p6146_p10 = pnand %p4508_p7, %p358_p8  ;;  %s370_s27 = sshll.u32 %s6014_s26, 4  ;;  %s371_s27 = int_to_ptr.vmem [resolvable:$true] %s370_s27 }
  0x12   : > { %s5918_s21 = scalar_lea.hbm %s6988_s1, 8064 }
  0x13   : > { %s7015_s25 = scalar_select %p6146_p10, 1, 0 }
  0x14   : > { %p5706_p11 = pneg %p6146_p10  ;;  %p5919_p13 = scmp.ne.s32.totalorder %s6988_s1, %s5918_s21 }
  0x15   : > { %p5925_p3 = scmp.lt.u32.totalorder %s5918_s21, %s6988_s1 }
  0x16   : > { %p6154_p12 = pnand %p7006_p9, %p5706_p11 }
  0x18   : > { %p5920_p0 = pneg %p6154_p12 }
  0x1a   : > { %p5921_p1 = pnand %p5920_p0, %p5919_p13 }
  0x1c   : > { %p5922_p2 = pneg %p5921_p1 }
  0x1e   : > { %p5927_p4 = pnand %p5925_p3, %p5922_p2 }
  0x20   : > { %5930 = shalt.err (!%p5927_p4)
}
  0x21   : > { %s5931_s24 = scalar_lea.vmem %s371_s27, 8064  ;;  %p5939_p9 = scmp.lt.s32.totalorder %s371_s27, %s371_s27 }
  0x22   : > { %p5932_p7 = scmp.ne.s32.totalorder %s371_s27, %s5931_s24  ;;  %p5940_p6 = scmp.lt.s32.totalorder %s5931_s24, %s5931_s24 }
  0x24   : > { %p5934_p8 = pnand %p5932_p7, %p5920_p0  ;;  %p5941_p5 = por %p5940_p6, %p5939_p9 }
  0x26   : > { %p5935_p11 = pneg %p5934_p8 }
  0x28   : > { %p5942_p10 = pnand %p5941_p5, %p5935_p11 }
  0x2a   : > { %5945 = shalt.err (!%p5942_p10)
}
  0x2b   : > { %s6015_s15 = smov 128   ;;  %s6016_s22 = smov 8  }
  0x2c   : > { %5709 = dma.hbm_to_vmem [thread:$0]  (!%p6154_p12), %s6988_s1, 8064, %s371_s27, [#allocation3], %s6015_s15, %s6015_s15, %s6016_s22  }
  0x2d   : > { %p7017_p13 = scmp.ne.s32.totalorder %s7015_s25, 0 }
  0x2e   : > { %p7018_p1 = scmp.eq.s32.totalorder (!%p7017_p13), %s6118_s17, 0 }
  0x2f   : > { %430 = sbr.rel (%p7017_p13) target bundleno = 4194 (0x1062), region = 76 }
  0x36   : > { %5991 = dma.done.wait (%p7018_p1), [#allocation3], 8064   ;;  %p7019_p0 = pmov %p7018_p1 }
  0x37   : > { %p475_p5 = scmp.lt.s32.totalorder %s6118_s17, 1  ;;  %v5774_v11 = vld [vmem:[#allocation2 + $0x3c] ss:$8 sps:$4 sm:$0xff]   ;;  %v5772_v18 = vld [vmem:[#allocation2 + $0x38] ss:$8 sps:$4 sm:$0xff]   ;;  %vm850_vm0 = vcmask 1041408  }
  0x38   : > { %5993 = vsyncadd (%p7019_p0), [#allocation3], 4294959232  ;;  %799 = vmatprep.mubr.bf16.mxu1 %v5774_v11  ;;  %v5780_v13 = vld [vmem:[#allocation2 + $0x4] ss:$8 sps:$4 sm:$0xff]   ;;  %v5778_v20 = vld [vmem:[#allocation2] ss:$8 sps:$4 sm:$0xff]  }
  0x39   : > { %s476_s19 = scalar_select %p475_p5, %s6118_s17, 1  ;;  %685 = vmatprep.mubr.bf16.mxu0 %v5780_v13  ;;  %v5775_v19 = vld [vmem:[#allocation2 + $0x4c] ss:$8 sps:$4 sm:$0xff]   ;;  %v5777_v22 = vld [vmem:[#allocation2 + $0x48] ss:$8 sps:$4 sm:$0xff]   ;;  %vm837_vm1 = vcmask 31744  }
  0x3a   : > { %v5784_v21 = vld [vmem:[#allocation2 + $0x14] ss:$8 sps:$4 sm:$0xff]   ;;  %v5787_v24 = vld [vmem:[#allocation2 + $0x10] ss:$8 sps:$4 sm:$0xff]   ;;  %v5789_v25 = vld [vmem:[#allocation2 + $0x24] ss:$8 sps:$4 sm:$0xff]  }
  0x3b   : > { %s4775_s24 = sshll.u32 %s476_s19, 7  ;;  %v5781_v23 = vld [vmem:[#allocation2 + $0x5c] ss:$8 sps:$4 sm:$0xff]   ;;  %v729_v26 = vld [vmem:[#allocation2 + $0x68] sm:$0x11]  ;;  %vm6018_vm2 = vmmov 0  }
  0x3c   : > { %s6185_s26 = scalar_lea.vmem %s6987_s0, %s4775_s24  ;;  %v5783_v27 = vld [vmem:[#allocation2 + $0x58] ss:$8 sps:$4 sm:$0xff]   ;;  %v519_v28 = vld [vmem:[#allocation2 + $0x30] sm:$0x11]  ;;  %v4546_v30 = vcombine.high %v729_v26, %v729_v26  ;;  %v4545_v33 = vcombine.low %v729_v26, %v729_v26  ;;  %v5796_v36 = vld [vmem:[#allocation2 + $0x84] ss:$8 sps:$4 sm:$0xff]  }
  0x3d   : > { %v6188_v0 = vld [vmem:[%s6185_s26 + $0x40] sm:$0xff]   ;;  %v6195_v2 = vld [vmem:[%s6185_s26 + $0x48] sm:$0xff]   ;;  %v6205_v4 = vld [vmem:[%s6185_s26 + $0x50] sm:$0xff]   ;;  %v4522_v31 = vcombine.high %v519_v28, %v519_v28  ;;  %v4521_v34 = vcombine.low %v519_v28, %v519_v28  ;;  %vm2440_vm3 = vcmask 1040384   ;;  %vm2436_vm4 = vcmask 400384   ;;  %s473_s20 = sand.u32 1, %s6004_s30  }
  0x3e   : > { %v6191_v1 = vld [vmem:[%s6185_s26] sm:$0xff]   ;;  %4816 = vmatprep.subr.bf16.mxu1 %v6188_v0  ;;  %4776 = vmatprep.subr.bf16.mxu0 %v6188_v0  ;;  %v6200_v3 = vld [vmem:[%s6185_s26 + $0x8] sm:$0xff]   ;;  %v6210_v5 = vld [vmem:[%s6185_s26 + $0x10] sm:$0xff]   ;;  %vm2552_vm5 = vcmask 130048   ;;  %vm3420_vm6 = vcmask 1043456   ;;  %vm3421_vm7 = vcmask 1044480  }
  0x3f   : > { %4817 = vmatpush3.bf16.msra.mxu1 %v6191_v1  ;;  %4777 = vmatpush3.bf16.msra.mxu0 %v6191_v1  ;;  %v6215_v6 = vld [vmem:[%s6185_s26 + $0x58] sm:$0xff]   ;;  %v6225_v8 = vld [vmem:[%s6185_s26 + $0x60] sm:$0xff]   ;;  %v6235_v10 = vld [vmem:[%s6185_s26 + $0x68] sm:$0xff]   ;;  %vm3416_vm8 = vcmask 72704   ;;  %vm4316_vm9 = vcmask 64512   ;;  %vm4382_vm10 = vcmask 261120  }
  0x40   : > { %4818 = vmatprep.subr.bf16.mxu1 %v6195_v2  ;;  %4778 = vmatprep.subr.bf16.mxu0 %v6195_v2  ;;  %v6220_v7 = vld [vmem:[%s6185_s26 + $0x18] sm:$0xff]   ;;  %v6230_v9 = vld [vmem:[%s6185_s26 + $0x20] sm:$0xff]   ;;  %v6240_v12 = vld [vmem:[%s6185_s26 + $0x28] sm:$0xff]   ;;  %s4772_s21 = sshll.u32 %s6118_s17, 4  ;;  %s474_s28 = scalar_lea.vmem [#allocation5], %s473_s20 }
  0x41   : > { %v6244_v14 = vld [vmem:[%s6185_s26 + $0x70] sm:$0xff]   ;;  %v6254_v16 = vld [vmem:[%s6185_s26 + $0x78] sm:$0xff]   ;;  %v5794_v29 = vld [vmem:[#allocation2 + $0x20] ss:$8 sps:$4 sm:$0xff]   ;;  %s6945_s15 = scalar_lea.hbm %s7001_s14, %s4772_s21  ;;  %s4428_s22 = scalar_lea.sflag [#allocation4], %s473_s20 }
  0x42   : > { %v6250_v15 = vld [vmem:[%s6185_s26 + $0x30] sm:$0xff]   ;;  %v6260_v17 = vld [vmem:[%s6185_s26 + $0x38] sm:$0xff]   ;;  %v5799_v37 = vld [vmem:[#allocation2 + $0x80] ss:$8 sps:$4 sm:$0xff]   ;;  %p7020_p9 = scmp.ne.s32.totalorder %s7012_s23, 0  ;;  %s6021_s18 = smov [#allocation5]  }
  0x43   : > { %4819 = vmatpush3.bf16.msra.mxu1 %v6200_v3  ;;  %4779 = vmatpush3.bf16.msra.mxu0 %v6200_v3  ;;  %v5793_v32 = vld [vmem:[#allocation2 + $0x74] ss:$8 sps:$4 sm:$0xff]   ;;  %v5791_v35 = vld [vmem:[#allocation2 + $0x70] ss:$8 sps:$4 sm:$0xff]   ;;  %v1004_v39 = vld [vmem:[#allocation2 + $0xa0] sm:$0x11] }
  0x44   : > { %4820 = vmatprep.subr.bf16.mxu1 %v6205_v4  ;;  %4780 = vmatprep.subr.bf16.mxu0 %v6205_v4  ;;  %v5800_v38 = vld [vmem:[#allocation2 + $0x94] ss:$8 sps:$4 sm:$0xff]   ;;  %v5802_v40 = vld [vmem:[#allocation2 + $0x90] ss:$8 sps:$4 sm:$0xff]   ;;  %v4563_v41 = vcombine.high %v1004_v39, %v1004_v39  ;;  %v4562_v42 = vcombine.low %v1004_v39, %v1004_v39  ;;  %v5818_v52 = vld [vmem:[#allocation2 + $0xe4] ss:$8 sps:$4 sm:$0xff]  }
  0x45   : > { %v5807_v43 = vld [vmem:[#allocation2 + $0xac] ss:$8 sps:$4 sm:$0xff]   ;;  %v5805_v44 = vld [vmem:[#allocation2 + $0xa8] ss:$8 sps:$4 sm:$0xff]   ;;  %v5808_v45 = vld [vmem:[#allocation2 + $0xbc] ss:$8 sps:$4 sm:$0xff]  }
  0x46   : > { %v5810_v46 = vld [vmem:[#allocation2 + $0xb8] ss:$8 sps:$4 sm:$0xff]   ;;  %v5811_v47 = vld [vmem:[#allocation2 + $0xcc] ss:$8 sps:$4 sm:$0xff]   ;;  %v5813_v49 = vld [vmem:[#allocation2 + $0xc8] ss:$8 sps:$4 sm:$0xff]  }
  0x47   : > { %4821 = vmatpush3.bf16.msra.mxu1 %v6210_v5  ;;  %4781 = vmatpush3.bf16.msra.mxu0 %v6210_v5  ;;  %v1205_v48 = vld [vmem:[#allocation2 + $0xd8] sm:$0x11]  ;;  %v5816_v53 = vld [vmem:[#allocation2 + $0xe0] ss:$8 sps:$4 sm:$0xff]   ;;  %v5822_v58 = vld [vmem:[#allocation2 + $0x104] ss:$8 sps:$4 sm:$0xff]  }
  0x48   : > { %4822 = vmatprep.subr.bf16.mxu1 %v6215_v6  ;;  %4782 = vmatprep.subr.bf16.mxu0 %v6215_v6  ;;  %v4576_v50 = vcombine.high %v1205_v48, %v1205_v48  ;;  %v4575_v51 = vcombine.low %v1205_v48, %v1205_v48  ;;  %v5819_v54 = vld [vmem:[#allocation2 + $0xf4] ss:$8 sps:$4 sm:$0xff]   ;;  %v4547_v55 = vld [vmem:[%s6989_s2 + $0x2] sm:$0x3]  ;;  %v5821_v57 = vld [vmem:[#allocation2 + $0xf0] ss:$8 sps:$4 sm:$0xff]  }
  0x49   : > { %v852_v56 = vsel %vm850_vm0, %v4547_v55, 0  ;;  %v1406_v59 = vld [vmem:[#allocation2 + $0x110] sm:$0x11]  ;;  %v5824_v60 = vld [vmem:[#allocation2 + $0x100] ss:$8 sps:$4 sm:$0xff]   ;;  %s5950_s19 = sshll.u32 %s6021_s18, 4  ;;  %s5951_s19 = int_to_ptr.vmem [resolvable:$false] %s5950_s19 }
  0x4a   : > { %v4589_v61 = vcombine.high %v1406_v59, %v1406_v59  ;;  %v4588_v62 = vcombine.low %v1406_v59, %v1406_v59  ;;  %v721_v63 = vld [vmem:[%s6989_s2] sm:$0x3]  ;;  %v5829_v11 = vld [vmem:[#allocation2 + $0x154] ss:$8 sps:$4 sm:$0xff]   ;;  %v5827_v13 = vld [vmem:[#allocation2 + $0x150] ss:$8 sps:$4 sm:$0xff]  }
  0x4b   : > { %4823 = vmatpush3.bf16.msra.mxu1 %v6220_v7  ;;  %4783 = vmatpush3.bf16.msra.mxu0 %v6220_v7  ;;  %v5832_v26 = vld [vmem:[#allocation2 + $0x160] ss:$8 sps:$4 sm:$0xff]   ;;  %v5836_v39 = vld [vmem:[#allocation2 + $0x174] ss:$8 sps:$4 sm:$0xff]   ;;  %s5952_s24 = scalar_lea.vmem %s5951_s19, 32 }
  0x4c   : > { %4824 = vmatprep.subr.bf16.mxu1 %v6225_v8  ;;  %4784 = vmatprep.subr.bf16.mxu0 %v6225_v8 }
  0x4f   : > { %4825 = vmatpush3.bf16.msra.mxu1 %v6230_v9  ;;  %4785 = vmatpush3.bf16.msra.mxu0 %v6230_v9 }
  0x50   : > { %4826 = vmatprep.subr.bf16.mxu1 %v6235_v10  ;;  %4786 = vmatprep.subr.bf16.mxu0 %v6235_v10 }
  0x53   : > { %4827 = vmatpush3.bf16.msra.mxu1 %v6240_v12  ;;  %4787 = vmatpush3.bf16.msra.mxu0 %v6240_v12 }
  0x54   : > { %4828 = vmatprep.subr.bf16.mxu1 %v6244_v14  ;;  %4788 = vmatprep.subr.bf16.mxu0 %v6244_v14 }
  0x57   : > { %4829 = vmatpush3.bf16.msra.mxu1 %v6250_v15  ;;  %4789 = vmatpush3.bf16.msra.mxu0 %v6250_v15 }
  0x58   : > { %4830 = vmatprep.subr.bf16.mxu1 %v6254_v16  ;;  %4790 = vmatprep.subr.bf16.mxu0 %v6254_v16 }
  0x5b   : > { %4831 = vmatpush3.bf16.msra.mxu1 %v6260_v17  ;;  %4791 = vmatpush3.bf16.msra.mxu0 %v6260_v17 }
  0x5c   : > { %4866 = vmatprep.subr.bf16.mxu1 %v6188_v0  ;;  %5691 = vmatprep.subr.msk.bf16.mxu0 %vm850_vm0, %v4547_v55 }
  0x5e   : > { %800 = vmatmul.mubr.bf16.vlgmr.msra.gmra.mrb[0].mxu1 %v5772_v18  ;;  %686 = vmatmul.mubr.bf16.vlgmr.msra.gmra.mrb[0].mxu0 %v5778_v20 }
  0x5f   : > { %4867 = vmatpush3.bf16.msra.mxu1 %v6191_v1  ;;  %807 = vmatprep.mubr.bf16.mxu1 %v5775_v19 }
  0x60   : > { %4868 = vmatprep.subr.bf16.mxu1 %v6195_v2  ;;  %693 = vmatprep.mubr.bf16.mxu0 %v5784_v21 }
  0x61   : > { %5286 = vmatpush3.bf16.msra.mxu0 %v852_v56 }
  0x62   : > { %5692 = vmatprep.subr.msk.bf16.mxu0 %vm850_vm0, %v721_v63 }
  0x63   : > { %4869 = vmatpush3.bf16.msra.mxu1 %v6200_v3 }
  0x64   : > { %4870 = vmatprep.subr.bf16.mxu1 %v6205_v4 }
  0x66   : > { %808 = vmatmul.mubr.bf16.gmra.mrb[4].mxu1 %v5777_v22  ;;  %694 = vmatmul.mubr.bf16.gmra.mrb[4].mxu0 %v5787_v24 }
  0x67   : > { %4871 = vmatpush3.bf16.msra.mxu1 %v6210_v5  ;;  %815 = vmatprep.mubr.bf16.mxu1 %v5781_v23  ;;  %v5830_v23 = vld [vmem:[#allocation2 + $0x164] ss:$8 sps:$4 sm:$0xff]  }
  0x68   : > { %4872 = vmatprep.subr.bf16.mxu1 %v6215_v6  ;;  %701 = vmatprep.mubr.bf16.mxu0 %v5789_v25 }
  0x6b   : > { %4873 = vmatpush3.bf16.msra.mxu1 %v6220_v7 }
  0x6c   : > { %4874 = vmatprep.subr.bf16.mxu1 %v6225_v8 }
  0x6e   : > { %816 = vmatmul.mubr.bf16.gmra.mrb[8].mxu1 %v5783_v27  ;;  %702 = vmatmul.mubr.bf16.gmra.mrb[8].mxu0 %v5794_v29 }
  0x6f   : > { %4875 = vmatpush3.bf16.msra.mxu1 %v6230_v9  ;;  %823 = vmatprep.mubr.bf16.mxu1 %v4546_v30 }
  0x70   : > { %4876 = vmatprep.subr.bf16.mxu1 %v6235_v10  ;;  %709 = vmatprep.mubr.bf16.mxu0 %v4522_v31 }
  0x73   : > { %4877 = vmatpush3.bf16.msra.mxu1 %v6240_v12 }
  0x74   : > { %4878 = vmatprep.subr.bf16.mxu1 %v6244_v14 }
  0x76   : > { %824 = vmatmul.mubr.bf16.gmra.mrb[12].mxu1 %v4545_v33  ;;  %710 = vmatmul.mubr.bf16.gmra.mrb[12].mxu0 %v4521_v34 }
  0x77   : > { %4879 = vmatpush3.bf16.msra.mxu1 %v6250_v15  ;;  %1074 = vmatprep.mubr.bf16.mxu1 %v5793_v32 }
  0x78   : > { %4880 = vmatprep.subr.bf16.mxu1 %v6254_v16 }
  0x7b   : > { %4881 = vmatpush3.bf16.msra.mxu1 %v6260_v17 }
  0x7c   : > { %4911 = vmatprep.subr.bf16.mxu1 %v6188_v0 }
  0x7e   : > { %1075 = vmatmul.mubr.bf16.vlgmr.msra.gmra.mrb[16].mxu1 %v5791_v35 }
  0x7f   : > { %4912 = vmatpush3.bf16.msra.mxu1 %v6191_v1  ;;  %1082 = vmatprep.mubr.bf16.mxu1 %v5796_v36 }
  0x80   : > { %4913 = vmatprep.subr.bf16.mxu1 %v6195_v2 }
  0x83   : > { %4914 = vmatpush3.bf16.msra.mxu1 %v6200_v3 }
  0x84   : > { %4915 = vmatprep.subr.bf16.mxu1 %v6205_v4 }
  0x86   : > { %1083 = vmatmul.mubr.bf16.gmra.mrb[20].mxu1 %v5799_v37 }
  0x87   : > { %4916 = vmatpush3.bf16.msra.mxu1 %v6210_v5  ;;  %1090 = vmatprep.mubr.bf16.mxu1 %v5800_v38 }
  0x88   : > { %4917 = vmatprep.subr.bf16.mxu1 %v6215_v6 }
  0x8b   : > { %4918 = vmatpush3.bf16.msra.mxu1 %v6220_v7 }
  0x8c   : > { %4919 = vmatprep.subr.bf16.mxu1 %v6225_v8 }
  0x8e   : > { %1091 = vmatmul.mubr.bf16.gmra.mrb[24].mxu1 %v5802_v40 }
  0x8f   : > { %4920 = vmatpush3.bf16.msra.mxu1 %v6230_v9  ;;  %1098 = vmatprep.mubr.bf16.mxu1 %v4563_v41 }
  0x90   : > { %4921 = vmatprep.subr.bf16.mxu1 %v6235_v10 }
  0x93   : > { %4922 = vmatpush3.bf16.msra.mxu1 %v6240_v12 }
  0x94   : > { %4923 = vmatprep.subr.bf16.mxu1 %v6244_v14 }
  0x96   : > { %1099 = vmatmul.mubr.bf16.gmra.mrb[28].mxu1 %v4562_v42  ;;  %v5838_v42 = vld [vmem:[#allocation2 + $0x170] ss:$8 sps:$4 sm:$0xff]  }
  0x97   : > { %4924 = vmatpush3.bf16.msra.mxu1 %v6250_v15  ;;  %1275 = vmatprep.mubr.bf16.mxu1 %v5807_v43 }
  0x98   : > { %4925 = vmatprep.subr.bf16.mxu1 %v6254_v16 }
  0x9b   : > { %4926 = vmatpush3.bf16.msra.mxu1 %v6260_v17 }
  0x9c   : > { %4956 = vmatprep.subr.bf16.mxu1 %v6188_v0 }
  0x9e   : > { %1276 = vmatmul.mubr.bf16.vlgmr.msra.gmra.mrb[32].mxu1 %v5805_v44 }
  0x9f   : > { %4957 = vmatpush3.bf16.msra.mxu1 %v6191_v1  ;;  %1283 = vmatprep.mubr.bf16.mxu1 %v5808_v45 }
  0xa0   : > { %4958 = vmatprep.subr.bf16.mxu1 %v6195_v2 }
  0xa3   : > { %4959 = vmatpush3.bf16.msra.mxu1 %v6200_v3 }
  0xa4   : > { %4960 = vmatprep.subr.bf16.mxu1 %v6205_v4 }
  0xa6   : > { %1284 = vmatmul.mubr.bf16.gmra.mrb[36].mxu1 %v5810_v46 }
  0xa7   : > { %4961 = vmatpush3.bf16.msra.mxu1 %v6210_v5  ;;  %1291 = vmatprep.mubr.bf16.mxu1 %v5811_v47 }
  0xa8   : > { %4962 = vmatprep.subr.bf16.mxu1 %v6215_v6 }
  0xab   : > { %4963 = vmatpush3.bf16.msra.mxu1 %v6220_v7 }
  0xac   : > { %4964 = vmatprep.subr.bf16.mxu1 %v6225_v8 }
  0xae   : > { %1292 = vmatmul.mubr.bf16.gmra.mrb[40].mxu1 %v5813_v49  ;;  %v931_v49 = vsel %vm850_vm0, %v721_v63, 0 }
  0xaf   : > { %4965 = vmatpush3.bf16.msra.mxu1 %v6230_v9  ;;  %1299 = vmatprep.mubr.bf16.mxu1 %v4576_v50  ;;  %v4564_v50 = vld [vmem:[%s6989_s2 + $0x4] sm:$0x3] }
  0xb0   : > { %4966 = vmatprep.subr.bf16.mxu1 %v6235_v10 }
  0xb3   : > { %4967 = vmatpush3.bf16.msra.mxu1 %v6240_v12 }
  0xb4   : > { %4968 = vmatprep.subr.bf16.mxu1 %v6244_v14 }
  0xb6   : > { %1300 = vmatmul.mubr.bf16.gmra.mrb[44].mxu1 %v4575_v51 }
  0xb7   : > { %4969 = vmatpush3.bf16.msra.mxu1 %v6250_v15  ;;  %1476 = vmatprep.mubr.bf16.mxu1 %v5818_v52 }
  0xb8   : > { %4970 = vmatprep.subr.bf16.mxu1 %v6254_v16 }
  0xbb   : > { %4971 = vmatpush3.bf16.msra.mxu1 %v6260_v17 }
  0xbc   : > { %5046 = vmatprep.subr.bf16.mxu1 %v6188_v0 }
  0xbe   : > { %1477 = vmatmul.mubr.bf16.vlgmr.msra.gmra.mrb[48].mxu1 %v5816_v53 }
  0xbf   : > { %1484 = vmatprep.mubr.bf16.mxu1 %v5819_v54  ;;  %5047 = vmatpush3.bf16.msra.mxu1 %v6191_v1  ;;  %v1808_v54 = vld [vmem:[#allocation2 + $0x180] sm:$0x11] }
  0xc0   : > { %5048 = vmatprep.subr.bf16.mxu1 %v6195_v2 }
  0xc3   : > { %5049 = vmatpush3.bf16.msra.mxu1 %v6200_v3 }
  0xc4   : > { %5050 = vmatprep.subr.bf16.mxu1 %v6205_v4 }
  0xc6   : > { %1485 = vmatmul.mubr.bf16.gmra.mrb[52].mxu1 %v5821_v57 }
  0xc7   : > { %1492 = vmatprep.mubr.bf16.mxu1 %v5822_v58  ;;  %5051 = vmatpush3.bf16.msra.mxu1 %v6210_v5  ;;  %v4615_v58 = vcombine.high %v1808_v54, %v1808_v54 }
  0xc8   : > { %5052 = vmatprep.subr.bf16.mxu1 %v6215_v6 }
  0xcb   : > { %5053 = vmatpush3.bf16.msra.mxu1 %v6220_v7 }
  0xcc   : > { %5054 = vmatprep.subr.bf16.mxu1 %v6225_v8 }
  0xce   : > { %1493 = vmatmul.mubr.bf16.gmra.mrb[56].mxu1 %v5824_v60 }
  0xcf   : > { %1500 = vmatprep.mubr.bf16.mxu1 %v4589_v61  ;;  %5055 = vmatpush3.bf16.msra.mxu1 %v6230_v9  ;;  %v4614_v61 = vcombine.low %v1808_v54, %v1808_v54 }
  0xd0   : > { %5056 = vmatprep.subr.bf16.mxu1 %v6235_v10 }
  0xd3   : > { %5057 = vmatpush3.bf16.msra.mxu1 %v6240_v12 }
  0xd4   : > { %5058 = vmatprep.subr.bf16.mxu1 %v6244_v14 }
  0xd6   : > { %1501 = vmatmul.mubr.bf16.gmra.mrb[60].mxu1 %v4588_v62 }
  0xd7   : > { %5059 = vmatpush3.bf16.msra.mxu1 %v6250_v15  ;;  %1878 = vmatprep.mubr.bf16.mxu1 %v5829_v11 }
  0xd8   : > { %5060 = vmatprep.subr.bf16.mxu1 %v6254_v16 }
  0xdb   : > { %5061 = vmatpush3.bf16.msra.mxu1 %v6260_v17 }
  0xdc   : > { %5091 = vmatprep.subr.bf16.mxu1 %v6188_v0 }
  0xde   : > { %1879 = vmatmul.mubr.bf16.vlgmr.msra.gmra.mrb[64].mxu1 %v5827_v13 }
  0xdf   : > { %5092 = vmatpush3.bf16.msra.mxu1 %v6191_v1  ;;  %1886 = vmatprep.mubr.bf16.mxu1 %v5830_v23  ;;  %v5846_v23 = vld [vmem:[#allocation2 + $0x188] ss:$8 sps:$4 sm:$0xff]  }
  0xe0   : > { %5093 = vmatprep.subr.bf16.mxu1 %v6195_v2 }
  0xe3   : > { %5094 = vmatpush3.bf16.msra.mxu1 %v6200_v3 }
  0xe4   : > { %5095 = vmatprep.subr.bf16.mxu1 %v6205_v4 }
  0xe6   : > { %1887 = vmatmul.mubr.bf16.gmra.mrb[68].mxu1 %v5832_v26 }
  0xe7   : > { %5096 = vmatpush3.bf16.msra.mxu1 %v6210_v5  ;;  %1894 = vmatprep.mubr.bf16.mxu1 %v5836_v39  ;;  %v5851_v39 = vld [vmem:[#allocation2 + $0x19c] ss:$8 sps:$4 sm:$0xff]  }
  0xe8   : > { %5097 = vmatprep.subr.bf16.mxu1 %v6215_v6 }
  0xeb   : > { %5098 = vmatpush3.bf16.msra.mxu1 %v6220_v7 }
  0xec   : > { %5099 = vmatprep.subr.bf16.mxu1 %v6225_v8 }
  0xee   : > { %1895 = vmatmul.mubr.bf16.gmra.mrb[72].mxu1 %v5838_v42  ;;  %v5854_v42 = vld [vmem:[#allocation2 + $0x198] ss:$8 sps:$4 sm:$0xff]  }
  0xef   : > { %5100 = vmatpush3.bf16.msra.mxu1 %v6230_v9  ;;  %1902 = vmatprep.mubr.bf16.mxu1 %v4615_v58 }
  0xf0   : > { %5101 = vmatprep.subr.bf16.mxu1 %v6235_v10 }
  0xf3   : > { %5102 = vmatpush3.bf16.msra.mxu1 %v6240_v12 }
  0xf4   : > { %5103 = vmatprep.subr.bf16.mxu1 %v6244_v14 }
  0xf6   : > { %1903 = vmatmul.mubr.bf16.gmra.mrb[76].mxu1 %v4614_v61 }
  0xf7   : > { %5104 = vmatpush3.bf16.msra.mxu1 %v6250_v15 }
  0xf8   : > { %5105 = vmatprep.subr.bf16.mxu1 %v6254_v16 }
  0xfb   : > { %5106 = vmatpush3.bf16.msra.mxu1 %v6260_v17 }
  0xfc   : > { %5136 = vmatprep.subr.bf16.mxu1 %v6188_v0 }
 0x131   : > { %v4832_v18 = vpop.f32.mrb[0].mxu1  ;;  %v4792_v22 = vpop.f32.mrb[0].mxu0 }
 0x132   : > { %v4833_v19 = vpop.f32.mrb[1].mxu1  ;;  %v4793_v25 = vpop.f32.mrb[1].mxu0 }
 0x133   : > { %v4834_v20 = vadd.f32 %v4833_v19, %v4832_v18  ;;  %v4835_v21 = vpop.f32.mrb[2].mxu1  ;;  %v6345_v28 = vadd.f32 %v4793_v25, %v4792_v22  ;;  %v4795_v29 = vpop.f32.mrb[2].mxu0 }
 0x134   : > { %v4836_v24 = vpop.f32.mrb[3].mxu1  ;;  %v4796_v30 = vpop.f32.mrb[3].mxu0 }
 0x135   : > { %v4837_v27 = vadd.f32 %v4836_v24, %v4835_v21  ;;  %v6347_v32 = vadd.f32 %v4796_v30, %v4795_v29  ;;  %v5848_v24 = vld [vmem:[#allocation2 + $0x18c] ss:$8 sps:$4 sm:$0xff]  }
 0x136   : > { %2079 = vmatprep.mubr.bf16.mxu1 %v5848_v24  ;;  %v5868_v24 = vld [vmem:[#allocation2 + $0x1e0] ss:$8 sps:$4 sm:$0xff]  }
 0x137   : > { %v831_v31 = vpack.c.bf16 %v4837_v27, %v4834_v20  ;;  %v717_v34 = vpack.c.bf16 %v6347_v32, %v6345_v28  ;;  %2080 = vmatmul.mubr.bf16.vlgmr.msra.gmra.mrb[80].mxu1 %v5846_v23  ;;  %v4577_v28 = vld [vmem:[%s6989_s2 + $0x6] sm:$0x3] }
 0x138   : > { %5137 = vmatpush3.bf16.msra.mxu1 %v6191_v1  ;;  %2087 = vmatprep.mubr.bf16.mxu1 %v5851_v39 }
 0x139   : > { %v4838_v33 = vpop.f32.mrb[4].mxu1  ;;  %5287 = vmatprep.mubr.msk.bf16.mxu0 %vm837_vm1, %v831_v31  ;;  %v4798_v38 = vpop.f32.mrb[4].mxu0  ;;  %5138 = vmatprep.subr.bf16.mxu1 %v6195_v2 }
 0x13a   : > { %v4839_v35 = vpop.f32.mrb[5].mxu1  ;;  %v4799_v41 = vpop.f32.mrb[5].mxu0 }
 0x13b   : > { %v4840_v36 = vadd.f32 %v4839_v35, %v4838_v33  ;;  %v4841_v37 = vpop.f32.mrb[6].mxu1  ;;  %v6356_v44 = vadd.f32 %v4799_v41, %v4798_v38  ;;  %v4801_v45 = vpop.f32.mrb[6].mxu0 }
 0x13c   : > { %v4842_v40 = vpop.f32.mrb[7].mxu1  ;;  %v4802_v46 = vpop.f32.mrb[7].mxu0  ;;  %5139 = vmatpush3.bf16.msra.mxu1 %v6200_v3 }
 0x13d   : > { %v4843_v43 = vadd.f32 %v4842_v40, %v4841_v37  ;;  %v6358_v48 = vadd.f32 %v4802_v46, %v4801_v45  ;;  %5140 = vmatprep.subr.bf16.mxu1 %v6205_v4  ;;  %v5855_v4 = vld [vmem:[#allocation2 + $0x1ac] ss:$8 sps:$4 sm:$0xff]  }
 0x13f   : > { %v832_v47 = vpack.c.bf16 %v4843_v43, %v4840_v36  ;;  %v718_v52 = vpack.c.bf16 %v6358_v48, %v6356_v44  ;;  %v1125_v43 = vsel %vm850_vm0, %v4564_v50, 0  ;;  %2088 = vmatmul.mubr.bf16.gmra.mrb[84].mxu1 %v5854_v42  ;;  %v2009_v44 = vld [vmem:[#allocation2 + $0x1b8] sm:$0x11] }
 0x140   : > { %5141 = vmatpush3.bf16.msra.mxu1 %v6210_v5  ;;  %2095 = vmatprep.mubr.bf16.mxu1 %v5855_v4 }
 0x141   : > { %v4844_v51 = vpop.f32.mrb[8].mxu1  ;;  %5288 = vmatmul.mubr.msk.bf16.vlgmr.msra.gmra.mrb[16].mxu0 %vm837_vm1, %v832_v47  ;;  %v4804_v57 = vpop.f32.mrb[8].mxu0  ;;  %5142 = vmatprep.subr.bf16.mxu1 %v6215_v6 }
 0x142   : > { %v4845_v53 = vpop.f32.mrb[9].mxu1  ;;  %5296 = vmatpush3.bf16.msra.mxu0 %v931_v49  ;;  %v4805_v60 = vpop.f32.mrb[9].mxu0  ;;  %v4628_v49 = vcombine.high %v2009_v44, %v2009_v44 }
 0x143   : > { %v4846_v55 = vadd.f32 %v4845_v53, %v4844_v51  ;;  %v4847_v56 = vpop.f32.mrb[10].mxu1  ;;  %5693 = vmatprep.subr.msk.bf16.mxu0 %vm850_vm0, %v4564_v50  ;;  %v4806_v63 = vadd.f32 %v4805_v60, %v4804_v57  ;;  %v4807_v11 = vpop.f32.mrb[10].mxu0  ;;  %v5860_v57 = vld [vmem:[#allocation2 + $0x1c0] ss:$8 sps:$4 sm:$0xff]   ;;  %v5863_v60 = vld [vmem:[#allocation2 + $0x1d4] ss:$8 sps:$4 sm:$0xff]  }
 0x144   : > { %v4848_v59 = vpop.f32.mrb[11].mxu1  ;;  %v4808_v13 = vpop.f32.mrb[11].mxu0  ;;  %5143 = vmatpush3.bf16.msra.mxu1 %v6220_v7  ;;  %v4627_v7 = vcombine.low %v2009_v44, %v2009_v44 }
 0x145   : > { %v4849_v62 = vadd.f32 %v4848_v59, %v4847_v56  ;;  %v4809_v19 = vadd.f32 %v4808_v13, %v4807_v11  ;;  %5144 = vmatprep.subr.bf16.mxu1 %v6225_v8 }
 0x147   : > { %v833_v18 = vpack.c.bf16 %v4849_v62, %v4846_v55  ;;  %v719_v21 = vpack.c.bf16 %v4809_v19, %v4806_v63  ;;  %v1326_v55 = vsel %vm850_vm0, %v4577_v28, 0  ;;  %v5865_v63 = vld [vmem:[#allocation2 + $0x1d0] ss:$8 sps:$4 sm:$0xff]  }
 0x148   : > { %5145 = vmatpush3.bf16.msra.mxu1 %v6230_v9  ;;  %v4590_v9 = vld [vmem:[%s6989_s2 + $0x8] sm:$0x3] }
 0x149   : > { %v4850_v20 = vpop.f32.mrb[12].mxu1  ;;  %5291 = vmatprep.mubr.msk.bf16.mxu0 %vm837_vm1, %v833_v18  ;;  %v4810_v27 = vpop.f32.mrb[12].mxu0  ;;  %5146 = vmatprep.subr.bf16.mxu1 %v6235_v10  ;;  %v5862_v10 = vld [vmem:[#allocation2 + $0x1c4] ss:$8 sps:$4 sm:$0xff]  }
 0x14a   : > { %v4851_v22 = vpop.f32.mrb[13].mxu1  ;;  %v4811_v30 = vpop.f32.mrb[13].mxu0  ;;  %v5866_v18 = vld [vmem:[#allocation2 + $0x1e4] ss:$8 sps:$4 sm:$0xff]  }
 0x14b   : > { %v4852_v25 = vadd.f32 %v4851_v22, %v4850_v20  ;;  %v4853_v26 = vpop.f32.mrb[14].mxu1  ;;  %v4812_v33 = vadd.f32 %v4811_v30, %v4810_v27  ;;  %v4813_v35 = vpop.f32.mrb[14].mxu0  ;;  %v2210_v22 = vld [vmem:[#allocation2 + $0x1f0] sm:$0x11] }
 0x14c   : > { %v4854_v29 = vpop.f32.mrb[15].mxu1  ;;  %v4814_v36 = vpop.f32.mrb[15].mxu0  ;;  %5147 = vmatpush3.bf16.msra.mxu1 %v6240_v12  ;;  %v4641_v27 = vcombine.high %v2210_v22, %v2210_v22 }
 0x14d   : > { %v834_v31 = vpack.c.bf16 %v4852_v25, %v4852_v25  ;;  %v720_v45 = vpack.c.bf16 %v4812_v33, %v4812_v33  ;;  %5148 = vmatprep.subr.bf16.mxu1 %v6244_v14  ;;  %v1527_v33 = vsel %vm850_vm0, %v4590_v9, 0 }
 0x14f   : > { %5292 = vmatmul.mubr.msk.bf16.gmra.mrb[20].mxu0 %vm837_vm1, %v834_v31 }
 0x150   : > { %5297 = vmatprep.mubr.msk.bf16.mxu0 %vm837_vm1, %v717_v34  ;;  %v5857_v34 = vld [vmem:[#allocation2 + $0x1a8] ss:$8 sps:$4 sm:$0xff]   ;;  %5149 = vmatpush3.bf16.msra.mxu1 %v6250_v15 }
 0x151   : > { %v4882_v37 = vpop.f32.mrb[16].mxu1  ;;  %2096 = vmatmul.mubr.bf16.gmra.mrb[88].mxu1 %v5857_v34  ;;  %5150 = vmatprep.subr.bf16.mxu1 %v6254_v16 }
 0x152   : > { %v4883_v38 = vpop.f32.mrb[17].mxu1  ;;  %2103 = vmatprep.mubr.bf16.mxu1 %v4628_v49 }
 0x153   : > { %v4884_v0 = vadd.f32 %v4883_v38, %v4882_v37  ;;  %v4885_v40 = vpop.f32.mrb[18].mxu1  ;;  %v4640_v37 = vcombine.low %v2210_v22, %v2210_v22  ;;  %v5913_v22 = vld [vmem:[%s6185_s26 + $0x28] sm:$0xff]  }
 0x154   : > { %v4886_v41 = vpop.f32.mrb[19].mxu1  ;;  %5151 = vmatpush3.bf16.msra.mxu1 %v6260_v17 }
 0x155   : > { %v4887_v1 = vadd.f32 %v4886_v41, %v4885_v40 }
 0x157   : > { %v1106_v2 = vpack.c.bf16 %v4887_v1, %v4884_v0  ;;  %5298 = vmatmul.mubr.msk.bf16.vlgmr.msra.gmra.mrb[16].mxu0 %vm837_vm1, %v718_v52  ;;  %v5902_v0 = vld [vmem:[%s6185_s26 + $0x40] sm:$0xff]  }
 0x158   : > { %5301 = vmatprep.mubr.msk.bf16.mxu0 %vm837_vm1, %v719_v21  ;;  %5306 = vmatpush3.bf16.msra.mxu0 %v1125_v43 }
 0x159   : > { %v4888_v3 = vpop.f32.mrb[20].mxu1  ;;  %5694 = vmatprep.subr.msk.bf16.mxu0 %vm850_vm0, %v4577_v28  ;;  %2104 = vmatmul.mubr.bf16.gmra.mrb[92].mxu1 %v4627_v7 }
 0x15a   : > { %v4889_v32 = vpop.f32.mrb[21].mxu1  ;;  %2280 = vmatprep.mubr.bf16.mxu1 %v5862_v10 }
 0x15b   : > { %v4890_v46 = vadd.f32 %v4889_v32, %v4888_v3  ;;  %v4891_v47 = vpop.f32.mrb[22].mxu1 }
 0x15c   : > { %v4892_v48 = vpop.f32.mrb[23].mxu1 }
 0x15d   : > { %v4893_v5 = vadd.f32 %v4892_v48, %v4891_v47 }
 0x15f   : > { %v1107_v50 = vpack.c.bf16 %v4893_v5, %v4890_v46  ;;  %5302 = vmatmul.mubr.msk.bf16.gmra.mrb[24].mxu0 %vm837_vm1, %v720_v45 }
 0x160   : > { %5307 = vmatprep.mubr.msk.bf16.mxu0 %vm837_vm1, %v1106_v2 }
 0x161   : > { %v4894_v6 = vpop.f32.mrb[24].mxu1  ;;  %2281 = vmatmul.mubr.bf16.vlgmr.msra.gmra.mrb[96].mxu1 %v5860_v57 }
 0x162   : > { %v4895_v51 = vpop.f32.mrb[25].mxu1  ;;  %2288 = vmatprep.mubr.bf16.mxu1 %v5863_v60  ;;  %v5907_v60 = vld [vmem:[%s6185_s26 + $0x10] sm:$0xff]  }
 0x163   : > { %v4896_v52 = vadd.f32 %v4895_v51, %v4894_v6  ;;  %v4897_v53 = vpop.f32.mrb[26].mxu1 }
 0x164   : > { %v4898_v8 = vpop.f32.mrb[27].mxu1 }
 0x165   : > { %v4899_v54 = vadd.f32 %v4898_v8, %v4897_v53  ;;  %v5903_v8 = vld [vmem:[%s6185_s26] sm:$0xff]  }
 0x167   : > { %v1108_v56 = vpack.c.bf16 %v4899_v54, %v4896_v52  ;;  %5308 = vmatmul.mubr.msk.bf16.vlgmr.msra.gmra.mrb[16].mxu0 %vm837_vm1, %v1107_v50 }
 0x168   : > { %5316 = vmatpush3.bf16.msra.mxu0 %v1326_v55  ;;  %v5904_v55 = vld [vmem:[%s6185_s26 + $0x48] sm:$0xff]  }
 0x169   : > { %v4900_v12 = vpop.f32.mrb[28].mxu1  ;;  %5311 = vmatprep.mubr.msk.bf16.mxu0 %vm837_vm1, %v1108_v56  ;;  %5695 = vmatprep.subr.msk.bf16.mxu0 %vm850_vm0, %v4590_v9 }
 0x16a   : > { %v4901_v14 = vpop.f32.mrb[29].mxu1  ;;  %2289 = vmatmul.mubr.bf16.gmra.mrb[100].mxu1 %v5865_v63 }
 0x16b   : > { %v4902_v58 = vadd.f32 %v4901_v14, %v4900_v12  ;;  %v4903_v59 = vpop.f32.mrb[30].mxu1  ;;  %2296 = vmatprep.mubr.bf16.mxu1 %v5866_v18  ;;  %v5905_v14 = vld [vmem:[%s6185_s26 + $0x8] sm:$0xff]   ;;  %v5909_v18 = vld [vmem:[%s6185_s26 + $0x18] sm:$0xff]  }
 0x16c   : > { %v4904_v61 = vpop.f32.mrb[31].mxu1 }
 0x16d   : > { %v1109_v62 = vpack.c.bf16 %v4902_v58, %v4902_v58  ;;  %v5906_v58 = vld [vmem:[%s6185_s26 + $0x50] sm:$0xff]  }
 0x16f   : > { %5312 = vmatmul.mubr.msk.bf16.gmra.mrb[28].mxu0 %vm837_vm1, %v1109_v62 }
 0x171   : > { %v4927_v15 = vpop.f32.mrb[32].mxu1 }
 0x172   : > { %v4928_v16 = vpop.f32.mrb[33].mxu1  ;;  %2297 = vmatmul.mubr.bf16.gmra.mrb[104].mxu1 %v5868_v24  ;;  %v5916_v24 = vld [vmem:[%s6185_s26 + $0x78] sm:$0xff]  }
 0x173   : > { %v4929_v11 = vadd.f32 %v4928_v16, %v4927_v15  ;;  %v4930_v13 = vpop.f32.mrb[34].mxu1  ;;  %2304 = vmatprep.mubr.bf16.mxu1 %v4641_v27  ;;  %v5908_v15 = vld [vmem:[%s6185_s26 + $0x58] sm:$0xff]   ;;  %v5839_v27 = vld [vmem:[#allocation2 + $0x12c] ss:$8 sps:$4 sm:$0xff]  }
 0x174   : > { %v4931_v19 = vpop.f32.mrb[35].mxu1 }
 0x175   : > { %v4932_v20 = vadd.f32 %v4931_v19, %v4930_v13  ;;  %v5910_v19 = vld [vmem:[%s6185_s26 + $0x60] sm:$0xff]  }
 0x177   : > { %v1307_v21 = vpack.c.bf16 %v4932_v20, %v4929_v11  ;;  %v5835_v11 = vld [vmem:[#allocation2 + $0x11c] ss:$8 sps:$4 sm:$0xff]  }
 0x178   : > { %v5911_v20 = vld [vmem:[%s6185_s26 + $0x20] sm:$0xff]  }
 0x179   : > { %v4933_v17 = vpop.f32.mrb[36].mxu1  ;;  %5317 = vmatprep.mubr.msk.bf16.mxu0 %vm837_vm1, %v1307_v21  ;;  %v5912_v21 = vld [vmem:[%s6185_s26 + $0x68] sm:$0xff]  }
 0x17a   : > { %v4934_v23 = vpop.f32.mrb[37].mxu1  ;;  %2305 = vmatmul.mubr.bf16.gmra.mrb[108].mxu1 %v4640_v37 }
 0x17b   : > { %v4935_v25 = vadd.f32 %v4934_v23, %v4933_v17  ;;  %v4936_v26 = vpop.f32.mrb[38].mxu1  ;;  %v5914_v17 = vld [vmem:[%s6185_s26 + $0x70] sm:$0xff]  }
 0x17c   : > { %v4937_v29 = vpop.f32.mrb[39].mxu1  ;;  %v5915_v23 = vld [vmem:[%s6185_s26 + $0x30] sm:$0xff]  }
 0x17d   : > { %v4938_v30 = vadd.f32 %v4937_v29, %v4936_v26  ;;  %v5917_v26 = vld [vmem:[%s6185_s26 + $0x38] sm:$0xff]   ;;  %v5842_v29 = vld [vmem:[#allocation2 + $0x128] ss:$8 sps:$4 sm:$0xff]   ;;  %s4440_s26 = sshll.u32 %s474_s28, 4  ;;  %s6947_s26 = int_to_ptr.vmem [resolvable:$true] %s4440_s26 }
 0x17e   : > { %s5946_s17 = scalar_lea.vmem %s6947_s26, 16  ;;  %p5953_p2 = scmp.lt.s32.totalorder %s6947_s26, %s5951_s19 }
 0x17f   : > { %v1308_v31 = vpack.c.bf16 %v4938_v30, %v4935_v25  ;;  %v5833_v25 = vld [vmem:[#allocation2 + $0x118] ss:$8 sps:$4 sm:$0xff]   ;;  %v5844_v30 = vld [vmem:[#allocation2 + $0x13c] ss:$8 sps:$4 sm:$0xff]   ;;  %p5947_p6 = scmp.ne.s32.totalorder %s6947_s26, %s5946_s17  ;;  %p5954_p3 = scmp.lt.s32.totalorder %s5952_s24, %s5946_s17 }
 0x181   : > { %v4939_v35 = vpop.f32.mrb[40].mxu1  ;;  %5318 = vmatmul.mubr.msk.bf16.vlgmr.msra.gmra.mrb[16].mxu0 %vm837_vm1, %v1308_v31  ;;  %v1607_v31 = vld [vmem:[#allocation2 + $0x148] sm:$0x11]  ;;  %p5948_p10 = pnand %p5947_p6, %p7020_p9  ;;  %p5955_p4 = por %p5954_p3, %p5953_p2 }
 0x182   : > { %v4940_v36 = vpop.f32.mrb[41].mxu1  ;;  %5326 = vmatpush3.bf16.msra.mxu0 %v1527_v33  ;;  %v5849_v33 = vld [vmem:[#allocation2 + $0x138] ss:$8 sps:$4 sm:$0xff]  }
 0x183   : > { %v4941_v38 = vadd.f32 %v4940_v36, %v4939_v35  ;;  %v4942_v39 = vpop.f32.mrb[42].mxu1  ;;  %5001 = vmatprep.subr.bf16.mxu0 %v5902_v0  ;;  %v4602_v35 = vcombine.high %v1607_v31, %v1607_v31  ;;  %v4601_v36 = vcombine.low %v1607_v31, %v1607_v31  ;;  %p5949_p12 = pneg %p5948_p10 }
 0x184   : > { %v4943_v40 = vpop.f32.mrb[43].mxu1 }
 0x185   : > { %v4944_v41 = vadd.f32 %v4943_v40, %v4942_v39  ;;  %p5956_p7 = pnand %p5955_p4, %p5949_p12 }
 0x187   : > { %v1309_v42 = vpack.c.bf16 %v4944_v41, %v4941_v38 }
 0x189   : > { %v4945_v1 = vpop.f32.mrb[44].mxu1  ;;  %5321 = vmatprep.mubr.msk.bf16.mxu0 %vm837_vm1, %v1309_v42 }
 0x18a   : > { %v4946_v43 = vpop.f32.mrb[45].mxu1 }
 0x18b   : > { %v4947_v28 = vadd.f32 %v4946_v43, %v4945_v1  ;;  %v4948_v2 = vpop.f32.mrb[46].mxu1 }
 0x18c   : > { %v4949_v3 = vpop.f32.mrb[47].mxu1 }
 0x18d   : > { %v1310_v4 = vpack.c.bf16 %v4947_v28, %v4947_v28 }
 0x18f   : > { %5322 = vmatmul.mubr.msk.bf16.gmra.mrb[32].mxu0 %vm837_vm1, %v1310_v4 }
 0x191   : > { %v4972_v32 = vpop.f32.mrb[48].mxu1 }
 0x192   : > { %v4973_v34 = vpop.f32.mrb[49].mxu1 }
 0x193   : > { %v4974_v44 = vadd.f32 %v4973_v34, %v4972_v32  ;;  %v4975_v45 = vpop.f32.mrb[50].mxu1 }
 0x194   : > { %v4976_v46 = vpop.f32.mrb[51].mxu1 }
 0x195   : > { %v4977_v47 = vadd.f32 %v4976_v46, %v4975_v45 }
 0x197   : > { %v1508_v48 = vpack.c.bf16 %v4977_v47, %v4974_v44 }
 0x199   : > { %v4978_v5 = vpop.f32.mrb[52].mxu1  ;;  %5327 = vmatprep.mubr.msk.bf16.mxu0 %vm837_vm1, %v1508_v48 }
 0x19a   : > { %v4979_v49 = vpop.f32.mrb[53].mxu1 }
 0x19b   : > { %v4980_v50 = vadd.f32 %v4979_v49, %v4978_v5  ;;  %v4981_v6 = vpop.f32.mrb[54].mxu1 }
 0x19c   : > { %v4982_v51 = vpop.f32.mrb[55].mxu1 }
 0x19d   : > { %v4983_v7 = vadd.f32 %v4982_v51, %v4981_v6 }
 0x19f   : > { %v1509_v52 = vpack.c.bf16 %v4983_v7, %v4980_v50  ;;  %v4603_v50 = vld [vmem:[%s6989_s2 + $0xa] sm:$0x3] }
 0x1a0   : > { %v1728_v51 = vsel %vm850_vm0, %v4603_v50, 0 }
 0x1a1   : > { %5328 = vmatmul.mubr.msk.bf16.vlgmr.msra.gmra.mrb[16].mxu0 %vm837_vm1, %v1509_v52  ;;  %v4984_v53 = vpop.f32.mrb[56].mxu1 }
 0x1a2   : > { %5002 = vmatpush3.bf16.msra.mxu0 %v5903_v8  ;;  %v4985_v54 = vpop.f32.mrb[57].mxu1 }
 0x1a3   : > { %5003 = vmatprep.subr.bf16.mxu0 %v5904_v55  ;;  %v4986_v9 = vadd.f32 %v4985_v54, %v4984_v53  ;;  %v4987_v10 = vpop.f32.mrb[58].mxu1 }
 0x1a4   : > { %v4988_v56 = vpop.f32.mrb[59].mxu1 }
 0x1a5   : > { %v4989_v12 = vadd.f32 %v4988_v56, %v4987_v10 }
 0x1a6   : > { %5004 = vmatpush3.bf16.msra.mxu0 %v5905_v14 }
 0x1a7   : > { %v1510_v57 = vpack.c.bf16 %v4989_v12, %v4986_v9  ;;  %5005 = vmatprep.subr.bf16.mxu0 %v5906_v58 }
 0x1a9   : > { %v4990_v59 = vpop.f32.mrb[60].mxu1  ;;  %5331 = vmatprep.mubr.msk.bf16.mxu0 %vm837_vm1, %v1510_v57 }
 0x1aa   : > { %5006 = vmatpush3.bf16.msra.mxu0 %v5907_v60  ;;  %v4991_v61 = vpop.f32.mrb[61].mxu1 }
 0x1ab   : > { %v4992_v62 = vadd.f32 %v4991_v61, %v4990_v59  ;;  %5007 = vmatprep.subr.bf16.mxu0 %v5908_v15  ;;  %v4993_v16 = vpop.f32.mrb[62].mxu1 }
 0x1ac   : > { %v4994_v63 = vpop.f32.mrb[63].mxu1 }
 0x1ad   : > { %v1511_v13 = vpack.c.bf16 %v4992_v62, %v4992_v62 }
 0x1ae   : > { %5008 = vmatpush3.bf16.msra.mxu0 %v5909_v18 }
 0x1af   : > { %5332 = vmatmul.mubr.msk.bf16.gmra.mrb[36].mxu0 %vm837_vm1, %v1511_v13  ;;  %5009 = vmatprep.subr.bf16.mxu0 %v5910_v19 }
 0x1b0   : > { %1677 = vmatprep.mubr.bf16.mxu0 %v5835_v11 }
 0x1b1   : > { %v5062_v37 = vpop.f32.mrb[64].mxu1 }
 0x1b2   : > { %5010 = vmatpush3.bf16.msra.mxu0 %v5911_v20  ;;  %v5063_v38 = vpop.f32.mrb[65].mxu1 }
 0x1b3   : > { %5011 = vmatprep.subr.bf16.mxu0 %v5912_v21  ;;  %v5065_v39 = vpop.f32.mrb[66].mxu1  ;;  %v6439_v40 = vadd.f32 %v5063_v38, %v5062_v37 }
 0x1b4   : > { %v5066_v0 = vpop.f32.mrb[67].mxu1 }
 0x1b5   : > { %v6441_v41 = vadd.f32 %v5066_v0, %v5065_v39 }
 0x1b6   : > { %5012 = vmatpush3.bf16.msra.mxu0 %v5913_v22  ;;  %v6479_v22 = vld [vmem:[%s6989_s2 + $0xc] sm:$0x3] }
 0x1b7   : > { %5013 = vmatprep.subr.bf16.mxu0 %v5914_v17  ;;  %v1910_v42 = vpack.c.bf16 %v6441_v41, %v6439_v40 }
 0x1b9   : > { %v5068_v1 = vpop.f32.mrb[68].mxu1 }
 0x1ba   : > { %5014 = vmatpush3.bf16.msra.mxu0 %v5915_v23  ;;  %v5069_v43 = vpop.f32.mrb[69].mxu1 }
 0x1bb   : > { %5015 = vmatprep.subr.bf16.mxu0 %v5916_v24  ;;  %v6445_v28 = vadd.f32 %v5069_v43, %v5068_v1  ;;  %v5071_v2 = vpop.f32.mrb[70].mxu1 }
 0x1bc   : > { %v5072_v3 = vpop.f32.mrb[71].mxu1 }
 0x1bd   : > { %v6447_v4 = vadd.f32 %v5072_v3, %v5071_v2 }
 0x1be   : > { %5016 = vmatpush3.bf16.msra.mxu0 %v5917_v26 }
 0x1bf   : > { %v1911_v32 = vpack.c.bf16 %v6447_v4, %v6445_v28  ;;  %5696 = vmatprep.subr.msk.bf16.mxu0 %vm850_vm0, %v4603_v50  ;;  %v6017_v4 = vmov 0.0  }
 0x1c0   : > { %5387 = vmatprep.subr.bf16.mxu1 %v6017_v4  ;;  %5395 = vmatprep.mubr.msk.bf16.mxu1 %vm6018_vm2, %v6017_v4 }
 0x1c1   : > { %1678 = vmatmul.mubr.bf16.vlgmr.msra.gmra.mrb[40].mxu0 %v5833_v25  ;;  %v5074_v34 = vpop.f32.mrb[72].mxu1 }
 0x1c2   : > { %1685 = vmatprep.mubr.bf16.mxu0 %v5839_v27  ;;  %v5075_v44 = vpop.f32.mrb[73].mxu1  ;;  %5336 = vmatpush3.bf16.msra.mxu0 %v1728_v51 }
 0x1c3   : > { %v5077_v45 = vpop.f32.mrb[74].mxu1  ;;  %v6451_v47 = vadd.f32 %v5075_v44, %v5074_v34  ;;  %5697 = vmatprep.subr.msk.bf16.mxu0 %vm850_vm0, %v6479_v22 }
 0x1c4   : > { %v5078_v46 = vpop.f32.mrb[75].mxu1 }
 0x1c5   : > { %v6453_v48 = vadd.f32 %v5078_v46, %v5077_v45 }
 0x1c7   : > { %v1912_v5 = vpack.c.bf16 %v6453_v48, %v6451_v47 }
 0x1c9   : > { %1686 = vmatmul.mubr.bf16.gmra.mrb[44].mxu0 %v5842_v29  ;;  %v5080_v49 = vpop.f32.mrb[76].mxu1 }
 0x1ca   : > { %1693 = vmatprep.mubr.bf16.mxu0 %v5844_v30  ;;  %v5081_v6 = vpop.f32.mrb[77].mxu1 }
 0x1cb   : > { %v5083_v7 = vpop.f32.mrb[78].mxu1  ;;  %v6462_v53 = vadd.f32 %v5081_v6, %v5080_v49 }
 0x1cc   : > { %v5084_v52 = vpop.f32.mrb[79].mxu1 }
 0x1cd   : > { %v1913_v40 = vpack.c.bf16 %v6462_v53, %v6462_v53 }
 0x1d1   : > { %1694 = vmatmul.mubr.bf16.gmra.mrb[48].mxu0 %v5849_v33 }
 0x1d2   : > { %1701 = vmatprep.mubr.bf16.mxu0 %v4602_v35 }
 0x1d9   : > { %1702 = vmatmul.mubr.bf16.gmra.mrb[52].mxu0 %v4601_v36 }
 0x20a   : > { %v5107_v8 = vpop.f32.mrb[80].mxu1 }
 0x20b   : > { %v5108_v55 = vpop.f32.mrb[81].mxu1 }
 0x20c   : > { %v5110_v10 = vpop.f32.mrb[82].mxu1  ;;  %v6464_v57 = vadd.f32 %v5108_v55, %v5107_v8 }
 0x20d   : > { %v5111_v12 = vpop.f32.mrb[83].mxu1 }
 0x20e   : > { %v6466_v58 = vadd.f32 %v5111_v12, %v5110_v10 }
 0x210   : > { %v2111_v59 = vpack.c.bf16 %v6466_v58, %v6464_v57 }
 0x212   : > { %v5113_v60 = vpop.f32.mrb[84].mxu1 }
 0x213   : > { %v5114_v61 = vpop.f32.mrb[85].mxu1 }
 0x214   : > { %v5116_v62 = vpop.f32.mrb[86].mxu1  ;;  %v6470_v16 = vadd.f32 %v5114_v61, %v5113_v60 }
 0x215   : > { %v5117_v15 = vpop.f32.mrb[87].mxu1 }
 0x216   : > { %v6472_v63 = vadd.f32 %v5117_v15, %v5116_v62 }
 0x218   : > { %v2112_v11 = vpack.c.bf16 %v6472_v63, %v6470_v16 }
 0x222   : > { %v5293_v54 = vpop.f32.mrb[20].mxu0 }
 0x223   : > { %v904_v9 = vpop.f32.mrb[21].mxu0 }
 0x224   : > { %v5294_v56 = vpop.f32.mrb[22].mxu0  ;;  %v5119_v13 = vpop.f32.mrb[88].mxu1 }
 0x225   : > { %v907_v14 = vpop.f32.mrb[23].mxu0  ;;  %v5120_v19 = vpop.f32.mrb[89].mxu1 }
 0x226   : > { %v6481_v17 = vadd.f32 %v5120_v19, %v5119_v13  ;;  %v5122_v23 = vpop.f32.mrb[90].mxu1 }
 0x227   : > { %v5123_v26 = vpop.f32.mrb[91].mxu1 }
 0x228   : > { %v6485_v29 = vadd.f32 %v5123_v26, %v5122_v23 }
 0x22a   : > { %v2113_v31 = vpack.c.bf16 %v6485_v29, %v6481_v17 }
 0x22c   : > { %v5125_v33 = vpop.f32.mrb[92].mxu1 }
 0x22d   : > { %v5126_v35 = vpop.f32.mrb[93].mxu1 }
 0x22e   : > { %v6489_v36 = vadd.f32 %v5126_v35, %v5125_v33  ;;  %v5128_v37 = vpop.f32.mrb[94].mxu1 }
 0x22f   : > { %v5129_v38 = vpop.f32.mrb[95].mxu1 }
 0x232   : > { %v5303_v18 = vpop.f32.mrb[24].mxu0 }
 0x233   : > { %v992_v20 = vadd.f32 %v5303_v18, %v5293_v54  ;;  %v983_v21 = vpop.f32.mrb[25].mxu0 }
 0x234   : > { %v984_v24 = vadd.f32 %v983_v21, %v904_v9  ;;  %v5304_v25 = vpop.f32.mrb[26].mxu0  ;;  %v5152_v39 = vpop.f32.mrb[96].mxu1 }
 0x235   : > { %v986_v27 = vpop.f32.mrb[27].mxu0  ;;  %v5153_v1 = vpop.f32.mrb[97].mxu1 }
 0x236   : > { %v987_v30 = vadd.f32 %v986_v27, %v907_v14  ;;  %v6491_v3 = vadd.f32 %v5153_v1, %v5152_v39  ;;  %v5155_v34 = vpop.f32.mrb[98].mxu1 }
 0x237   : > { %v5156_v46 = vpop.f32.mrb[99].mxu1 }
 0x238   : > { %v6493_v50 = vadd.f32 %v5156_v46, %v5155_v34 }
 0x23a   : > { %v2312_v51 = vpack.c.bf16 %v6493_v50, %v6491_v3 }
 0x23d   : > { %v5158_v7 = vpop.f32.mrb[100].mxu1 }
 0x23e   : > { %v5159_v52 = vpop.f32.mrb[101].mxu1 }
 0x23f   : > { %v6497_v8 = vadd.f32 %v5159_v52, %v5158_v7  ;;  %v5161_v54 = vpop.f32.mrb[102].mxu1 }
 0x240   : > { %v5162_v55 = vpop.f32.mrb[103].mxu1 }
 0x241   : > { %v6499_v9 = vadd.f32 %v5162_v55, %v5161_v54 }
 0x242   : > { %v5313_v0 = vpop.f32.mrb[28].mxu0 }
 0x243   : > { %v1197_v43 = vadd.f32 %v5313_v0, %v992_v20  ;;  %v1177_v2 = vpop.f32.mrb[29].mxu0  ;;  %v2313_v10 = vpack.c.bf16 %v6499_v9, %v6497_v8 }
 0x244   : > { %v1195_v44 = vadd.f32 %v1177_v2, %v984_v24  ;;  %v5314_v45 = vpop.f32.mrb[30].mxu0 }
 0x245   : > { %v1180_v49 = vpop.f32.mrb[31].mxu0  ;;  %v5164_v56 = vpop.f32.mrb[104].mxu1 }
 0x246   : > { %v1196_v6 = vadd.f32 %v1180_v49, %v987_v30  ;;  %v5165_v12 = vpop.f32.mrb[105].mxu1 }
 0x247   : > { %v6503_v14 = vadd.f32 %v5165_v12, %v5164_v56  ;;  %v5167_v60 = vpop.f32.mrb[106].mxu1 }
 0x248   : > { %v5168_v61 = vpop.f32.mrb[107].mxu1 }
 0x249   : > { %v6505_v62 = vadd.f32 %v5168_v61, %v5167_v60  ;;  %v1929_v61 = vsel %vm850_vm0, %v6479_v22, 0 }
 0x24b   : > { %v2314_v15 = vpack.c.bf16 %v6505_v62, %v6503_v14  ;;  %v4647_v14 = vld [vmem:[%s6990_s3] ss:$0 sm:$0xff] }
 0x24d   : > { %v5170_v13 = vpop.f32.mrb[108].mxu1 }
 0x24e   : > { %v5171_v18 = vpop.f32.mrb[109].mxu1 }
 0x24f   : > { %v6509_v19 = vadd.f32 %v5171_v18, %v5170_v13  ;;  %v5173_v20 = vpop.f32.mrb[110].mxu1  ;;  %v4629_v13 = vld [vmem:[%s6989_s2 + $0xe] sm:$0x3] }
 0x250   : > { %v5174_v21 = vpop.f32.mrb[111].mxu1 }
 0x251   : > { %v2315_v28 = vpack.c.bf16 %v6509_v19, %v6509_v19 }
 0x262   : > { %v5323_v23 = vpop.f32.mrb[32].mxu0 }
 0x263   : > { %v1398_v24 = vadd.f32 %v5323_v23, %v1197_v43  ;;  %v1378_v25 = vpop.f32.mrb[33].mxu0 }
 0x264   : > { %v1396_v26 = vadd.f32 %v1378_v25, %v1195_v44  ;;  %v5324_v27 = vpop.f32.mrb[34].mxu0 }
 0x265   : > { %v1381_v30 = vpop.f32.mrb[35].mxu0 }
 0x266   : > { %v1397_v33 = vadd.f32 %v1381_v30, %v1196_v6 }
 0x282   : > { %v5333_v35 = vpop.f32.mrb[36].mxu0 }
 0x283   : > { %v6511_v37 = vadd.f32 %v5333_v35, %v1398_v24  ;;  %v1579_v38 = vpop.f32.mrb[37].mxu0 }
 0x284   : > { %v6513_v39 = vadd.f32 %v1579_v38, %v1396_v26  ;;  %v5334_v0 = vpop.f32.mrb[38].mxu0 }
 0x285   : > { %v1582_v1 = vpop.f32.mrb[39].mxu0  ;;  %v2130_v0 = vsel %vm850_vm0, %v4629_v13, 0 }
 0x286   : > { %v6515_v2 = vadd.f32 %v1582_v1, %v1397_v33  ;;  %v4642_v1 = vld [vmem:[%s6989_s2 + $0x10] sm:$0x3] }
 0x287   : > { %v2331_v41 = vsel %vm850_vm0, %v4642_v1, 0 }
 0x294   : > { %v5017_v34 = vpop.f32.mrb[40].mxu0 }
 0x295   : > { %v5018_v45 = vpop.f32.mrb[41].mxu0 }
 0x296   : > { %v5019_v46 = vadd.f32 %v5018_v45, %v5017_v34  ;;  %v5020_v49 = vpop.f32.mrb[42].mxu0 }
 0x297   : > { %v5021_v43 = vpop.f32.mrb[43].mxu0 }
 0x298   : > { %v5022_v7 = vadd.f32 %v5021_v43, %v5020_v49 }
 0x29a   : > { %v1709_v44 = vpack.c.bf16 %v5022_v7, %v5019_v46 }
 0x29c   : > { %v5023_v52 = vpop.f32.mrb[44].mxu0  ;;  %5337 = vmatprep.mubr.msk.bf16.mxu0 %vm837_vm1, %v1709_v44 }
 0x29d   : > { %v5024_v6 = vpop.f32.mrb[45].mxu0 }
 0x29e   : > { %v5025_v54 = vadd.f32 %v5024_v6, %v5023_v52  ;;  %v5026_v55 = vpop.f32.mrb[46].mxu0 }
 0x29f   : > { %v5027_v56 = vpop.f32.mrb[47].mxu0 }
 0x2a0   : > { %v5028_v12 = vadd.f32 %v5027_v56, %v5026_v55 }
 0x2a2   : > { %v1710_v60 = vpack.c.bf16 %v5028_v12, %v5025_v54 }
 0x2a4   : > { %v5029_v18 = vpop.f32.mrb[48].mxu0  ;;  %5338 = vmatmul.mubr.msk.bf16.vlgmr.msra.gmra.mrb[16].mxu0 %vm837_vm1, %v1710_v60 }
 0x2a5   : > { %v5030_v20 = vpop.f32.mrb[49].mxu0  ;;  %5346 = vmatpush3.bf16.msra.mxu0 %v1929_v61 }
 0x2a6   : > { %v5031_v21 = vadd.f32 %v5030_v20, %v5029_v18  ;;  %v5032_v23 = vpop.f32.mrb[50].mxu0  ;;  %5698 = vmatprep.subr.msk.bf16.mxu0 %vm850_vm0, %v4629_v13 }
 0x2a7   : > { %v5033_v24 = vpop.f32.mrb[51].mxu0 }
 0x2a8   : > { %v5034_v25 = vadd.f32 %v5033_v24, %v5032_v23 }
 0x2aa   : > { %v1711_v26 = vpack.c.bf16 %v5034_v25, %v5031_v21 }
 0x2ac   : > { %v5035_v27 = vpop.f32.mrb[52].mxu0  ;;  %5341 = vmatprep.mubr.msk.bf16.mxu0 %vm837_vm1, %v1711_v26 }
 0x2ad   : > { %v5036_v22 = vpop.f32.mrb[53].mxu0 }
 0x2ae   : > { %v5037_v30 = vadd.f32 %v5036_v22, %v5035_v27  ;;  %v5038_v33 = vpop.f32.mrb[54].mxu0  ;;  %v6019_v27 = vmov 0  }
 0x2af   : > { %v5039_v35 = vpop.f32.mrb[55].mxu0  ;;  %v2442_v22 = vsel %vm2440_vm3, 65535, %v6019_v27  ;;  %v5871_v33 = vld [vmem:[%s6991_s4 + $0x8] sm:$0x1f]  }
 0x2b0   : > { %v1712_v38 = vpack.c.bf16 %v5037_v30, %v5037_v30  ;;  %v5872_v35 = vld [vmem:[%s6991_s4] sm:$0x1f]   ;;  %v5881_v27 = vld [vmem:[%s6991_s4 + $0x28] sm:$0x1f]  }
 0x2b2   : > { %5342 = vmatmul.mubr.msk.bf16.gmra.mrb[56].mxu0 %vm837_vm1, %v1712_v38  ;;  %v5873_v38 = vld [vmem:[%s6992_s5 + $0x8] sm:$0xff]  }
 0x2b3   : > { %5347 = vmatprep.mubr.msk.bf16.mxu0 %vm837_vm1, %v1910_v42  ;;  %v2114_v42 = vpack.c.bf16 %v6489_v36, %v6489_v36 }
 0x2ba   : > { %5348 = vmatmul.mubr.msk.bf16.vlgmr.msra.gmra.mrb[16].mxu0 %vm837_vm1, %v1911_v32 }
 0x2bb   : > { %5351 = vmatprep.mubr.msk.bf16.mxu0 %vm837_vm1, %v1912_v5  ;;  %5356 = vmatpush3.bf16.msra.mxu0 %v2130_v0  ;;  %v5874_v0 = vld [vmem:[%s6992_s5] sm:$0xff]  }
 0x2bc   : > { %5699 = vmatprep.subr.msk.bf16.mxu0 %vm850_vm0, %v4642_v1 }
 0x2c2   : > { %5352 = vmatmul.mubr.msk.bf16.gmra.mrb[60].mxu0 %vm837_vm1, %v1913_v40 }
 0x2c3   : > { %5357 = vmatprep.mubr.msk.bf16.mxu0 %vm837_vm1, %v2111_v59 }
 0x2ca   : > { %5358 = vmatmul.mubr.msk.bf16.vlgmr.msra.gmra.mrb[16].mxu0 %vm837_vm1, %v2112_v11 }
 0x2cb   : > { %5361 = vmatprep.mubr.msk.bf16.mxu0 %vm837_vm1, %v2113_v31  ;;  %5366 = vmatpush3.bf16.msra.mxu0 %v2331_v41 }
 0x2cc   : > { %5375 = vmatprep.subr.bf16.mxu0 %v6017_v4 }
 0x2d2   : > { %5362 = vmatmul.mubr.msk.bf16.gmra.mrb[64].mxu0 %vm837_vm1, %v2114_v42 }
 0x2d3   : > { %5367 = vmatprep.mubr.msk.bf16.mxu0 %vm837_vm1, %v2312_v51 }
 0x2da   : > { %5368 = vmatmul.mubr.msk.bf16.vlgmr.msra.gmra.mrb[16].mxu0 %vm837_vm1, %v2313_v10 }
 0x2db   : > { %5371 = vmatprep.mubr.msk.bf16.mxu0 %vm837_vm1, %v2314_v15 }
 0x2e2   : > { %5372 = vmatmul.mubr.msk.bf16.gmra.mrb[68].mxu0 %vm837_vm1, %v2315_v28 }
 0x2e3   : > { %5383 = vmatprep.mubr.msk.bf16.mxu0 %vm6018_vm2, %v6017_v4 }
 0x385   : > { %v5343_v32 = vpop.f32.mrb[56].mxu0 }
 0x386   : > { %v1800_v47 = vadd.f32 %v5343_v32, %v6511_v37  ;;  %v1780_v48 = vpop.f32.mrb[57].mxu0 }
 0x387   : > { %v1798_v5 = vadd.f32 %v1780_v48, %v6513_v39  ;;  %v5344_v53 = vpop.f32.mrb[58].mxu0 }
 0x388   : > { %v1783_v57 = vpop.f32.mrb[59].mxu0 }
 0x389   : > { %v1799_v58 = vadd.f32 %v1783_v57, %v6515_v2  ;;  %v5875_v57 = vld [vmem:[%s6991_s4 + $0x10] sm:$0x1f]  }
 0x395   : > { %v5353_v59 = vpop.f32.mrb[60].mxu0 }
 0x396   : > { %v2001_v16 = vadd.f32 %v5353_v59, %v1800_v47  ;;  %v1981_v63 = vpop.f32.mrb[61].mxu0 }
 0x397   : > { %v1999_v11 = vadd.f32 %v1981_v63, %v1798_v5  ;;  %v5354_v17 = vpop.f32.mrb[62].mxu0 }
 0x398   : > { %v1984_v29 = vpop.f32.mrb[63].mxu0 }
 0x399   : > { %v2000_v31 = vadd.f32 %v1984_v29, %v1799_v58  ;;  %v5876_v58 = vld [vmem:[%s6992_s5 + $0x10] sm:$0xff]  }
 0x3a5   : > { %v5363_v36 = vpop.f32.mrb[64].mxu0 }
 0x3a6   : > { %v2202_v3 = vadd.f32 %v5363_v36, %v2001_v16  ;;  %v2182_v50 = vpop.f32.mrb[65].mxu0 }
 0x3a7   : > { %v2200_v51 = vadd.f32 %v2182_v50, %v1999_v11  ;;  %v5364_v8 = vpop.f32.mrb[66].mxu0 }
 0x3a8   : > { %v2185_v9 = vpop.f32.mrb[67].mxu0 }
 0x3a9   : > { %v2201_v10 = vadd.f32 %v2185_v9, %v2000_v31 }
 0x3ad   : > { %v5369_v62 = vpop.f32.mrb[16].mxu0 }
 0x3ae   : > { %v2413_v15 = vadd.f32 %v5369_v62, %v4647_v14  ;;  %v2367_v19 = vpop.f32.mrb[17].mxu0  ;;  %v5877_v62 = vld [vmem:[%s6991_s4 + $0x18] sm:$0x1f]  }
 0x3af   : > { %v2411_v37 = vadd.f32 %v4647_v14, %v2367_v19  ;;  %v5370_v39 = vpop.f32.mrb[18].mxu0 }
 0x3b0   : > { %v2414_v2 = vadd.f32 %v5370_v39, %v4647_v14  ;;  %v2370_v34 = vpop.f32.mrb[19].mxu0  ;;  %v2420_v46 = vmax.f32 %v2413_v15, 0.0  ;;  %v5878_v15 = vld [vmem:[%s6992_s5 + $0x18] sm:$0xff]  }
 0x3b1   : > { %v2412_v45 = vadd.f32 %v4647_v14, %v2370_v34  ;;  %v2418_v43 = vmax.f32 %v2411_v37, 0.0 }
 0x3b2   : > { %v2421_v49 = vmax.f32 %v2414_v2, 0.0 }
 0x3b3   : > { %v2419_v7 = vmax.f32 %v2412_v45, 0.0 }
 0x3b4   : > { %v6590_v44 = vpack.c.bf16 %v2421_v49, %v2420_v46 }
 0x3b5   : > { %v6592_v52 = vpack.c.bf16 %v2419_v7, %v2418_v43  ;;  %v5373_v6 = vpop.f32.mrb[68].mxu0 }
 0x3b6   : > { %v2403_v54 = vadd.f32 %v5373_v6, %v2202_v3  ;;  %v2383_v55 = vpop.f32.mrb[69].mxu0 }
 0x3b7   : > { %v2401_v56 = vadd.f32 %v2383_v55, %v2200_v51  ;;  %v5374_v12 = vpop.f32.mrb[70].mxu0  ;;  %5376 = vmatpush3.bf16.msra.mxu0 %v6592_v52  ;;  %5388 = vmatpush3.bf16.msra.mxu1 %v6592_v52  ;;  %v5880_v55 = vld [vmem:[%s6992_s5 + $0x20] sm:$0xff]  }
 0x3b8   : > { %v2417_v60 = vadd.f32 %v4647_v14, %v2403_v54  ;;  %v2386_v61 = vpop.f32.mrb[71].mxu0  ;;  %5377 = vmatprep.subr.bf16.mxu0 %v6017_v4  ;;  %5389 = vmatprep.subr.bf16.mxu1 %v6017_v4  ;;  %v5879_v54 = vld [vmem:[%s6991_s4 + $0x20] sm:$0x1f]  }
 0x3b9   : > { %v2415_v13 = vadd.f32 %v4647_v14, %v2401_v56  ;;  %v2402_v18 = vadd.f32 %v2386_v61, %v2201_v10 }
 0x3ba   : > { %v2424_v20 = vmax.f32 %v2417_v60, 0.0 }
 0x3bb   : > { %v2416_v21 = vadd.f32 %v4647_v14, %v2402_v18  ;;  %5378 = vmatpush3.bf16.msra.mxu0 %v6590_v44  ;;  %5390 = vmatpush3.bf16.msra.mxu1 %v6590_v44  ;;  %v2422_v23 = vmax.f32 %v2415_v13, 0.0 }
 0x3bc   : > { %5379 = vmatprep.subr.bf16.mxu0 %v6017_v4  ;;  %5391 = vmatprep.subr.bf16.mxu1 %v6017_v4  ;;  %v2428_v25 = vpack.c.bf16 %v2424_v20, %v2424_v20 }
 0x3bd   : > { %v2423_v24 = vmax.f32 %v2416_v21, 0.0 }
 0x3be   : > { %v6608_v30 = vand.u32 %v2442_v22, %v2428_v25  ;;  %v5882_v22 = vld [vmem:[%s6992_s5 + $0x28] sm:$0xff]  }
 0x3bf   : > { %v6602_v26 = vpack.c.bf16 %v2423_v24, %v2422_v23 }
 0x3c1   : > { %5380 = vmatpush3.bf16.msra.mxu0 %v6602_v26  ;;  %5392 = vmatpush3.bf16.msra.mxu1 %v6602_v26 }
 0x3c2   : > { %5381 = vmatprep.subr.bf16.mxu0 %v6017_v4  ;;  %5393 = vmatprep.subr.bf16.mxu1 %v6017_v4 }
 0x3c5   : > { %5382 = vmatpush3.bf16.msra.mxu0 %v6608_v30  ;;  %5394 = vmatpush3.bf16.msra.mxu1 %v6608_v30 }
 0x3c6   : > { %5399 = vmatprep.subr.bf16.mxu0 %v6017_v4  ;;  %5405 = vmatprep.subr.bf16.mxu1 %v6017_v4 }
 0x3c8   : > { %5396 = vmatmul.mubr.msk.bf16.vlgmr.msra.gmra.mrb[112].mxu1 %vm2436_vm4, %v5871_v33  ;;  %5384 = vmatmul.mubr.msk.bf16.vlgmr.msra.gmra.mrb[72].mxu0 %vm2436_vm4, %v5872_v35 }
 0x3c9   : > { %5401 = vmatprep.mubr.msk.bf16.mxu0 %vm6018_vm2, %v6017_v4  ;;  %5407 = vmatprep.mubr.msk.bf16.mxu1 %vm6018_vm2, %v6017_v4 }
 0x3ca   : > { %5400 = vmatpush3.bf16.msra.mxu0 %v5873_v38  ;;  %5406 = vmatpush3.bf16.msra.mxu1 %v5874_v0 }
 0x3cb   : > { %5411 = vmatprep.subr.bf16.mxu0 %v6017_v4  ;;  %5423 = vmatprep.subr.bf16.mxu1 %v6017_v4 }
 0x49b   : > { %v2535_v1 = vpop.f32.mrb[112].mxu1  ;;  %v2480_v40 = vpop.f32.mrb[72].mxu0 }
 0x49c   : > { %v5397_v41 = vpop.f32.mrb[113].mxu1  ;;  %v5385_v42 = vpop.f32.mrb[73].mxu0 }
 0x49d   : > { %v2538_v28 = vpop.f32.mrb[114].mxu1  ;;  %v2483_v32 = vpop.f32.mrb[74].mxu0 }
 0x49e   : > { %v2542_v47 = vpack.c.bf16 %v2538_v28, %v2535_v1  ;;  %v2487_v48 = vpack.c.bf16 %v2483_v32, %v2480_v40  ;;  %v5398_v5 = vpop.f32.mrb[115].mxu1  ;;  %v5386_v53 = vpop.f32.mrb[75].mxu0 }
 0x49f   : > { %v5884_v5 = vld [vmem:[%s6992_s5 + $0x30] sm:$0xff]  }
 0x4a0   : > { %5402 = vmatmul.mubr.msk.bf16.vlgmr.msra.gmra.mrb[76].mxu0 %vm2552_vm5, %v2542_v47  ;;  %5408 = vmatmul.mubr.msk.bf16.vlgmr.msra.gmra.mrb[116].mxu1 %vm2552_vm5, %v2487_v48  ;;  %v5883_v48 = vld [vmem:[%s6991_s4 + $0x30] sm:$0x1f]  }
 0x4a1   : > { %5412 = vmatpush3.bf16.msra.mxu0 %v6592_v52  ;;  %5419 = vmatprep.mubr.msk.bf16.mxu0 %vm6018_vm2, %v6017_v4 }
 0x4a2   : > { %5413 = vmatprep.subr.bf16.mxu0 %v6017_v4  ;;  %5425 = vmatprep.mubr.msk.bf16.mxu1 %vm6018_vm2, %v6017_v4 }
 0x4a3   : > { %5424 = vmatpush3.bf16.msra.mxu1 %v5876_v58 }
 0x4a4   : > { %5429 = vmatprep.subr.bf16.mxu1 %v6017_v4 }
 0x4a5   : > { %5414 = vmatpush3.bf16.msra.mxu0 %v6590_v44 }
 0x4a6   : > { %5415 = vmatprep.subr.bf16.mxu0 %v6017_v4 }
 0x4a9   : > { %5416 = vmatpush3.bf16.msra.mxu0 %v6602_v26 }
 0x4aa   : > { %5417 = vmatprep.subr.bf16.mxu0 %v6017_v4 }
 0x4ad   : > { %5418 = vmatpush3.bf16.msra.mxu0 %v6608_v30 }
 0x4ae   : > { %5441 = vmatprep.subr.bf16.mxu0 %v6017_v4 }
 0x4b0   : > { %5420 = vmatmul.mubr.msk.bf16.vlgmr.msra.gmra.mrb[80].mxu0 %vm2436_vm4, %v5875_v57 }
 0x4b1   : > { %5443 = vmatprep.mubr.msk.bf16.mxu0 %vm6018_vm2, %v6017_v4  ;;  %5442 = vmatpush3.bf16.msra.mxu0 %v5878_v15 }
 0x4b2   : > { %5447 = vmatprep.subr.bf16.mxu0 %v6017_v4 }
 0x573   : > { %v2590_v59 = vpop.f32.mrb[76].mxu0  ;;  %v2640_v16 = vpop.f32.mrb[116].mxu1 }
 0x574   : > { %v5403_v63 = vpop.f32.mrb[77].mxu0  ;;  %v2641_v11 = vadd.f32 %v2640_v16, %v2590_v59  ;;  %v5409_v17 = vpop.f32.mrb[117].mxu1 }
 0x575   : > { %v2593_v29 = vpop.f32.mrb[78].mxu0  ;;  %v2643_v31 = vpop.f32.mrb[118].mxu1 }
 0x576   : > { %v5404_v36 = vpop.f32.mrb[79].mxu0  ;;  %v2644_v3 = vadd.f32 %v2643_v31, %v2593_v29  ;;  %v5410_v50 = vpop.f32.mrb[119].mxu1 }
 0x577   : > { %v5886_v50 = vld [vmem:[%s6992_s5 + $0x38] sm:$0xff]  }
 0x583   : > { %v2692_v51 = vpop.f32.mrb[80].mxu0 }
 0x584   : > { %v5421_v8 = vpop.f32.mrb[81].mxu0 }
 0x585   : > { %v2695_v9 = vpop.f32.mrb[82].mxu0 }
 0x586   : > { %v2699_v10 = vpack.c.bf16 %v2695_v9, %v2692_v51  ;;  %v5422_v14 = vpop.f32.mrb[83].mxu0 }
 0x588   : > { %5426 = vmatmul.mubr.msk.bf16.vlgmr.msra.gmra.mrb[120].mxu1 %vm2552_vm5, %v2699_v10 }
 0x589   : > { %5430 = vmatpush3.bf16.msra.mxu1 %v6592_v52  ;;  %5437 = vmatprep.mubr.msk.bf16.mxu1 %vm6018_vm2, %v6017_v4 }
 0x58a   : > { %5431 = vmatprep.subr.bf16.mxu1 %v6017_v4 }
 0x58d   : > { %5432 = vmatpush3.bf16.msra.mxu1 %v6590_v44 }
 0x58e   : > { %5433 = vmatprep.subr.bf16.mxu1 %v6017_v4 }
 0x591   : > { %5434 = vmatpush3.bf16.msra.mxu1 %v6602_v26 }
 0x592   : > { %5435 = vmatprep.subr.bf16.mxu1 %v6017_v4 }
 0x595   : > { %5436 = vmatpush3.bf16.msra.mxu1 %v6608_v30 }
 0x596   : > { %5459 = vmatprep.subr.bf16.mxu1 %v6017_v4 }
 0x598   : > { %5438 = vmatmul.mubr.msk.bf16.vlgmr.msra.gmra.mrb[124].mxu1 %vm2436_vm4, %v5877_v62 }
 0x599   : > { %5461 = vmatprep.mubr.msk.bf16.mxu1 %vm6018_vm2, %v6017_v4  ;;  %5460 = vmatpush3.bf16.msra.mxu1 %v5880_v55 }
 0x59a   : > { %5465 = vmatprep.subr.bf16.mxu1 %v6017_v4 }
 0x65b   : > { %v2746_v19 = vpop.f32.mrb[120].mxu1 }
 0x65c   : > { %v2753_v37 = vadd.f32 %v2746_v19, %v2641_v11  ;;  %v5427_v39 = vpop.f32.mrb[121].mxu1 }
 0x65d   : > { %v2749_v2 = vpop.f32.mrb[122].mxu1 }
 0x65e   : > { %v2754_v34 = vadd.f32 %v2749_v2, %v2644_v3  ;;  %v5428_v45 = vpop.f32.mrb[123].mxu1  ;;  %v5885_v3 = vld [vmem:[%s6991_s4 + $0x38] sm:$0x1f]  }
 0x66b   : > { %v2800_v46 = vpop.f32.mrb[124].mxu1 }
 0x66c   : > { %v5439_v49 = vpop.f32.mrb[125].mxu1 }
 0x66d   : > { %v2803_v43 = vpop.f32.mrb[126].mxu1 }
 0x66e   : > { %v2807_v7 = vpack.c.bf16 %v2803_v43, %v2800_v46  ;;  %v5440_v6 = vpop.f32.mrb[127].mxu1 }
 0x670   : > { %5444 = vmatmul.mubr.msk.bf16.vlgmr.msra.gmra.mrb[84].mxu0 %vm2552_vm5, %v2807_v7 }
 0x671   : > { %5448 = vmatpush3.bf16.msra.mxu0 %v6592_v52  ;;  %5455 = vmatprep.mubr.msk.bf16.mxu0 %vm6018_vm2, %v6017_v4 }
 0x672   : > { %5449 = vmatprep.subr.bf16.mxu0 %v6017_v4 }
 0x675   : > { %5450 = vmatpush3.bf16.msra.mxu0 %v6590_v44 }
 0x676   : > { %5451 = vmatprep.subr.bf16.mxu0 %v6017_v4 }
 0x679   : > { %5452 = vmatpush3.bf16.msra.mxu0 %v6602_v26 }
 0x67a   : > { %5453 = vmatprep.subr.bf16.mxu0 %v6017_v4 }
 0x67d   : > { %5454 = vmatpush3.bf16.msra.mxu0 %v6608_v30 }
 0x67e   : > { %5477 = vmatprep.subr.bf16.mxu0 %v6017_v4 }
 0x680   : > { %5456 = vmatmul.mubr.msk.bf16.vlgmr.msra.gmra.mrb[88].mxu0 %vm2436_vm4, %v5879_v54 }
 0x681   : > { %5479 = vmatprep.mubr.msk.bf16.mxu0 %vm6018_vm2, %v6017_v4  ;;  %5478 = vmatpush3.bf16.msra.mxu0 %v5882_v22 }
 0x682   : > { %5483 = vmatprep.subr.bf16.mxu0 %v6017_v4 }
 0x743   : > { %v2854_v56 = vpop.f32.mrb[84].mxu0 }
 0x744   : > { %v2861_v12 = vadd.f32 %v2854_v56, %v2753_v37  ;;  %v5445_v60 = vpop.f32.mrb[85].mxu0 }
 0x745   : > { %v2857_v61 = vpop.f32.mrb[86].mxu0 }
 0x746   : > { %v2862_v13 = vadd.f32 %v2857_v61, %v2754_v34  ;;  %v5446_v18 = vpop.f32.mrb[87].mxu0  ;;  %v5887_v34 = vld [vmem:[%s6991_s4 + $0x40] sm:$0x1f]  }
 0x753   : > { %v2908_v20 = vpop.f32.mrb[88].mxu0 }
 0x754   : > { %v5457_v21 = vpop.f32.mrb[89].mxu0 }
 0x755   : > { %v2911_v23 = vpop.f32.mrb[90].mxu0 }
 0x756   : > { %v2915_v24 = vpack.c.bf16 %v2911_v23, %v2908_v20  ;;  %v5458_v25 = vpop.f32.mrb[91].mxu0 }
 0x758   : > { %5462 = vmatmul.mubr.msk.bf16.vlgmr.msra.gmra.mrb[128].mxu1 %vm2552_vm5, %v2915_v24  ;;  %v6020_v24 = vmov 65535  }
 0x759   : > { %5466 = vmatpush3.bf16.msra.mxu1 %v6592_v52  ;;  %5473 = vmatprep.mubr.msk.bf16.mxu1 %vm6018_vm2, %v6017_v4  ;;  %v3422_v25 = vsel %vm3420_vm6, 4294967295, %v6020_v24  ;;  %v5896_v24 = vld [vmem:[%s6995_s8 + $0x38] sm:$0xff]  }
 0x75a   : > { %5467 = vmatprep.subr.bf16.mxu1 %v6017_v4 }
 0x75d   : > { %5468 = vmatpush3.bf16.msra.mxu1 %v6590_v44 }
 0x75e   : > { %5469 = vmatprep.subr.bf16.mxu1 %v6017_v4 }
 0x761   : > { %5470 = vmatpush3.bf16.msra.mxu1 %v6602_v26 }
 0x762   : > { %5471 = vmatprep.subr.bf16.mxu1 %v6017_v4 }
 0x765   : > { %5472 = vmatpush3.bf16.msra.mxu1 %v6608_v30 }
 0x766   : > { %5495 = vmatprep.subr.bf16.mxu1 %v6017_v4 }
 0x768   : > { %5474 = vmatmul.mubr.msk.bf16.vlgmr.msra.gmra.mrb[132].mxu1 %vm2436_vm4, %v5881_v27 }
 0x769   : > { %5497 = vmatprep.mubr.msk.bf16.mxu1 %vm6018_vm2, %v6017_v4  ;;  %5496 = vmatpush3.bf16.msra.mxu1 %v5884_v5 }
 0x76a   : > { %5501 = vmatprep.subr.bf16.mxu1 %v6017_v4 }
 0x82b   : > { %v2962_v33 = vpop.f32.mrb[128].mxu1 }
 0x82c   : > { %v2969_v35 = vadd.f32 %v2962_v33, %v2861_v12  ;;  %v5463_v38 = vpop.f32.mrb[129].mxu1  ;;  %v4716_v12 = vld [vmem:[%s6993_s6] ss:$0 sm:$0xff]  ;;  %v3423_v33 = vsel %vm3421_vm7, %v3422_v25, 0 }
 0x82d   : > { %v2965_v0 = vpop.f32.mrb[130].mxu1 }
 0x82e   : > { %v2970_v1 = vadd.f32 %v2965_v0, %v2862_v13  ;;  %v5464_v40 = vpop.f32.mrb[131].mxu1  ;;  %v4718_v0 = vld [vmem:[%s6994_s7 + $0x1] sm:$0x1] }
 0x82f   : > { %v5889_v40 = vld [vmem:[%s6995_s8 + $0x8] sm:$0xff]  }
 0x83b   : > { %v3016_v41 = vpop.f32.mrb[132].mxu1 }
 0x83c   : > { %v5475_v42 = vpop.f32.mrb[133].mxu1 }
 0x83d   : > { %v3019_v28 = vpop.f32.mrb[134].mxu1 }
 0x83e   : > { %v3023_v32 = vpack.c.bf16 %v3019_v28, %v3016_v41  ;;  %v5476_v47 = vpop.f32.mrb[135].mxu1  ;;  %v5890_v41 = vld [vmem:[%s6995_s8] sm:$0xff]  }
 0x840   : > { %5480 = vmatmul.mubr.msk.bf16.vlgmr.msra.gmra.mrb[92].mxu0 %vm2552_vm5, %v3023_v32 }
 0x841   : > { %5484 = vmatpush3.bf16.msra.mxu0 %v6592_v52  ;;  %5491 = vmatprep.mubr.msk.bf16.mxu0 %vm6018_vm2, %v6017_v4 }
 0x842   : > { %5485 = vmatprep.subr.bf16.mxu0 %v6017_v4 }
 0x845   : > { %5486 = vmatpush3.bf16.msra.mxu0 %v6590_v44 }
 0x846   : > { %5487 = vmatprep.subr.bf16.mxu0 %v6017_v4 }
 0x849   : > { %5488 = vmatpush3.bf16.msra.mxu0 %v6602_v26 }
 0x84a   : > { %5489 = vmatprep.subr.bf16.mxu0 %v6017_v4 }
 0x84d   : > { %5490 = vmatpush3.bf16.msra.mxu0 %v6608_v30 }
 0x84e   : > { %5513 = vmatprep.subr.bf16.mxu0 %v6017_v4 }
 0x850   : > { %5492 = vmatmul.mubr.msk.bf16.vlgmr.msra.gmra.mrb[96].mxu0 %vm2436_vm4, %v5883_v48 }
 0x851   : > { %5515 = vmatprep.mubr.msk.bf16.mxu0 %vm6018_vm2, %v6017_v4  ;;  %5514 = vmatpush3.bf16.msra.mxu0 %v5886_v50 }
 0x852   : > { %5519 = vmatprep.subr.bf16.mxu0 %v6017_v4 }
 0x913   : > { %v3070_v53 = vpop.f32.mrb[92].mxu0 }
 0x914   : > { %v3077_v57 = vadd.f32 %v3070_v53, %v2969_v35  ;;  %v5481_v58 = vpop.f32.mrb[93].mxu0 }
 0x915   : > { %v3073_v59 = vpop.f32.mrb[94].mxu0 }
 0x916   : > { %v3078_v16 = vadd.f32 %v3073_v59, %v2970_v1  ;;  %v5482_v63 = vpop.f32.mrb[95].mxu0  ;;  %v3415_v1 = vld [vmem:[%s6994_s7] sm:$0x1] }
 0x917   : > { %v4732_v63 = vld [vmem:[%s6994_s7 + $0x3] sm:$0x1] }
 0x923   : > { %v3124_v11 = vpop.f32.mrb[96].mxu0 }
 0x924   : > { %v5493_v17 = vpop.f32.mrb[97].mxu0 }
 0x925   : > { %v3127_v29 = vpop.f32.mrb[98].mxu0  ;;  %v4744_v17 = vld [vmem:[%s6994_s7 + $0x5] sm:$0x1] }
 0x926   : > { %v3131_v31 = vpack.c.bf16 %v3127_v29, %v3124_v11  ;;  %v5494_v36 = vpop.f32.mrb[99].mxu0  ;;  %v4738_v11 = vld [vmem:[%s6994_s7 + $0x4] sm:$0x1]  ;;  %v4750_v29 = vld [vmem:[%s6994_s7 + $0x6] sm:$0x1] }
 0x927   : > { %v4762_v36 = vld [vmem:[%s6994_s7 + $0x8] sm:$0x1] }
 0x928   : > { %5498 = vmatmul.mubr.msk.bf16.vlgmr.msra.gmra.mrb[136].mxu1 %vm2552_vm5, %v3131_v31  ;;  %v4756_v31 = vld [vmem:[%s6994_s7 + $0x7] sm:$0x1] }
 0x929   : > { %5502 = vmatpush3.bf16.msra.mxu1 %v6592_v52  ;;  %5509 = vmatprep.mubr.msk.bf16.mxu1 %vm6018_vm2, %v6017_v4 }
 0x92a   : > { %5503 = vmatprep.subr.bf16.mxu1 %v6017_v4 }
 0x92d   : > { %5504 = vmatpush3.bf16.msra.mxu1 %v6590_v44 }
 0x92e   : > { %5505 = vmatprep.subr.bf16.mxu1 %v6017_v4 }
 0x931   : > { %5506 = vmatpush3.bf16.msra.mxu1 %v6602_v26 }
 0x932   : > { %5507 = vmatprep.subr.bf16.mxu1 %v6017_v4 }
 0x935   : > { %5508 = vmatpush3.bf16.msra.mxu1 %v6608_v30 }
 0x936   : > { %5531 = vmatprep.subr.bf16.mxu1 %v6017_v4 }
 0x938   : > { %5510 = vmatmul.mubr.msk.bf16.vlgmr.msra.gmra.mrb[140].mxu1 %vm2436_vm4, %v5885_v3  ;;  %v5891_v3 = vld [vmem:[%s6995_s8 + $0x10] sm:$0xff]  }
 0x939   : > { %5533 = vmatprep.mubr.msk.bf16.mxu1 %vm6018_vm2, %v6017_v4 }
 0x9fb   : > { %v3178_v51 = vpop.f32.mrb[136].mxu1 }
 0x9fc   : > { %v3185_v8 = vadd.f32 %v3178_v51, %v3077_v57  ;;  %v5499_v9 = vpop.f32.mrb[137].mxu1 }
 0x9fd   : > { %v3181_v10 = vpop.f32.mrb[138].mxu1 }
 0x9fe   : > { %v3186_v14 = vadd.f32 %v3181_v10, %v3078_v16  ;;  %v5500_v62 = vpop.f32.mrb[139].mxu1  ;;  %v4726_v16 = vld [vmem:[%s6994_s7 + $0x2] sm:$0x1] }
 0xa0b   : > { %v3232_v15 = vpop.f32.mrb[140].mxu1 }
 0xa0c   : > { %v5511_v19 = vpop.f32.mrb[141].mxu1 }
 0xa0d   : > { %v3235_v37 = vpop.f32.mrb[142].mxu1 }
 0xa0e   : > { %v3239_v39 = vpack.c.bf16 %v3235_v37, %v3232_v15  ;;  %v5512_v2 = vpop.f32.mrb[143].mxu1 }
 0xa10   : > { %5516 = vmatmul.mubr.msk.bf16.vlgmr.msra.gmra.mrb[100].mxu0 %vm2552_vm5, %v3239_v39  ;;  %v5892_v39 = vld [vmem:[%s6995_s8 + $0x18] sm:$0xff]  }
 0xa11   : > { %5520 = vmatpush3.bf16.msra.mxu0 %v6592_v52  ;;  %5527 = vmatprep.mubr.msk.bf16.mxu0 %vm6018_vm2, %v6017_v4 }
 0xa12   : > { %5521 = vmatprep.subr.bf16.mxu0 %v6017_v4 }
 0xa15   : > { %5522 = vmatpush3.bf16.msra.mxu0 %v6590_v44  ;;  %v5888_v44 = vld [vmem:[%s6992_s5 + $0x40] sm:$0xff]  }
 0xa16   : > { %5523 = vmatprep.subr.bf16.mxu0 %v6017_v4  ;;  %5532 = vmatpush3.bf16.msra.mxu1 %v5888_v44 }
 0xa17   : > { %5537 = vmatprep.subr.bf16.mxu1 %v6017_v4 }
 0xa19   : > { %5524 = vmatpush3.bf16.msra.mxu0 %v6602_v26 }
 0xa1a   : > { %5525 = vmatprep.subr.bf16.mxu0 %v6017_v4 }
 0xa1d   : > { %5526 = vmatpush3.bf16.msra.mxu0 %v6608_v30 }
 0xa1e   : > { %5543 = vmatprep.subr.bf16.mxu0 %v6017_v4 }
 0xa20   : > { %5528 = vmatmul.mubr.msk.bf16.vlgmr.msra.gmra.mrb[104].mxu0 %vm2436_vm4, %v5887_v34 }
 0xa21   : > { %5545 = vmatprep.mubr.msk.bf16.mxu0 %vm6018_vm2, %v6017_v4 }
 0xae3   : > { %v3286_v52 = vpop.f32.mrb[100].mxu0 }
 0xae4   : > { %v3293_v26 = vadd.f32 %v3286_v52, %v3185_v8  ;;  %v5517_v45 = vpop.f32.mrb[101].mxu0 }
 0xae5   : > { %v3289_v46 = vpop.f32.mrb[102].mxu0  ;;  %v5893_v45 = vld [vmem:[%s6995_s8 + $0x20] sm:$0xff]  }
 0xae6   : > { %v3294_v49 = vadd.f32 %v3289_v46, %v3186_v14  ;;  %v5518_v30 = vpop.f32.mrb[103].mxu0 }
 0xaf3   : > { %v3340_v43 = vpop.f32.mrb[104].mxu0 }
 0xaf4   : > { %v5529_v7 = vpop.f32.mrb[105].mxu0 }
 0xaf5   : > { %v3343_v6 = vpop.f32.mrb[106].mxu0 }
 0xaf6   : > { %v3347_v54 = vpack.c.bf16 %v3343_v6, %v3340_v43  ;;  %v5530_v55 = vpop.f32.mrb[107].mxu0  ;;  %v5894_v6 = vld [vmem:[%s6995_s8 + $0x28] sm:$0xff]  }
 0xaf8   : > { %5534 = vmatmul.mubr.msk.bf16.vlgmr.msra.gmra.mrb[144].mxu1 %vm2552_vm5, %v3347_v54 }
 0xaf9   : > { %5539 = vmatprep.mubr.msk.bf16.mxu1 %vm6018_vm2, %v6017_v4 }
 0xbcb   : > { %v3394_v56 = vpop.f32.mrb[144].mxu1 }
 0xbcc   : > { %v3401_v60 = vadd.f32 %v3394_v56, %v3293_v26  ;;  %v5535_v61 = vpop.f32.mrb[145].mxu1 }
 0xbcd   : > { %v3397_v13 = vpop.f32.mrb[146].mxu1  ;;  %v5895_v61 = vld [vmem:[%s6995_s8 + $0x30] sm:$0xff]  }
 0xbce   : > { %v3410_v18 = vadd.f32 %v4716_v12, %v3401_v60  ;;  %v3402_v20 = vadd.f32 %v3397_v13, %v3294_v49  ;;  %v5536_v21 = vpop.f32.mrb[147].mxu1 }
 0xbd0   : > { %v3411_v23 = vadd.f32 %v4716_v12, %v3402_v20  ;;  %v3412_v27 = vmax.f32 %v3410_v18, 0.0 }
 0xbd2   : > { %v3413_v22 = vmax.f32 %v3411_v23, 0.0 }
 0xbd4   : > { %v3414_v35 = vpack.c.bf16 %v3413_v22, %v3412_v27 }
 0xbd6   : > { %v3425_v38 = vand.u32 %v3423_v33, %v3414_v35 }
 0xbd8   : > { %5538 = vmatpush3.bf16.msra.mxu1 %v3425_v38  ;;  %5544 = vmatpush3.bf16.msra.mxu0 %v3425_v38 }
 0xbd9   : > { %5549 = vmatprep.subr.bf16.mxu1 %v6017_v4  ;;  %5555 = vmatprep.subr.bf16.mxu0 %v6017_v4 }
 0xbdb   : > { %5546 = vmatmul.mubr.msk.bf16.vlgmr.msra.gmra.mrb[108].mxu0 %vm3416_vm8, %v4718_v0  ;;  %5540 = vmatmul.mubr.msk.bf16.vlgmr.msra.gmra.mrb[148].mxu1 %vm3416_vm8, %v3415_v1 }
 0xbdc   : > { %5550 = vmatpush3.bf16.msra.mxu1 %v5889_v40  ;;  %5551 = vmatprep.mubr.msk.bf16.mxu1 %vm6018_vm2, %v6017_v4 }
 0xbdd   : > { %5561 = vmatprep.subr.bf16.mxu1 %v6017_v4  ;;  %5557 = vmatprep.mubr.msk.bf16.mxu0 %vm6018_vm2, %v6017_v4 }
 0xbde   : > { %5556 = vmatpush3.bf16.msra.mxu0 %v5890_v41 }
 0xbdf   : > { %5567 = vmatprep.subr.bf16.mxu0 %v6017_v4 }
 0xcae   : > { %v3509_v42 = vpop.f32.mrb[108].mxu0  ;;  %v3461_v28 = vpop.f32.mrb[148].mxu1 }
 0xcaf   : > { %v3515_v32 = vpack.c.bf16 %v3509_v42, %v3509_v42  ;;  %v5547_v47 = vpop.f32.mrb[109].mxu0  ;;  %v3467_v48 = vpack.c.bf16 %v3461_v28, %v3461_v28  ;;  %v5541_v5 = vpop.f32.mrb[149].mxu1 }
 0xcb0   : > { %v3512_v53 = vpop.f32.mrb[110].mxu0  ;;  %v3464_v57 = vpop.f32.mrb[150].mxu1  ;;  %v4314_v5 = vld [vmem:[%s6997_s10] sm:$0xf] }
 0xcb1   : > { %5552 = vmatmul.mubr.msk.bf16.vlgmr.msra.gmra.mrb[152].mxu1 %vm2552_vm5, %v3515_v32  ;;  %v5548_v58 = vpop.f32.mrb[111].mxu0  ;;  %5558 = vmatmul.mubr.msk.bf16.vlgmr.msra.gmra.mrb[112].mxu0 %vm2552_vm5, %v3467_v48  ;;  %v5542_v59 = vpop.f32.mrb[151].mxu1  ;;  %v4321_v53 = vsel %vm3420_vm6, %v4314_v5, 0 }
 0xcb2   : > { %5562 = vmatpush3.bf16.msra.mxu1 %v3425_v38  ;;  %5563 = vmatprep.mubr.msk.bf16.mxu1 %vm6018_vm2, %v6017_v4 }
 0xcb3   : > { %5573 = vmatprep.subr.bf16.mxu1 %v6017_v4  ;;  %5569 = vmatprep.mubr.msk.bf16.mxu0 %vm6018_vm2, %v6017_v4 }
 0xcb4   : > { %5568 = vmatpush3.bf16.msra.mxu0 %v5891_v3 }
 0xcb5   : > { %5579 = vmatprep.subr.bf16.mxu0 %v6017_v4 }
 0xcb9   : > { %5564 = vmatmul.mubr.msk.bf16.vlgmr.msra.gmra.mrb[156].mxu1 %vm3416_vm8, %v4726_v16 }
 0xcba   : > { %5574 = vmatpush3.bf16.msra.mxu1 %v3425_v38  ;;  %5575 = vmatprep.mubr.msk.bf16.mxu1 %vm6018_vm2, %v6017_v4 }
 0xcbb   : > { %5585 = vmatprep.subr.bf16.mxu1 %v6017_v4 }
 0xcc1   : > { %5576 = vmatmul.mubr.msk.bf16.vlgmr.msra.gmra.mrb[160].mxu1 %vm3416_vm8, %v4732_v63 }
 0xcc2   : > { %5586 = vmatpush3.bf16.msra.mxu1 %v3425_v38  ;;  %5587 = vmatprep.mubr.msk.bf16.mxu1 %vm6018_vm2, %v6017_v4 }
 0xcc3   : > { %5597 = vmatprep.subr.bf16.mxu1 %v6017_v4 }
 0xcc9   : > { %5588 = vmatmul.mubr.msk.bf16.vlgmr.msra.gmra.mrb[164].mxu1 %vm3416_vm8, %v4738_v11 }
 0xcca   : > { %5598 = vmatpush3.bf16.msra.mxu1 %v3425_v38  ;;  %5599 = vmatprep.mubr.msk.bf16.mxu1 %vm6018_vm2, %v6017_v4 }
 0xccb   : > { %5609 = vmatprep.subr.bf16.mxu1 %v6017_v4 }
 0xcd1   : > { %5600 = vmatmul.mubr.msk.bf16.vlgmr.msra.gmra.mrb[168].mxu1 %vm3416_vm8, %v4744_v17 }
 0xcd2   : > { %5610 = vmatpush3.bf16.msra.mxu1 %v3425_v38  ;;  %5611 = vmatprep.mubr.msk.bf16.mxu1 %vm6018_vm2, %v6017_v4 }
 0xcd3   : > { %5621 = vmatprep.subr.bf16.mxu1 %v6017_v4 }
 0xcd9   : > { %5612 = vmatmul.mubr.msk.bf16.vlgmr.msra.gmra.mrb[172].mxu1 %vm3416_vm8, %v4750_v29 }
 0xcda   : > { %5622 = vmatpush3.bf16.msra.mxu1 %v3425_v38  ;;  %5623 = vmatprep.mubr.msk.bf16.mxu1 %vm6018_vm2, %v6017_v4 }
 0xcdb   : > { %5633 = vmatprep.subr.bf16.mxu1 %v6017_v4 }
 0xce1   : > { %5624 = vmatmul.mubr.msk.bf16.vlgmr.msra.gmra.mrb[176].mxu1 %vm3416_vm8, %v4756_v31 }
 0xce2   : > { %5634 = vmatpush3.bf16.msra.mxu1 %v3425_v38  ;;  %5635 = vmatprep.mubr.msk.bf16.mxu1 %vm6018_vm2, %v6017_v4  ;;  %v5897_v38 = vld [vmem:[%s6995_s8 + $0x40] sm:$0xff]  }
 0xce3   : > { %5645 = vmatprep.subr.bf16.mxu1 %v6017_v4 }
 0xce9   : > { %5636 = vmatmul.mubr.msk.bf16.vlgmr.msra.gmra.mrb[180].mxu1 %vm3416_vm8, %v4762_v36 }
 0xcea   : > { %5647 = vmatprep.mubr.msk.bf16.mxu1 %vm6018_vm2, %v6017_v4  ;;  %5646 = vmatpush3.bf16.msra.mxu1 %v4321_v53 }
 0xd84   : > { %v3562_v50 = vpop.f32.mrb[152].mxu1  ;;  %v3611_v51 = vpop.f32.mrb[112].mxu0 }
 0xd85   : > { %v5553_v8 = vpop.f32.mrb[153].mxu1  ;;  %v6872_v9 = vadd.f32 %v3611_v51, %v3562_v50  ;;  %v5559_v10 = vpop.f32.mrb[113].mxu0 }
 0xd86   : > { %v3565_v14 = vpop.f32.mrb[154].mxu1  ;;  %v3614_v62 = vpop.f32.mrb[114].mxu0 }
 0xd87   : > { %v5554_v15 = vpop.f32.mrb[155].mxu1  ;;  %v5560_v19 = vpop.f32.mrb[115].mxu0 }
 0xd8c   : > { %v3656_v37 = vpop.f32.mrb[156].mxu1 }
 0xd8d   : > { %v3662_v2 = vpack.c.bf16 %v3656_v37, %v3656_v37  ;;  %v5565_v34 = vpop.f32.mrb[157].mxu1 }
 0xd8e   : > { %v3659_v44 = vpop.f32.mrb[158].mxu1 }
 0xd8f   : > { %5570 = vmatmul.mubr.msk.bf16.vlgmr.msra.gmra.mrb[116].mxu0 %vm2552_vm5, %v3662_v2  ;;  %v5566_v52 = vpop.f32.mrb[159].mxu1 }
 0xd90   : > { %5580 = vmatpush3.bf16.msra.mxu0 %v5892_v39  ;;  %5581 = vmatprep.mubr.msk.bf16.mxu0 %vm6018_vm2, %v6017_v4 }
 0xd91   : > { %5591 = vmatprep.subr.bf16.mxu0 %v6017_v4 }
 0xd94   : > { %v3755_v26 = vpop.f32.mrb[160].mxu1 }
 0xd95   : > { %v3761_v46 = vpack.c.bf16 %v3755_v26, %v3755_v26  ;;  %v5577_v49 = vpop.f32.mrb[161].mxu1 }
 0xd96   : > { %v3758_v30 = vpop.f32.mrb[162].mxu1 }
 0xd97   : > { %5582 = vmatmul.mubr.msk.bf16.vlgmr.msra.gmra.mrb[120].mxu0 %vm2552_vm5, %v3761_v46  ;;  %v5578_v43 = vpop.f32.mrb[163].mxu1 }
 0xd98   : > { %5592 = vmatpush3.bf16.msra.mxu0 %v5893_v45  ;;  %5593 = vmatprep.mubr.msk.bf16.mxu0 %vm6018_vm2, %v6017_v4  ;;  %v4310_v43 = vld [vmem:[%s6996_s9] sm:$0x1] }
 0xd99   : > { %5603 = vmatprep.subr.bf16.mxu0 %v6017_v4 }
 0xd9c   : > { %v3854_v7 = vpop.f32.mrb[164].mxu1 }
 0xd9d   : > { %v3860_v54 = vpack.c.bf16 %v3854_v7, %v3854_v7  ;;  %v5589_v55 = vpop.f32.mrb[165].mxu1 }
 0xd9e   : > { %v3857_v56 = vpop.f32.mrb[166].mxu1 }
 0xd9f   : > { %5594 = vmatmul.mubr.msk.bf16.vlgmr.msra.gmra.mrb[124].mxu0 %vm2552_vm5, %v3860_v54  ;;  %v5590_v12 = vpop.f32.mrb[167].mxu1 }
 0xda0   : > { %5604 = vmatpush3.bf16.msra.mxu0 %v5894_v6  ;;  %5605 = vmatprep.mubr.msk.bf16.mxu0 %vm6018_vm2, %v6017_v4 }
 0xda1   : > { %5615 = vmatprep.subr.bf16.mxu0 %v6017_v4 }
 0xda4   : > { %v3953_v60 = vpop.f32.mrb[168].mxu1 }
 0xda5   : > { %v3959_v13 = vpack.c.bf16 %v3953_v60, %v3953_v60  ;;  %v5601_v18 = vpop.f32.mrb[169].mxu1 }
 0xda6   : > { %v3956_v20 = vpop.f32.mrb[170].mxu1  ;;  %v4315_v18 = vld [vmem:[%s6998_s11] sm:$0x1] }
 0xda7   : > { %5606 = vmatmul.mubr.msk.bf16.vlgmr.msra.gmra.mrb[128].mxu0 %vm2552_vm5, %v3959_v13  ;;  %v5602_v21 = vpop.f32.mrb[171].mxu1  ;;  %v5899_v13 = vld [vmem:[%s6999_s12 + $0x8] sm:$0xff]  }
 0xda8   : > { %5616 = vmatpush3.bf16.msra.mxu0 %v5895_v61  ;;  %5617 = vmatprep.mubr.msk.bf16.mxu0 %vm6018_vm2, %v6017_v4  ;;  %v5898_v61 = vld [vmem:[%s6999_s12] sm:$0xff]  }
 0xda9   : > { %5627 = vmatprep.subr.bf16.mxu0 %v6017_v4 }
 0xdac   : > { %v4052_v23 = vpop.f32.mrb[172].mxu1 }
 0xdad   : > { %v4058_v25 = vpack.c.bf16 %v4052_v23, %v4052_v23  ;;  %v5613_v27 = vpop.f32.mrb[173].mxu1 }
 0xdae   : > { %v4055_v22 = vpop.f32.mrb[174].mxu1 }
 0xdaf   : > { %5618 = vmatmul.mubr.msk.bf16.vlgmr.msra.gmra.mrb[132].mxu0 %vm2552_vm5, %v4058_v25  ;;  %v5614_v33 = vpop.f32.mrb[175].mxu1 }
 0xdb0   : > { %5628 = vmatpush3.bf16.msra.mxu0 %v5896_v24  ;;  %5629 = vmatprep.mubr.msk.bf16.mxu0 %vm6018_vm2, %v6017_v4 }
 0xdb1   : > { %5639 = vmatprep.subr.bf16.mxu0 %v6017_v4 }
 0xdb4   : > { %v4151_v35 = vpop.f32.mrb[176].mxu1 }
 0xdb5   : > { %v4157_v0 = vpack.c.bf16 %v4151_v35, %v4151_v35  ;;  %v5625_v1 = vpop.f32.mrb[177].mxu1 }
 0xdb6   : > { %v4154_v40 = vpop.f32.mrb[178].mxu1 }
 0xdb7   : > { %5630 = vmatmul.mubr.msk.bf16.vlgmr.msra.gmra.mrb[136].mxu0 %vm2552_vm5, %v4157_v0  ;;  %v5626_v41 = vpop.f32.mrb[179].mxu1 }
 0xdb8   : > { %5640 = vmatpush3.bf16.msra.mxu0 %v5897_v38  ;;  %5641 = vmatprep.mubr.msk.bf16.mxu0 %vm6018_vm2, %v6017_v4 }
 0xdb9   : > { %5651 = vmatprep.subr.bf16.mxu0 %v6017_v4 }
 0xdbc   : > { %v4250_v42 = vpop.f32.mrb[180].mxu1 }
 0xdbd   : > { %v4256_v28 = vpack.c.bf16 %v4250_v42, %v4250_v42  ;;  %v5637_v32 = vpop.f32.mrb[181].mxu1 }
 0xdbe   : > { %v4253_v47 = vpop.f32.mrb[182].mxu1 }
 0xdbf   : > { %5642 = vmatmul.mubr.msk.bf16.vlgmr.msra.gmra.mrb[140].mxu0 %vm2552_vm5, %v4256_v28  ;;  %v5638_v48 = vpop.f32.mrb[183].mxu1 }
 0xdc0   : > { %5655 = vmatprep.mubr.msk.bf16.mxu0 %vm6018_vm2, %v6017_v4  ;;  %5652 = vmatpush3.bf16.msra.mxu0 %v5898_v61 }
 0xdc1   : > { %5653 = vmatprep.subr.bf16.mxu0 %v6017_v4  ;;  %v4369_v4 = vld [vmem:[%s7000_s13] sm:$0x1] }
 0xdc4   : > { %5654 = vmatpush3.bf16.msra.mxu0 %v5899_v13 }
 0xe62   : > { %v3709_v57 = vpop.f32.mrb[116].mxu0 }
 0xe63   : > { %v3715_v58 = vadd.f32 %v3709_v57, %v6872_v9  ;;  %v5571_v59 = vpop.f32.mrb[117].mxu0 }
 0xe64   : > { %v3712_v16 = vpop.f32.mrb[118].mxu0 }
 0xe65   : > { %v5572_v63 = vpop.f32.mrb[119].mxu0 }
 0xe6a   : > { %v3808_v11 = vpop.f32.mrb[120].mxu0 }
 0xe6b   : > { %v3814_v17 = vadd.f32 %v3808_v11, %v3715_v58  ;;  %v5583_v29 = vpop.f32.mrb[121].mxu0 }
 0xe6c   : > { %v3811_v31 = vpop.f32.mrb[122].mxu0 }
 0xe6d   : > { %v5584_v36 = vpop.f32.mrb[123].mxu0 }
 0xe72   : > { %v3907_v3 = vpop.f32.mrb[124].mxu0 }
 0xe73   : > { %v3913_v50 = vadd.f32 %v3907_v3, %v3814_v17  ;;  %v5595_v51 = vpop.f32.mrb[125].mxu0 }
 0xe74   : > { %v3910_v8 = vpop.f32.mrb[126].mxu0 }
 0xe75   : > { %v5596_v10 = vpop.f32.mrb[127].mxu0 }
 0xe7a   : > { %v4006_v14 = vpop.f32.mrb[128].mxu0 }
 0xe7b   : > { %v4012_v62 = vadd.f32 %v4006_v14, %v3913_v50  ;;  %v5607_v15 = vpop.f32.mrb[129].mxu0 }
 0xe7c   : > { %v4009_v19 = vpop.f32.mrb[130].mxu0 }
 0xe7d   : > { %v5608_v37 = vpop.f32.mrb[131].mxu0 }
 0xe82   : > { %v4105_v39 = vpop.f32.mrb[132].mxu0 }
 0xe83   : > { %v4111_v9 = vadd.f32 %v4105_v39, %v4012_v62  ;;  %v5619_v2 = vpop.f32.mrb[133].mxu0 }
 0xe84   : > { %v4108_v34 = vpop.f32.mrb[134].mxu0 }
 0xe85   : > { %v5620_v44 = vpop.f32.mrb[135].mxu0 }
 0xe8a   : > { %v4204_v52 = vpop.f32.mrb[136].mxu0 }
 0xe8b   : > { %v4210_v26 = vadd.f32 %v4204_v52, %v4111_v9  ;;  %v5631_v45 = vpop.f32.mrb[137].mxu0 }
 0xe8c   : > { %v4207_v46 = vpop.f32.mrb[138].mxu0 }
 0xe8d   : > { %v5632_v49 = vpop.f32.mrb[139].mxu0 }
 0xe92   : > { %v4303_v30 = vpop.f32.mrb[140].mxu0 }
 0xe93   : > { %v4309_v7 = vadd.f32 %v4303_v30, %v4210_v26  ;;  %v5643_v6 = vpop.f32.mrb[141].mxu0 }
 0xe94   : > { %v4306_v54 = vpop.f32.mrb[142].mxu0 }
 0xe95   : > { %v4311_v55 = vadd.f32 %v4310_v43, %v4309_v7  ;;  %v5644_v56 = vpop.f32.mrb[143].mxu0 }
 0xe97   : > { %v4312_v12 = vmax.f32 %v4311_v55, 0.0 }
 0xe99   : > { %v4313_v60 = vpack.c.bf16 %v4312_v12, %v4312_v12 }
 0xe9b   : > { %5648 = vmatmul.mubr.msk.bf16.vlgmr.msra.gmra.mrb[184].mxu1 %vm4316_vm9, %v4313_v60 }
 0xf6e   : > { %v4357_v20 = vpop.f32.mrb[184].mxu1 }
 0xf6f   : > { %v4358_v21 = vadd.f32 %v4357_v20, %v4315_v18  ;;  %v5649_v23 = vpop.f32.mrb[185].mxu1 }
 0xf70   : > { %v4360_v24 = vpop.f32.mrb[186].mxu1 }
 0xf71   : > { %5900 = vtanh.f32 %v4358_v21  ;;  %v5650_v25 = vpop.f32.mrb[187].mxu1 }
 0xf7b   : > { %v5901_v27 = vpop.eup %5900 }
 0xf7c   : > { %v4364_v22 = vpack.c.bf16 %v5901_v27, %v5901_v27 }
 0xf7e   : > { %5656 = vmatmul.mubr.msk.bf16.vlgmr.msra.gmra.mrb[144].mxu0 %vm4382_vm10, %v4364_v22 }
0x1051   : > { %v4420_v33 = vpop.f32.mrb[144].mxu0 }
0x1052   : > { %v4421_v35 = vadd.f32 %v4420_v33, %v4369_v4  ;;  %v5657_v38 = vpop.f32.mrb[145].mxu0 }
0x1053   : > { %v4423_v0 = vpop.f32.mrb[146].mxu0 }
0x1054   : > { %4426 = vst [vmem:[%s474_s28] sm:$0x1] %v4421_v35  ;;  %v5658_v1 = vpop.f32.mrb[147].mxu0 }
0x1055   : > { %5959 = shalt.err (!%p5956_p7)
}
0x1056   : > { %s5960_s20 = scalar_lea.hbm %s6945_s15, 16  ;;  %s5964_s25 = scalar_lea.hbm %s7001_s14, 32 }
0x1057   : > { %p5961_p8 = scmp.ne.s32.totalorder %s6945_s15, %s5960_s20  ;;  %p5965_p1 = scmp.lt.u32.totalorder %s6945_s15, %s7001_s14 }
0x1058   : > { %p5966_p0 = scmp.lt.u32.totalorder %s5964_s25, %s5960_s20  ;;  %p5968_p6 = scmp.lt.u32.totalorder %s5960_s20, %s6945_s15 }
0x1059   : > { %p5962_p11 = pnand %p5961_p8, %p7020_p9 }
0x105a   : > { %p5967_p5 = por %p5966_p0, %p5965_p1 }
0x105b   : > { %p5963_p13 = pneg %p5962_p11 }
0x105c   : > { %p5969_p10 = por %p5968_p6, %p5967_p5 }
0x105e   : > { %p5970_p12 = pnand %p5969_p10, %p5963_p13 }
0x1060   : > { %5973 = shalt.err (!%p5970_p12)
}
0x1061   : > { %5704 = dma.vmem_to_hbm [thread:$0]  (%p7020_p9), %s6947_s26, 16, %s6945_s15, %s4428_s22  }
0x1062 PF: > { %s7021_s17 = sld [smem:[#allocation11_spill]]  ;;  %p5716_p2 = scmp.ge.s32.totalorder %s6012_s16, 2 }
0x1063   : > { %s4452_s19 = sand.u32 1, %s6000_s29  }
0x1064   : > { %s4453_s24 = scalar_lea.sflag [#allocation4], %s4452_s19 }
0x1068   : > { %p7022_p3 = scmp.ne.s32.totalorder %s7021_s17, 0 }
0x106a   : > { %p5711_p4 = pnand %p5716_p2, %p7022_p3 }
0x106c   : > { %5995 = dma.done.wait (!%p5711_p4), %s4453_s24, 16  }
0x106d   : > { %5997 = vsyncadd (!%p5711_p4), %s4453_s24, 4294967280  ;;  %s7023_s16 = sld [smem:[#allocation9_spill]]  ;;  %s7024_s20 = sld [smem:[#allocation8_spill]] }
0x106e   : > { %s7025_s15 = sld [smem:[#allocation10_spill]]  ;;  %s7026_s29 = smov %s6004_s30 }
0x1073   : > { %p25_p7 = scmp.ge.s32.totalorder %s7023_s16, 4   ;;  %s7027_s30 = smov %s7024_s20 }
0x1075   :  { %27 = sbr.rel (!%p25_p7) target bundleno = 4 (0x4), region = 164 }
0x107c   :  { %4457 = vsyncpa [#allocation3], 1 }
0x107d   :  { %4459 = vsyncpa [#allocation3 + $0x1], 1 }
0x107e   :  { %4460 = vsyncpa [#allocation4], 1 }
0x107f   :  { %4462 = vsyncpa [#allocation4 + $0x1], 1 }

</bundles_post_ra>
